<compile_context>
chip_gen: v7x
topology: tpu7x:2x2x1
jax: 0.10.0
libtpu: 0.0.40
codegen_flags: <defaults>
</compile_context>

<pallas_src>
import math

import jax
import jax.numpy as jnp
from jax.experimental import pallas as pl
from jax.experimental.pallas import tpu as pltpu


def _gelu_tanh(x):
    # GELU with tanh approximation (matches torch nn.GELU(approximate='tanh')).
    c = math.sqrt(2.0 / math.pi)
    return 0.5 * x * (1.0 + jnp.tanh(c * (x + 0.044715 * x * x * x)))


def _round_up(x, m):
    return ((x + m - 1) // m) * m


def _vmem_capacity_bytes():
    # Generation-aware VMEM capacity (v5e/v6e: 128 MiB, v7x: 64 MiB per TC).
    try:
        return int(pltpu.get_tpu_info().vmem_capacity_bytes)
    except Exception:
        return 64 << 20  # conservative fallback (v7x per-TC size)


# ------------------------------------------------------------------ kernels --

def _mlp_kernel_fused(x_ref, w1_ref, w2_ref, out_ref):
    # Weights fully VMEM-resident: fused fc1 -> GELU -> fc2 per M tile.
    xb = x_ref[...].astype(w1_ref.dtype)           # in-kernel bf16 cast
    h = jnp.dot(xb, w1_ref[...], preferred_element_type=jnp.float32)
    h = _gelu_tanh(h)                               # GELU in f32 (EUP tanh)
    o = jnp.dot(h.astype(w2_ref.dtype), w2_ref[...],
                preferred_element_type=jnp.float32)
    out_ref[...] = o.astype(out_ref.dtype)


def _mlp_kernel_hchunked(x_ref, w1_ref, w2_ref, out_ref, acc_ref):
    # Hidden dim tiled:  out = sum_h gelu(x @ w1[:, h]) @ w2[h, :]
    hi = pl.program_id(1)

    @pl.when(hi == 0)
    def _init():
        acc_ref[...] = jnp.zeros_like(acc_ref)

    xb = x_ref[...].astype(w1_ref.dtype)
    h = jnp.dot(xb, w1_ref[...], preferred_element_type=jnp.float32)
    h = _gelu_tanh(h)
    acc_ref[...] += jnp.dot(h.astype(w2_ref.dtype), w2_ref[...],
                            preferred_element_type=jnp.float32)

    @pl.when(hi == pl.num_programs(1) - 1)
    def _store():
        out_ref[...] = acc_ref[...].astype(out_ref.dtype)


# ----------------------------------------------------------------- tiling ----

def _choose_block_m(M, block_m):
    # bf16 packs 2 rows/sublane -> keep the M tile a multiple of 16.
    bm = min(block_m, _round_up(M, 16))
    # Prefer >= 4 grid steps along M (prefetch overlap) while keeping bm >= 128.
    while bm > 128 and M // bm < 4:
        bm //= 2
    if M >= 128:
        bm = max(bm, 128)
    return _round_up(bm, 16)


def _choose_block_h(C, H, O, bm, x_bpe, out_bpe, w_bpe, budget, max_bh=None):
    """Pick the hidden-dim tile.  bh == H means fully-resident weights."""

    def footprint(bh, n_wbuf):
        return (2 * bm * C * x_bpe                  # x tile (double-buffered)
                + 2 * bm * O * out_bpe              # out tile (double-buffered)
                + bm * O * 4                        # f32 accumulator / staging
                + n_wbuf * (C * bh + bh * O) * w_bpe  # weight tiles
                + bm * bh * 4)                      # f32 fc1 intermediate

    fused_allowed = (max_bh is None) or (max_bh >= H)
    if fused_allowed and footprint(H, 1) <= budget:
        return H, footprint(H, 1)

    cap = H if max_bh is None else min(H, max_bh)
    divisors = [bh for bh in range(128, cap + 1, 128) if H % bh == 0 and bh < H]
    if not divisors:
        # TODO(synk): hidden dims without a 128-multiple divisor fall back to
        # fully-resident weights (may exceed the soft VMEM budget).
        return H, footprint(H, 1)

    fitting = [bh for bh in divisors if footprint(bh, 2) <= budget]
    bh = max(fitting) if fitting else min(divisors)
    return bh, footprint(bh, 2)


# ---------------------------------------------------------------- wrapper ----

def mlp_forward(x, w1, w2, *, block_m=256, compute_dtype=jnp.bfloat16,
                out_dtype=None, max_hidden_block=None, interpret=False):
    """x: (..., C), w1: (C, H), w2: (H, O) -> (..., O)."""
    C = x.shape[-1]
    H = w1.shape[1]
    O = w2.shape[1]
    assert w1.shape[0] == C and w2.shape[0] == H

    # Weights should already be stored in compute_dtype (one-time cast by the
    # caller); cast here only as a fallback so semantics never break.
    if w1.dtype != compute_dtype:
        w1 = w1.astype(compute_dtype)
    if w2.dtype != compute_dtype:
        w2 = w2.astype(compute_dtype)

    out_dtype = x.dtype if out_dtype is None else out_dtype

    lead_shape = x.shape[:-1]
    x2 = x.reshape(-1, C)
    M = x2.shape[0]

    bm = _choose_block_m(M, block_m)
    Mp = _round_up(M, bm)
    if Mp != M:
        # TODO(synk): the ragged last M tile could be masked in-kernel instead
        # of padded in the wrapper; padding rows are zeros and are sliced off.
        x2 = jnp.pad(x2, ((0, Mp - M), (0, 0)))

    x_bpe = jnp.dtype(x2.dtype).itemsize
    w_bpe = jnp.dtype(compute_dtype).itemsize
    out_bpe = jnp.dtype(out_dtype).itemsize

    vmem_cap = _vmem_capacity_bytes()
    budget = vmem_cap - (8 << 20)                   # headroom for compiler scratch
    bh, needed = _choose_block_h(C, H, O, bm, x_bpe, out_bpe, w_bpe, budget,
                                 max_bh=max_hidden_block)

    # Never request the full physical VMEM; leave headroom on every generation.
    vmem_limit = int(min(vmem_cap - (4 << 20),
                         max(32 << 20, int(needed * 1.5))))

    cost = pl.CostEstimate(
        flops=2 * M * (C * H + H * O),
        transcendentals=M * H,
        bytes_accessed=(M * C * x_bpe + (C * H + H * O) * w_bpe
                        + M * O * out_bpe),
    )

    if bh == H:
        # Fused path: weights VMEM-resident across the whole (parallel) M axis.
        grid = (Mp // bm,)

        def build(single_buffer_weights):
            w_mode = pl.Buffered(1) if single_buffer_weights else None
            return pl.pallas_call(
                _mlp_kernel_fused,
                out_shape=jax.ShapeDtypeStruct((Mp, O), out_dtype),
                grid=grid,
                in_specs=[
                    pl.BlockSpec((bm, C), lambda i: (i, 0)),   # activations
                    pl.BlockSpec((C, H), lambda i: (0, 0),     # fc1 weight
                                 pipeline_mode=w_mode),
                    pl.BlockSpec((H, O), lambda i: (0, 0),     # fc2 weight
                                 pipeline_mode=w_mode),
                ],
                out_specs=pl.BlockSpec((bm, O), lambda i: (i, 0)),
                compiler_params=pltpu.CompilerParams(
                    dimension_semantics=("parallel",),
                    vmem_limit_bytes=vmem_limit),
                cost_estimate=cost,
                interpret=interpret,
            )

        try:
            out = build(True)(x2, w1, w2)
        except Exception:
            # Robust fallback if single-buffered weight pipelining is rejected.
            out = build(False)(x2, w1, w2)
    else:
        # H-chunked path: accumulate fc2 partial products in an f32 scratch.
        grid = (Mp // bm, H // bh)
        out = pl.pallas_call(
            _mlp_kernel_hchunked,
            out_shape=jax.ShapeDtypeStruct((Mp, O), out_dtype),
            grid=grid,
            in_specs=[
                pl.BlockSpec((bm, C), lambda i, j: (i, 0)),    # activations
                pl.BlockSpec((C, bh), lambda i, j: (0, j)),    # fc1 weight chunk
                pl.BlockSpec((bh, O), lambda i, j: (j, 0)),    # fc2 weight chunk
            ],
            out_specs=pl.BlockSpec((bm, O), lambda i, j: (i, 0)),
            scratch_shapes=[pltpu.VMEM((bm, O), jnp.float32)],
            compiler_params=pltpu.CompilerParams(
                dimension_semantics=("parallel", "arbitrary"),
                vmem_limit_bytes=vmem_limit),
            cost_estimate=cost,
            interpret=interpret,
        )(x2, w1, w2)

    if Mp != M:
        out = out[:M]
    return out.reshape(*lead_shape, O)


# ------------------------------------------------------------------- demo ----

def _mlp_reference(x, w1, w2, compute_dtype=jnp.bfloat16):
    # Pure-JAX reference with matching numerics (bf16 operands, f32 accum).
    C = x.shape[-1]
    xb = x.reshape(-1, C).astype(compute_dtype)
    h = jnp.dot(xb, w1.astype(compute_dtype), preferred_element_type=jnp.float32)
    h = _gelu_tanh(h)
    o = jnp.dot(h.astype(compute_dtype), w2.astype(compute_dtype),
                preferred_element_type=jnp.float32)
    return o.reshape(*x.shape[:-1], w2.shape[1]).astype(x.dtype)


if __name__ == "__main__":
    # Small but MXU-friendly shapes: M = B*T = 512 rows, C/H/O multiples of 256.
    B, T, C, H, O = 2, 256, 256, 512, 256

    key = jax.random.PRNGKey(0)
    kx, k1, k2 = jax.random.split(key, 3)
    x = jax.random.normal(kx, (B, T, C), jnp.float32)
    # Weights stored pre-transposed as [in, out] and pre-cast to bf16 once
    # (the "stored params" — avoids a per-call f32->bf16 pass).
    w1 = (jax.random.normal(k1, (C, H), jnp.float32) / math.sqrt(C)).astype(jnp.bfloat16)
    w2 = (jax.random.normal(k2, (H, O), jnp.float32) / math.sqrt(H)).astype(jnp.bfloat16)

    # Fused path (weights fully VMEM-resident, single-buffered).
    out = jax.block_until_ready(mlp_forward(x, w1, w2, block_m=256))
    assert out.shape == (B, T, O)

    # H-chunked path (forced) — exercises the accumulator/pl.when pipeline.
    out_chunked = jax.block_until_ready(
        mlp_forward(x, w1, w2, block_m=256, max_hidden_block=256))
    assert out_chunked.shape == (B, T, O)

    ref = _mlp_reference(x, w1, w2)
    assert jnp.allclose(out, ref, atol=5e-3, rtol=5e-3)
    assert jnp.allclose(out_chunked, ref, atol=5e-3, rtol=5e-3)

    # Sanity check against full-precision module semantics (bf16 quant error).
    ref_f32 = _gelu_tanh(x @ w1.astype(jnp.float32)) @ w2.astype(jnp.float32)
    assert jnp.allclose(out, ref_f32, atol=1e-1, rtol=1e-1)

    print("KERNEL_OK")
</pallas_src>

<mosaic_0001>
module attributes {stable_mosaic.version = 11 : i64} {
  func.func @_mlp_kernel_fused(%arg0: i32, %arg1: memref<128x256xf32, #tpu.memory_space<vmem>>, %arg2: memref<256x512xbf16, #tpu.memory_space<vmem>>, %arg3: memref<512x256xbf16, #tpu.memory_space<vmem>>, %arg4: memref<128x256xf32, #tpu.memory_space<vmem>>) attributes {dimension_semantics = [#tpu.dimension_semantics<parallel>], iteration_bounds = array<i64: 4>, scalar_prefetch = 0 : i64, scratch_operands = 0 : i64, tpu.core_type = #tpu.core_type<tc>, window_params = [{transform_indices = @transform_0, window_bounds = array<i64: 128, 256>}, {pipeline_mode = #tpu.pipeline_mode<synchronous>, transform_indices = @transform_1, window_bounds = array<i64: 256, 512>}, {pipeline_mode = #tpu.pipeline_mode<synchronous>, transform_indices = @transform_2, window_bounds = array<i64: 512, 256>}, {transform_indices = @transform_3, window_bounds = array<i64: 128, 256>}]} {
    %c0 = arith.constant 0 : index
    %c0_0 = arith.constant 0 : index
    %0 = vector.load %arg1[%c0, %c0_0] : memref<128x256xf32, #tpu.memory_space<vmem>>, vector<128x256xf32>
    %1 = arith.truncf %0 : vector<128x256xf32> to vector<128x256xbf16>
    %c0_1 = arith.constant 0 : index
    %c0_2 = arith.constant 0 : index
    %2 = vector.load %arg2[%c0_1, %c0_2] : memref<256x512xbf16, #tpu.memory_space<vmem>>, vector<256x512xbf16>
    %cst = arith.constant dense<0.000000e+00> : vector<128x512xf32>
    %3 = tpu.matmul %1, %2, %cst {dimension_numbers = #tpu.dot_dimension_numbers<[1], [0], [0], [1], [0, 0, 1, 1], [], []>} : vector<128x256xbf16>, vector<256x512xbf16>, vector<128x512xf32> -> vector<128x512xf32>
    %cst_3 = arith.constant 5.000000e-01 : f32
    %4 = vector.broadcast %cst_3 : f32 to vector<128x512xf32>
    %5 = arith.mulf %4, %3 : vector<128x512xf32>
    %cst_4 = arith.constant 4.471500e-02 : f32
    %6 = vector.broadcast %cst_4 : f32 to vector<128x512xf32>
    %7 = arith.mulf %6, %3 : vector<128x512xf32>
    %8 = arith.mulf %7, %3 : vector<128x512xf32>
    %9 = arith.mulf %8, %3 : vector<128x512xf32>
    %10 = arith.addf %3, %9 : vector<128x512xf32>
    %cst_5 = arith.constant 0.797884583 : f32
    %11 = vector.broadcast %cst_5 : f32 to vector<128x512xf32>
    %12 = arith.mulf %11, %10 : vector<128x512xf32>
    %13 = math.tanh %12 : vector<128x512xf32>
    %cst_6 = arith.constant 1.000000e+00 : f32
    %14 = vector.broadcast %cst_6 : f32 to vector<128x512xf32>
    %15 = arith.addf %14, %13 : vector<128x512xf32>
    %16 = arith.mulf %5, %15 : vector<128x512xf32>
    %17 = arith.truncf %16 : vector<128x512xf32> to vector<128x512xbf16>
    %c0_7 = arith.constant 0 : index
    %c0_8 = arith.constant 0 : index
    %18 = vector.load %arg3[%c0_7, %c0_8] : memref<512x256xbf16, #tpu.memory_space<vmem>>, vector<512x256xbf16>
    %cst_9 = arith.constant dense<0.000000e+00> : vector<128x256xf32>
    %19 = tpu.matmul %17, %18, %cst_9 {dimension_numbers = #tpu.dot_dimension_numbers<[1], [0], [0], [1], [0, 0, 1, 1], [], []>} : vector<128x512xbf16>, vector<512x256xbf16>, vector<128x256xf32> -> vector<128x256xf32>
    %c0_10 = arith.constant 0 : index
    %c0_11 = arith.constant 0 : index
    %20 = vector.load %arg4[%c0_10, %c0_11] : memref<128x256xf32, #tpu.memory_space<vmem>>, vector<128x256xf32>
    tpu.vector_store %arg4[%c0_10, %c0_11], %19 {strides = array<i32>} : memref<128x256xf32, #tpu.memory_space<vmem>>, vector<128x256xf32>,
    return
  }
  func.func @transform_0(%arg0: i32) -> (i32, i32) {
    %c0_i32 = arith.constant 0 : i32
    %c0_i32_0 = arith.constant 0 : i32
    return %arg0, %c0_i32 : i32, i32
  }
  func.func @transform_1(%arg0: i32) -> (i32, i32) {
    %c0_i32 = arith.constant 0 : i32
    %c0_i32_0 = arith.constant 0 : i32
    %c0_i32_1 = arith.constant 0 : i32
    return %c0_i32, %c0_i32_0 : i32, i32
  }
  func.func @transform_2(%arg0: i32) -> (i32, i32) {
    %c0_i32 = arith.constant 0 : i32
    %c0_i32_0 = arith.constant 0 : i32
    %c0_i32_1 = arith.constant 0 : i32
    return %c0_i32, %c0_i32_0 : i32, i32
  }
  func.func @transform_3(%arg0: i32) -> (i32, i32) {
    %c0_i32 = arith.constant 0 : i32
    %c0_i32_0 = arith.constant 0 : i32
    return %arg0, %c0_i32 : i32, i32
  }
}

module attributes {stable_mosaic.version = 11 : i64} {
  func.func @_mlp_kernel_fused(%arg0: i32, %arg1: memref<128x256xf32, #tpu.memory_space<vmem>>, %arg2: memref<256x512xbf16, #tpu.memory_space<vmem>>, %arg3: memref<512x256xbf16, #tpu.memory_space<vmem>>, %arg4: memref<128x256xf32, #tpu.memory_space<vmem>>) attributes {dimension_semantics = [#tpu.dimension_semantics<parallel>], iteration_bounds = array<i64: 4>, scalar_prefetch = 0 : i64, scratch_operands = 0 : i64, tpu.core_type = #tpu.core_type<tc>, window_params = [{transform_indices = @transform_0, window_bounds = array<i64: 128, 256>}, {pipeline_mode = #tpu.pipeline_mode<synchronous>, transform_indices = @transform_1, window_bounds = array<i64: 256, 512>}, {pipeline_mode = #tpu.pipeline_mode<synchronous>, transform_indices = @transform_2, window_bounds = array<i64: 512, 256>}, {transform_indices = @transform_3, window_bounds = array<i64: 128, 256>}]} {
    %c0 = arith.constant 0 : index
    %c0_0 = arith.constant 0 : index
    %0 = vector.load %arg1[%c0, %c0_0] : memref<128x256xf32, #tpu.memory_space<vmem>>, vector<128x256xf32>
    %1 = arith.truncf %0 : vector<128x256xf32> to vector<128x256xbf16>
    %c0_1 = arith.constant 0 : index
    %c0_2 = arith.constant 0 : index
    %2 = vector.load %arg2[%c0_1, %c0_2] : memref<256x512xbf16, #tpu.memory_space<vmem>>, vector<256x512xbf16>
    %cst = arith.constant dense<0.000000e+00> : vector<128x512xf32>
    %3 = tpu.matmul %1, %2, %cst {dimension_numbers = #tpu.dot_dimension_numbers<[1], [0], [0], [1], [0, 0, 1, 1], [], []>} : vector<128x256xbf16>, vector<256x512xbf16>, vector<128x512xf32> -> vector<128x512xf32>
    %cst_3 = arith.constant 5.000000e-01 : f32
    %4 = vector.broadcast %cst_3 : f32 to vector<128x512xf32>
    %5 = arith.mulf %4, %3 : vector<128x512xf32>
    %cst_4 = arith.constant 4.471500e-02 : f32
    %6 = vector.broadcast %cst_4 : f32 to vector<128x512xf32>
    %7 = arith.mulf %6, %3 : vector<128x512xf32>
    %8 = arith.mulf %7, %3 : vector<128x512xf32>
    %9 = arith.mulf %8, %3 : vector<128x512xf32>
    %10 = arith.addf %3, %9 : vector<128x512xf32>
    %cst_5 = arith.constant 0.797884583 : f32
    %11 = vector.broadcast %cst_5 : f32 to vector<128x512xf32>
    %12 = arith.mulf %11, %10 : vector<128x512xf32>
    %13 = math.tanh %12 : vector<128x512xf32>
    %cst_6 = arith.constant 1.000000e+00 : f32
    %14 = vector.broadcast %cst_6 : f32 to vector<128x512xf32>
    %15 = arith.addf %14, %13 : vector<128x512xf32>
    %16 = arith.mulf %5, %15 : vector<128x512xf32>
    %17 = arith.truncf %16 : vector<128x512xf32> to vector<128x512xbf16>
    %c0_7 = arith.constant 0 : index
    %c0_8 = arith.constant 0 : index
    %18 = vector.load %arg3[%c0_7, %c0_8] : memref<512x256xbf16, #tpu.memory_space<vmem>>, vector<512x256xbf16>
    %cst_9 = arith.constant dense<0.000000e+00> : vector<128x256xf32>
    %19 = tpu.matmul %17, %18, %cst_9 {dimension_numbers = #tpu.dot_dimension_numbers<[1], [0], [0], [1], [0, 0, 1, 1], [], []>} : vector<128x512xbf16>, vector<512x256xbf16>, vector<128x256xf32> -> vector<128x256xf32>
    %c0_10 = arith.constant 0 : index
    %c0_11 = arith.constant 0 : index
    %20 = vector.load %arg4[%c0_10, %c0_11] : memref<128x256xf32, #tpu.memory_space<vmem>>, vector<128x256xf32>
    tpu.vector_store %arg4[%c0_10, %c0_11], %19 {strides = array<i32>} : memref<128x256xf32, #tpu.memory_space<vmem>>, vector<128x256xf32>,
    return
  }
  func.func @transform_0(%arg0: i32) -> (i32, i32) {
    %c0_i32 = arith.constant 0 : i32
    %c0_i32_0 = arith.constant 0 : i32
    return %arg0, %c0_i32 : i32, i32
  }
  func.func @transform_1(%arg0: i32) -> (i32, i32) {
    %c0_i32 = arith.constant 0 : i32
    %c0_i32_0 = arith.constant 0 : i32
    %c0_i32_1 = arith.constant 0 : i32
    return %c0_i32, %c0_i32_0 : i32, i32
  }
  func.func @transform_2(%arg0: i32) -> (i32, i32) {
    %c0_i32 = arith.constant 0 : i32
    %c0_i32_0 = arith.constant 0 : i32
    %c0_i32_1 = arith.constant 0 : i32
    return %c0_i32, %c0_i32_0 : i32, i32
  }
  func.func @transform_3(%arg0: i32) -> (i32, i32) {
    %c0_i32 = arith.constant 0 : i32
    %c0_i32_0 = arith.constant 0 : i32
    return %arg0, %c0_i32 : i32, i32
  }
}

</mosaic_0001>

<bundles_post_ra>
// kernel: tpu_custom_call.1
= control target key start
LH: loop header
LB: loop body
LE: loop exit
PB: predicated region body
PF: predicated region fallthrough
CT: control target
= control target key end

     0   :  { %8 = vsyncpa [#allocation3], 0  ;;  %s3863_s0 = inlined_call_operand.hbm [shape: f32[512,256], index: 0, kind: input, shape index: {}]   ;;  %s3864_s1 = inlined_call_operand.hbm [shape: bf16[256,512], index: 1, kind: input, shape index: {}]   ;;  %s3865_s2 = inlined_call_operand.hbm [shape: bf16[512,256], index: 2, kind: input, shape index: {}]   ;;  %s3866_s3 = inlined_call_operand.hbm [shape: f32[512,256], index: 3, kind: output, shape index: {}]  }
   0x1   :  { %10 = vsyncpa [#allocation3 + $0x1], 0 }
   0x2   :  { %11 = vsyncpa [#allocation6], 0 }
   0x3   :  { %12 = vsyncpa [#allocation4], 0 }
   0x4   :  { %14 = vsyncpa [#allocation4 + $0x1], 0  ;;  %s3001_s12 = smov 0   ;;  %s3003_s13 = smov 0  }
   0x5   :  { %s3005_s14 = smov 0   ;;  %s3007_s15 = smov 0  }
   0x6 LB: > { %s3022_s16 = sadd.s32 4294967295, %s2969_s15   ;;  %s2236_s17 = sadd.s32 4294967294, %s2969_s15   ;;  %s2969_s15 = sphi %s3007_s15, %s3885_s15   ;;  %s2965_s14 = sphi %s3005_s14, %s3884_s14   ;;  %s2961_s13 = sphi %s3003_s13, %s3883_s13   ;;  %s2957_s12 = sphi %s3001_s12, %s3882_s12  }
   0x7   : > { %p40_p0 = scmp.ne.s32.totalorder %s2961_s13, %s2957_s12  ;;  %p3867_p1 = scmp.eq.s32.totalorder %s3022_s16, 0 }
   0x8   : > { %p112_p3 = scmp.eq.s32.totalorder %s2236_s17, 3  ;;  %p2237_p5 = scmp.ge.s32.totalorder %s2969_s15, 1 }
   0x9   : > { %p3031_p4 = por %p3867_p1, %p40_p0  ;;  %p119_p7 = scmp.lt.s32.totalorder %s2969_s15, 5 }
   0xa   : > { %p3036_p6 = por %p112_p3, %p40_p0  ;;  %s2971_s21 = smov [#allocation5]  }
   0xb   : > { %s3870_s18 = scalar_select %p3031_p4, 1, 0 }
   0xc   : > { %s3871_s19 = scalar_select %p3036_p6, 1, 0 }
   0xd   : > { %p3041_p8 = pnand %p2237_p5, %p119_p7  ;;  %s131_s22 = sshll.u32 %s2971_s21, 4  ;;  %s132_s22 = int_to_ptr.vmem [resolvable:$true] %s131_s22 }
   0xe   : > { %s2972_s24 = smov [#allocation7]   ;;  %s2813_s28 = scalar_lea.hbm %s3864_s1, 8192 }
   0xf   : > { %s3872_s20 = scalar_select %p3041_p8, 1, 0 }
  0x10   : > { %p2432_p9 = pneg %p3041_p8  ;;  %s144_s25 = sshll.u32 %s2972_s24, 4  ;;  %s3053_s25 = int_to_ptr.vmem [resolvable:$true] %s144_s25 }
  0x11   : > { %p2814_p11 = scmp.ne.s32.totalorder %s3864_s1, %s2813_s28  ;;  %p2820_p3 = scmp.lt.u32.totalorder %s2813_s28, %s3864_s1 }
  0x12   : > { %p3049_p10 = pnand %p2432_p9, %p3867_p1 }
  0x14   : > { %p2815_p12 = pneg %p3049_p10 }
  0x16   : > { %p2816_p13 = pnand %p2815_p12, %p2814_p11 }
  0x18   : > { %p2817_p0 = pneg %p2816_p13 }
  0x1a   : > { %p2822_p5 = pnand %p2820_p3, %p2817_p0 }
  0x1c   : > { %2825 = shalt.err (!%p2822_p5)
}
  0x1d   : > { %s2826_s6 = scalar_lea.vmem %s132_s22, 8192  ;;  %p2834_p2 = scmp.lt.s32.totalorder %s132_s22, %s132_s22 }
  0x1e   : > { %p2827_p7 = scmp.ne.s32.totalorder %s132_s22, %s2826_s6  ;;  %p2835_p6 = scmp.lt.s32.totalorder %s2826_s6, %s2826_s6 }
  0x20   : > { %p2829_p9 = pnand %p2827_p7, %p2815_p12  ;;  %p2836_p4 = por %p2835_p6, %p2834_p2 }
  0x22   : > { %p2830_p1 = pneg %p2829_p9 }
  0x24   : > { %p2837_p8 = pnand %p2836_p4, %p2830_p1 }
  0x26   : > { %2840 = shalt.err (!%p2837_p8)
}
  0x27   : > { %s2973_s7 = smov 256   ;;  %s2974_s8 = smov 16  }
  0x28   : > { %2435 = dma.hbm_to_vmem [thread:$0]  (!%p3049_p10), %s3864_s1, 8192, %s132_s22, [#allocation6], %s2973_s7, %s2973_s7, %s2974_s8  }
  0x29   : > { %s2841_s21 = scalar_lea.hbm %s3865_s2, 8192 }
  0x2a   : > { %p2842_p1 = scmp.ne.s32.totalorder %s3865_s2, %s2841_s21  ;;  %p2848_p6 = scmp.lt.u32.totalorder %s2841_s21, %s3865_s2 }
  0x2c   : > { %p2844_p2 = pnand %p2842_p1, %p2815_p12 }
  0x2e   : > { %p2845_p4 = pneg %p2844_p2 }
  0x30   : > { %p2850_p8 = pnand %p2848_p6, %p2845_p4 }
  0x32   : > { %2853 = shalt.err (!%p2850_p8)
}
  0x33   : > { %s2854_s22 = scalar_lea.vmem %s3053_s25, 8192  ;;  %p2862_p3 = scmp.lt.s32.totalorder %s3053_s25, %s3053_s25 }
  0x34   : > { %p2855_p11 = scmp.ne.s32.totalorder %s3053_s25, %s2854_s22  ;;  %p2863_p5 = scmp.lt.s32.totalorder %s2854_s22, %s2854_s22 }
  0x36   : > { %p2857_p13 = pnand %p2855_p11, %p2815_p12  ;;  %p2864_p7 = por %p2863_p5, %p2862_p3 }
  0x38   : > { %p2858_p0 = pneg %p2857_p13 }
  0x3a   : > { %p2865_p9 = pnand %p2864_p7, %p2858_p0 }
  0x3c   : > { %2868 = shalt.err (!%p2865_p9)
}
  0x3d   : > { %s2975_s29 = smov 128   ;;  %s2976_s30 = smov 8  }
  0x3e   : > { %2438 = dma.hbm_to_vmem [thread:$0]  (!%p3049_p10), %s3865_s2, 8192, %s3053_s25, [#allocation6], %s2975_s29, %s2975_s29, %s2976_s30  }
  0x3f   : > { %s3106_s6 = sadd.s32 1, %s2969_s15   ;;  %s27_s10 = sadd.s32 1, %s2965_s14 }
  0x40   : > { %s24_s9 = ssub.s32 %s2969_s15, %s3106_s6  ;;  %p34_p1 = scmp.ne.s32.totalorder %s2965_s14, %s2961_s13 }
  0x41   : > { %p25_p12 = scmp.eq.s32.totalorder %s24_s9, 0  ;;  %p35_p2 = scmp.eq.s32.totalorder %s2969_s15, 0 }
  0x42   : > { %p3874_p6 = scmp.eq.s32.totalorder %s3022_s16, 3  ;;  %p2449_p11 = scmp.lt.s32.totalorder %s2969_s15, 4 }
  0x43   : > { %s3115_s11 = scalar_select %p25_p12, %s2965_s14, %s27_s10  }
  0x44   : > { %p36_p4 = por %p35_p2, %p34_p1  ;;  %p3119_p8 = por %p3874_p6, %p34_p1 }
  0x45   : > { %s158_s23 = sand.u32 1, %s2965_s14   ;;  %s2385_s25 = sshll.u32 %s2969_s15, 12 }
  0x46   : > { %s2241_s21 = sshll.u32 %s158_s23, 8  ;;  %s3129_s27 = scalar_lea.hbm %s3863_s0, %s2385_s25 }
  0x47   : > { %s162_s28 = scalar_lea.vmem [#allocation2], %s2241_s21  ;;  %p3133_p10 = pnand %p2449_p11, %p36_p4 }
  0x48   : > { %s170_s22 = sshll.u32 %s162_s28, 4  ;;  %s3137_s30 = scalar_lea.sflag [#allocation3], %s158_s23  ;;  %s3131_s22 = int_to_ptr.vmem [resolvable:$true] %s170_s22 }
  0x49   : > { %s2869_s4 = scalar_lea.hbm %s3129_s27, 4096  ;;  %p2871_p0 = pneg %p3133_p10 }
  0x4a   : > { %p2870_p13 = scmp.ne.s32.totalorder %s3129_s27, %s2869_s4  ;;  %s2874_s10 = scalar_lea.hbm %s3863_s0, 16384 }
  0x4b   : > { %p2875_p7 = scmp.lt.u32.totalorder %s3129_s27, %s3863_s0  ;;  %p2876_p9 = scmp.lt.u32.totalorder %s2874_s10, %s2869_s4 }
  0x4c   : > { %p2872_p3 = pnand %p2871_p0, %p2870_p13  ;;  %p2878_p1 = scmp.lt.u32.totalorder %s2869_s4, %s3129_s27 }
  0x4d   : > { %p2877_p12 = por %p2876_p9, %p2875_p7 }
  0x4e   : > { %p2873_p5 = pneg %p2872_p3 }
  0x4f   : > { %p2879_p2 = por %p2878_p1, %p2877_p12 }
  0x51   : > { %p2880_p4 = pnand %p2879_p2, %p2873_p5 }
  0x53   : > { %2883 = shalt.err (!%p2880_p4)
}
  0x54   : > { %s2884_s23 = scalar_lea.vmem %s3131_s22, 4096  ;;  %s2977_s24 = smov [#allocation2]  }
  0x55   : > { %p2885_p6 = scmp.ne.s32.totalorder %s3131_s22, %s2884_s23  ;;  %s2889_s26 = sshll.u32 %s2977_s24, 4  ;;  %s2890_s26 = int_to_ptr.vmem [resolvable:$false] %s2889_s26 }
  0x56   : > { %s2891_s28 = scalar_lea.vmem %s2890_s26, 8192  ;;  %p2892_p3 = scmp.lt.s32.totalorder %s3131_s22, %s2890_s26 }
  0x57   : > { %p2887_p11 = pnand %p2885_p6, %p2871_p0  ;;  %p2893_p7 = scmp.lt.s32.totalorder %s2891_s28, %s2884_s23 }
  0x59   : > { %p2888_p13 = pneg %p2887_p11  ;;  %p2894_p9 = por %p2893_p7, %p2892_p3 }
  0x5b   : > { %p2895_p12 = pnand %p2894_p9, %p2888_p13 }
  0x5d   : > { %2898 = shalt.err (!%p2895_p12)
}
  0x5e   : > { %2442 = dma.hbm_to_vmem [thread:$0]  (!%p3133_p10), %s3129_s27, 4096, %s3131_s22, %s3137_s30, %s2973_s7, %s2973_s7, %s2974_s8  }
  0x5f   : > { %p3877_p0 = scmp.ne.s32.totalorder %s3872_s20, 0 }
  0x60   : > { %s3171_s4 = sand.u32 (!%p3877_p0), 1, %s2961_s13   ;;  %p3878_p5 = scmp.ne.s32.totalorder (!%p3877_p0), %s3870_s18, 0 }
  0x61   : > { %182 = sbr.rel (%p3877_p0) target bundleno = 788 (0x314), region = 32  ;;  %s2246_s5 = sshll.u32 (!%p3877_p0), %s3171_s4, 8 }
  0x62   : > { %s185_s9 = scalar_lea.sflag (!%p3877_p0), [#allocation3], %s3171_s4  ;;  %s3177_s29 = scalar_lea.vmem (!%p3877_p0), [#allocation2], %s2246_s5 }
  0x68   : > { %2944 = dma.done.wait (%p3878_p5), %s185_s9, 4096  }
  0x69   : > { %2946 = vsyncadd (%p3878_p5), %s185_s9, 4294963200  ;;  %p3879_p10 = scmp.eq.s32.totalorder %s3022_s16, 0 }
  0x6b   : > { %2948 = dma.done.wait (%p3879_p10), [#allocation6], 16384   ;;  %p3880_p1 = pmov %p3879_p10 }
  0x6c   : > { %v2493_v0 = vld [vmem:[#allocation5 + $0x4] ss:$16 sps:$4 sm:$0xff]   ;;  %v2495_v1 = vld [vmem:[#allocation5] ss:$16 sps:$4 sm:$0xff]   ;;  %v222_v13 = vld [vmem:[%s3177_s29 + $0x8] sm:$0xff]  ;;  %s3779_s18 = scalar_lea.vmem [#allocation8], %s2246_s5 }
  0x6d   : > { %2950 = vsyncadd (%p3880_p1), [#allocation6], 4294950912  ;;  %653 = vmatprep.subr.bf16.mxu1 %v2493_v0  ;;  %v2496_v2 = vld [vmem:[#allocation5 + $0x24] ss:$16 sps:$4 sm:$0xff]   ;;  %v2498_v3 = vld [vmem:[#allocation5 + $0x20] ss:$16 sps:$4 sm:$0xff]  }
  0x6e   : > { %654 = vmatpush1.bf16.msra.mxu1 %v2495_v1  ;;  %v2499_v4 = vld [vmem:[#allocation5 + $0x44] ss:$16 sps:$4 sm:$0xff]   ;;  %v2501_v5 = vld [vmem:[#allocation5 + $0x40] ss:$16 sps:$4 sm:$0xff]   ;;  %v224_v14 = vld [vmem:[%s3177_s29 + $0x18] sm:$0xff]  ;;  %s2387_s20 = sshll.u32 %s3022_s16, 12 }
  0x6f   : > { %655 = vmatprep.subr.bf16.mxu1 %v2496_v2  ;;  %v2502_v6 = vld [vmem:[#allocation5 + $0x64] ss:$16 sps:$4 sm:$0xff]   ;;  %v2504_v7 = vld [vmem:[#allocation5 + $0x60] ss:$16 sps:$4 sm:$0xff]   ;;  %v3189_v15 = vpack.c.bf16 %v224_v14, %v222_v13  ;;  %v2543_v40 = vld [vmem:[#allocation5 + $0xc] ss:$16 sps:$4 sm:$0xff]   ;;  %s3815_s22 = scalar_lea.hbm %s3866_s3, %s2387_s20 }
  0x70   : > { %v2505_v8 = vld [vmem:[#allocation5 + $0x84] ss:$16 sps:$4 sm:$0xff]   ;;  %v2507_v9 = vld [vmem:[#allocation5 + $0x80] ss:$16 sps:$4 sm:$0xff]   ;;  %v226_v41 = vld [vmem:[%s3177_s29 + $0x28] sm:$0xff]  ;;  %s2144_s7 = sshll.u32 %s3779_s18, 4  ;;  %s3817_s7 = int_to_ptr.vmem [resolvable:$true] %s2144_s7 }
  0x71   : > { %v2508_v10 = vld [vmem:[#allocation5 + $0xa4] ss:$16 sps:$4 sm:$0xff]   ;;  %v2510_v11 = vld [vmem:[#allocation5 + $0xa0] ss:$16 sps:$4 sm:$0xff]   ;;  %685 = vmatprep.mubr.bf16.mxu1 %v3189_v15  ;;  %v228_v42 = vld [vmem:[%s3177_s29 + $0x38] sm:$0xff]  ;;  %s2130_s16 = scalar_lea.sflag [#allocation4], %s3171_s4 }
  0x72   : > { %656 = vmatpush1.bf16.msra.mxu1 %v2498_v3  ;;  %v2511_v12 = vld [vmem:[#allocation5 + $0xc4] ss:$16 sps:$4 sm:$0xff]   ;;  %v2513_v16 = vld [vmem:[#allocation5 + $0xc0] ss:$16 sps:$4 sm:$0xff]   ;;  %v2541_v45 = vld [vmem:[#allocation5 + $0x8] ss:$16 sps:$4 sm:$0xff]   ;;  %v3198_v48 = vpack.c.bf16 %v228_v42, %v226_v41 }
  0x73   : > { %657 = vmatprep.subr.bf16.mxu1 %v2499_v4  ;;  %v2514_v17 = vld [vmem:[#allocation5 + $0xe4] ss:$16 sps:$4 sm:$0xff]   ;;  %v2516_v18 = vld [vmem:[#allocation5 + $0xe0] ss:$16 sps:$4 sm:$0xff]   ;;  %v2546_v47 = vld [vmem:[#allocation5 + $0x2c] ss:$16 sps:$4 sm:$0xff]  }
  0x74   : > { %v2517_v19 = vld [vmem:[#allocation5 + $0x104] ss:$16 sps:$4 sm:$0xff]   ;;  %v2519_v20 = vld [vmem:[#allocation5 + $0x100] ss:$16 sps:$4 sm:$0xff]   ;;  %v2544_v51 = vld [vmem:[#allocation5 + $0x28] ss:$16 sps:$4 sm:$0xff]  }
  0x75   : > { %v2520_v21 = vld [vmem:[#allocation5 + $0x124] ss:$16 sps:$4 sm:$0xff]   ;;  %v2522_v22 = vld [vmem:[#allocation5 + $0x120] ss:$16 sps:$4 sm:$0xff]   ;;  %v2549_v54 = vld [vmem:[#allocation5 + $0x4c] ss:$16 sps:$4 sm:$0xff]  }
  0x76   : > { %658 = vmatpush1.bf16.msra.mxu1 %v2501_v5  ;;  %v2523_v23 = vld [vmem:[#allocation5 + $0x144] ss:$16 sps:$4 sm:$0xff]   ;;  %v2525_v24 = vld [vmem:[#allocation5 + $0x140] ss:$16 sps:$4 sm:$0xff]   ;;  %v230_v55 = vld [vmem:[%s3177_s29 + $0x48] sm:$0xff]  ;;  %s2899_s30 = scalar_lea.vmem %s3817_s7, 4096 }
  0x77   : > { %659 = vmatprep.subr.bf16.mxu1 %v2502_v6  ;;  %v2526_v25 = vld [vmem:[#allocation5 + $0x164] ss:$16 sps:$4 sm:$0xff]   ;;  %v2528_v26 = vld [vmem:[#allocation5 + $0x160] ss:$16 sps:$4 sm:$0xff]   ;;  %v232_v56 = vld [vmem:[%s3177_s29 + $0x58] sm:$0xff]  ;;  %p2900_p2 = scmp.ne.s32.totalorder %s3817_s7, %s2899_s30  ;;  %s2978_s10 = smov [#allocation8]  }
  0x78   : > { %v2529_v27 = vld [vmem:[#allocation5 + $0x184] ss:$16 sps:$4 sm:$0xff]   ;;  %v2531_v28 = vld [vmem:[#allocation5 + $0x180] ss:$16 sps:$4 sm:$0xff]   ;;  %v2547_v59 = vld [vmem:[#allocation5 + $0x48] ss:$16 sps:$4 sm:$0xff]   ;;  %v3208_v62 = vpack.c.bf16 %v232_v56, %v230_v55 }
  0x79   : > { %v2532_v29 = vld [vmem:[#allocation5 + $0x1a4] ss:$16 sps:$4 sm:$0xff]   ;;  %v2534_v30 = vld [vmem:[#allocation5 + $0x1a0] ss:$16 sps:$4 sm:$0xff]   ;;  %v2552_v61 = vld [vmem:[#allocation5 + $0x6c] ss:$16 sps:$4 sm:$0xff]   ;;  %p2901_p4 = pnand %p2900_p2, %p3119_p8 }
  0x7a   : > { %660 = vmatpush1.bf16.msra.mxu1 %v2504_v7  ;;  %v2535_v31 = vld [vmem:[#allocation5 + $0x1c4] ss:$16 sps:$4 sm:$0xff]   ;;  %v2537_v32 = vld [vmem:[#allocation5 + $0x1c0] ss:$16 sps:$4 sm:$0xff]   ;;  %v2550_v1 = vld [vmem:[#allocation5 + $0x68] ss:$16 sps:$4 sm:$0xff]  }
  0x7b   : > { %661 = vmatprep.subr.bf16.mxu1 %v2505_v8  ;;  %v2538_v33 = vld [vmem:[#allocation5 + $0x1e4] ss:$16 sps:$4 sm:$0xff]   ;;  %v2591_v35 = vld [vmem:[#allocation7] ss:$8 sps:$4 sm:$0xff]   ;;  %v2594_v43 = vld [vmem:[#allocation7 + $0x10] ss:$8 sps:$4 sm:$0xff]   ;;  %p2902_p6 = pneg %p2901_p4 }
  0x7c   : > { %v2589_v34 = vld [vmem:[#allocation7 + $0x4] ss:$8 sps:$4 sm:$0xff]   ;;  %v2592_v36 = vld [vmem:[#allocation7 + $0x14] ss:$8 sps:$4 sm:$0xff]   ;;  %v2540_v37 = vld [vmem:[#allocation5 + $0x1e0] ss:$16 sps:$4 sm:$0xff]  }
  0x7d   : > { %v221_v38 = vld [vmem:[%s3177_s29] sm:$0xff]  ;;  %v223_v39 = vld [vmem:[%s3177_s29 + $0x10] sm:$0xff]  ;;  %1871 = vmatprep.subr.bf16.mxu0 %v2589_v34  ;;  %v2555_v4 = vld [vmem:[#allocation5 + $0x8c] ss:$16 sps:$4 sm:$0xff]   ;;  %s2903_s21 = sshll.u32 %s2978_s10, 4  ;;  %s2904_s21 = int_to_ptr.vmem [resolvable:$false] %s2903_s21 }
  0x7e   : > { %662 = vmatpush1.bf16.msra.mxu1 %v2507_v9  ;;  %1872 = vmatpush1.bf16.msra.mxu0 %v2591_v35  ;;  %v3196_v44 = vpack.c.bf16 %v223_v39, %v221_v38  ;;  %v2595_v46 = vld [vmem:[#allocation7 + $0x24] ss:$8 sps:$4 sm:$0xff]   ;;  %v2597_v49 = vld [vmem:[#allocation7 + $0x20] ss:$8 sps:$4 sm:$0xff]   ;;  %v2598_v50 = vld [vmem:[#allocation7 + $0x34] ss:$8 sps:$4 sm:$0xff]   ;;  %p2906_p11 = scmp.lt.s32.totalorder %s3817_s7, %s2904_s21 }
  0x7f   : > { %663 = vmatprep.subr.bf16.mxu1 %v2508_v10  ;;  %1873 = vmatprep.subr.bf16.mxu0 %v2592_v36  ;;  %v225_v52 = vld [vmem:[%s3177_s29 + $0x20] sm:$0xff]  ;;  %v227_v53 = vld [vmem:[%s3177_s29 + $0x30] sm:$0xff]  ;;  %v234_v5 = vld [vmem:[%s3177_s29 + $0x68] sm:$0xff]  ;;  %s2905_s25 = scalar_lea.vmem %s2904_s21, 8192 }
  0x80   : > { %v2600_v57 = vld [vmem:[#allocation7 + $0x30] ss:$8 sps:$4 sm:$0xff]   ;;  %v2601_v58 = vld [vmem:[#allocation7 + $0x44] ss:$8 sps:$4 sm:$0xff]   ;;  %v3206_v60 = vpack.c.bf16 %v227_v53, %v225_v52  ;;  %v2603_v63 = vld [vmem:[#allocation7 + $0x40] ss:$8 sps:$4 sm:$0xff]   ;;  %p2907_p13 = scmp.lt.s32.totalorder %s2905_s25, %s2899_s30 }
  0x81   : > { %v2604_v0 = vld [vmem:[#allocation7 + $0x54] ss:$8 sps:$4 sm:$0xff]   ;;  %v229_v2 = vld [vmem:[%s3177_s29 + $0x40] sm:$0xff]  ;;  %v2606_v7 = vld [vmem:[#allocation7 + $0x50] ss:$8 sps:$4 sm:$0xff]  }
  0x82   : > { %664 = vmatpush1.bf16.msra.mxu1 %v2510_v11  ;;  %1874 = vmatpush1.bf16.msra.mxu0 %v2594_v43  ;;  %v231_v3 = vld [vmem:[%s3177_s29 + $0x50] sm:$0xff]  ;;  %v236_v6 = vld [vmem:[%s3177_s29 + $0x78] sm:$0xff]  ;;  %v2607_v8 = vld [vmem:[#allocation7 + $0x64] ss:$8 sps:$4 sm:$0xff]   ;;  %p2908_p3 = por %p2907_p13, %p2906_p11 }
  0x83   : > { %665 = vmatprep.subr.bf16.mxu1 %v2511_v12  ;;  %1875 = vmatprep.subr.bf16.mxu0 %v2595_v46  ;;  %v2553_v9 = vld [vmem:[#allocation5 + $0x88] ss:$16 sps:$4 sm:$0xff]   ;;  %v3216_v10 = vpack.c.bf16 %v231_v3, %v229_v2  ;;  %v3218_v11 = vpack.c.bf16 %v236_v6, %v234_v5  ;;  %v2558_v12 = vld [vmem:[#allocation5 + $0xac] ss:$16 sps:$4 sm:$0xff]   ;;  %v241_v38 = vld [vmem:[%s3177_s29 + $0xa0] sm:$0xff] }
  0x84   : > { %v2609_v13 = vld [vmem:[#allocation7 + $0x60] ss:$8 sps:$4 sm:$0xff]   ;;  %v2610_v14 = vld [vmem:[#allocation7 + $0x74] ss:$8 sps:$4 sm:$0xff]   ;;  %v2613_v5 = vld [vmem:[#allocation7 + $0x84] ss:$8 sps:$4 sm:$0xff]   ;;  %p2909_p7 = pnand %p2908_p3, %p2902_p6 }
  0x85   : > { %v2565_v34 = vld [vmem:[#allocation5 + $0x108] ss:$16 sps:$4 sm:$0xff]   ;;  %v2570_v36 = vld [vmem:[#allocation5 + $0x12c] ss:$16 sps:$4 sm:$0xff]   ;;  %v243_v39 = vld [vmem:[%s3177_s29 + $0xb0] sm:$0xff] }
  0x86   : > { %666 = vmatpush1.bf16.msra.mxu1 %v2513_v16  ;;  %1876 = vmatpush1.bf16.msra.mxu0 %v2597_v49  ;;  %v2556_v16 = vld [vmem:[#allocation5 + $0xa8] ss:$16 sps:$4 sm:$0xff]   ;;  %v3246_v43 = vpack.c.bf16 %v243_v39, %v241_v38  ;;  %v2579_v52 = vld [vmem:[#allocation5 + $0x18c] ss:$16 sps:$4 sm:$0xff]  }
  0x87   : > { %667 = vmatprep.subr.bf16.mxu1 %v2514_v17  ;;  %1877 = vmatprep.subr.bf16.mxu0 %v2598_v50  ;;  %v233_v17 = vld [vmem:[%s3177_s29 + $0x60] sm:$0xff]  ;;  %v246_v41 = vld [vmem:[%s3177_s29 + $0xc8] sm:$0xff]  ;;  %v248_v42 = vld [vmem:[%s3177_s29 + $0xd8] sm:$0xff] }
  0x88   : > { %v3248_v46 = vpack.c.bf16 %v248_v42, %v246_v41  ;;  %v2574_v49 = vld [vmem:[#allocation5 + $0x168] ss:$16 sps:$4 sm:$0xff]   ;;  %v245_v50 = vld [vmem:[%s3177_s29 + $0xc0] sm:$0xff]  ;;  %v2588_v3 = vld [vmem:[#allocation5 + $0x1ec] ss:$16 sps:$4 sm:$0xff]  }
  0x89   : > { %v250_v53 = vld [vmem:[%s3177_s29 + $0xe8] sm:$0xff] }
  0x8a   : > { %668 = vmatpush1.bf16.msra.mxu1 %v2516_v18  ;;  %1878 = vmatpush1.bf16.msra.mxu0 %v2600_v57  ;;  %v235_v18 = vld [vmem:[%s3177_s29 + $0x70] sm:$0xff]  ;;  %v2577_v56 = vld [vmem:[#allocation5 + $0x188] ss:$16 sps:$4 sm:$0xff]  }
  0x8b   : > { %669 = vmatprep.subr.bf16.mxu1 %v2517_v19  ;;  %1879 = vmatprep.subr.bf16.mxu0 %v2601_v58  ;;  %v2561_v19 = vld [vmem:[#allocation5 + $0xcc] ss:$16 sps:$4 sm:$0xff]   ;;  %v2583_v2 = vld [vmem:[#allocation5 + $0x1c8] ss:$16 sps:$4 sm:$0xff]  }
  0x8c   : > { %v2582_v58 = vld [vmem:[#allocation5 + $0x1ac] ss:$16 sps:$4 sm:$0xff]   ;;  %v2615_v6 = vld [vmem:[#allocation7 + $0x80] ss:$8 sps:$4 sm:$0xff]  }
  0x8e   : > { %670 = vmatpush1.bf16.msra.mxu1 %v2519_v20  ;;  %1880 = vmatpush1.bf16.msra.mxu0 %v2603_v63  ;;  %v238_v20 = vld [vmem:[%s3177_s29 + $0x88] sm:$0xff]  ;;  %v251_v63 = vld [vmem:[%s3177_s29 + $0xf0] sm:$0xff] }
  0x8f   : > { %671 = vmatprep.subr.bf16.mxu1 %v2520_v21  ;;  %1881 = vmatprep.subr.bf16.mxu0 %v2604_v0  ;;  %v240_v21 = vld [vmem:[%s3177_s29 + $0x98] sm:$0xff] }
  0x90   : > { %v2585_v0 = vld [vmem:[#allocation5 + $0x1cc] ss:$16 sps:$4 sm:$0xff]  }
  0x92   : > { %672 = vmatpush1.bf16.msra.mxu1 %v2522_v22  ;;  %1882 = vmatpush1.bf16.msra.mxu0 %v2606_v7  ;;  %v2612_v22 = vld [vmem:[#allocation7 + $0x70] ss:$8 sps:$4 sm:$0xff]   ;;  %v2616_v7 = vld [vmem:[#allocation7 + $0x94] ss:$8 sps:$4 sm:$0xff]  }
  0x93   : > { %673 = vmatprep.subr.bf16.mxu1 %v2523_v23  ;;  %1883 = vmatprep.subr.bf16.mxu0 %v2607_v8  ;;  %v3226_v23 = vpack.c.bf16 %v235_v18, %v233_v17  ;;  %v2625_v8 = vld [vmem:[#allocation7 + $0xc4] ss:$8 sps:$4 sm:$0xff]  }
  0x94   : > { %v2639_v17 = vld [vmem:[#allocation7 + $0x104] ss:$8 sps:$4 sm:$0xff]  }
  0x96   : > { %674 = vmatpush1.bf16.msra.mxu1 %v2525_v24  ;;  %1884 = vmatpush1.bf16.msra.mxu0 %v2609_v13  ;;  %v2559_v24 = vld [vmem:[#allocation5 + $0xc8] ss:$16 sps:$4 sm:$0xff]  }
  0x97   : > { %675 = vmatprep.subr.bf16.mxu1 %v2526_v25  ;;  %1885 = vmatprep.subr.bf16.mxu0 %v2610_v14  ;;  %v3228_v25 = vpack.c.bf16 %v240_v21, %v238_v20  ;;  %v2633_v13 = vld [vmem:[#allocation7 + $0xe0] ss:$8 sps:$4 sm:$0xff]   ;;  %v2634_v14 = vld [vmem:[#allocation7 + $0xf4] ss:$8 sps:$4 sm:$0xff]  }
  0x9a   : > { %676 = vmatpush1.bf16.msra.mxu1 %v2528_v26  ;;  %v2564_v26 = vld [vmem:[#allocation5 + $0xec] ss:$16 sps:$4 sm:$0xff]   ;;  %1886 = vmatpush1.bf16.msra.mxu0 %v2612_v22 }
  0x9b   : > { %677 = vmatprep.subr.bf16.mxu1 %v2529_v27  ;;  %v2562_v27 = vld [vmem:[#allocation5 + $0xe8] ss:$16 sps:$4 sm:$0xff]   ;;  %1887 = vmatprep.subr.bf16.mxu0 %v2613_v5 }
  0x9e   : > { %678 = vmatpush1.bf16.msra.mxu1 %v2531_v28  ;;  %v237_v28 = vld [vmem:[%s3177_s29 + $0x80] sm:$0xff]  ;;  %1888 = vmatpush1.bf16.msra.mxu0 %v2615_v6 }
  0x9f   : > { %679 = vmatprep.subr.bf16.mxu1 %v2532_v29  ;;  %v239_v29 = vld [vmem:[%s3177_s29 + $0x90] sm:$0xff]  ;;  %1889 = vmatprep.subr.bf16.mxu0 %v2616_v7 }
  0xa2   : > { %680 = vmatpush1.bf16.msra.mxu1 %v2534_v30  ;;  %v2567_v30 = vld [vmem:[#allocation5 + $0x10c] ss:$16 sps:$4 sm:$0xff]  }
  0xa3   : > { %681 = vmatprep.subr.bf16.mxu1 %v2535_v31  ;;  %v242_v31 = vld [vmem:[%s3177_s29 + $0xa8] sm:$0xff] }
  0xa6   : > { %682 = vmatpush1.bf16.msra.mxu1 %v2537_v32  ;;  %v244_v32 = vld [vmem:[%s3177_s29 + $0xb8] sm:$0xff] }
  0xa7   : > { %683 = vmatprep.subr.bf16.mxu1 %v2538_v33  ;;  %v3236_v33 = vpack.c.bf16 %v239_v29, %v237_v28  ;;  %v3238_v35 = vpack.c.bf16 %v244_v32, %v242_v31 }
  0xaa   : > { %684 = vmatpush1.bf16.msra.mxu1 %v2540_v37  ;;  %v2568_v37 = vld [vmem:[#allocation5 + $0x128] ss:$16 sps:$4 sm:$0xff]  }
  0xab   : > { %766 = vmatprep.subr.bf16.mxu1 %v2543_v40  ;;  %v2573_v40 = vld [vmem:[#allocation5 + $0x14c] ss:$16 sps:$4 sm:$0xff]  }
  0xad   : > { %686 = vmatmul.mubr.bf16.vlgmr.msra.gmra.mrb[0].mxu1 %v3196_v44 }
  0xae   : > { %767 = vmatpush1.bf16.msra.mxu1 %v2541_v45  ;;  %695 = vmatprep.mubr.bf16.mxu1 %v3198_v48  ;;  %v2571_v45 = vld [vmem:[#allocation5 + $0x148] ss:$16 sps:$4 sm:$0xff]  }
  0xaf   : > { %768 = vmatprep.subr.bf16.mxu1 %v2546_v47  ;;  %v2576_v47 = vld [vmem:[#allocation5 + $0x16c] ss:$16 sps:$4 sm:$0xff]  }
  0xb2   : > { %769 = vmatpush1.bf16.msra.mxu1 %v2544_v51  ;;  %v247_v51 = vld [vmem:[%s3177_s29 + $0xd0] sm:$0xff] }
  0xb3   : > { %770 = vmatprep.subr.bf16.mxu1 %v2549_v54  ;;  %v252_v54 = vld [vmem:[%s3177_s29 + $0xf8] sm:$0xff]  ;;  %v3256_v55 = vpack.c.bf16 %v247_v51, %v245_v50 }
  0xb4   : > { %v3258_v57 = vpack.c.bf16 %v252_v54, %v250_v53 }
  0xb5   : > { %696 = vmatmul.mubr.bf16.gmra.mrb[4].mxu1 %v3206_v60 }
  0xb6   : > { %771 = vmatpush1.bf16.msra.mxu1 %v2547_v59  ;;  %705 = vmatprep.mubr.bf16.mxu1 %v3208_v62  ;;  %v2580_v59 = vld [vmem:[#allocation5 + $0x1a8] ss:$16 sps:$4 sm:$0xff]  }
  0xb7   : > { %772 = vmatprep.subr.bf16.mxu1 %v2552_v61  ;;  %v249_v61 = vld [vmem:[%s3177_s29 + $0xe0] sm:$0xff] }
  0xba   : > { %773 = vmatpush1.bf16.msra.mxu1 %v2550_v1  ;;  %v267_v1 = vpack.c.bf16 %v251_v63, %v249_v61 }
  0xbb   : > { %774 = vmatprep.subr.bf16.mxu1 %v2555_v4  ;;  %v2586_v4 = vld [vmem:[#allocation5 + $0x1e8] ss:$16 sps:$4 sm:$0xff]  }
  0xbd   : > { %706 = vmatmul.mubr.bf16.gmra.mrb[8].mxu1 %v3216_v10 }
  0xbe   : > { %775 = vmatpush1.bf16.msra.mxu1 %v2553_v9  ;;  %715 = vmatprep.mubr.bf16.mxu1 %v3218_v11  ;;  %v2627_v9 = vld [vmem:[#allocation7 + $0xc0] ss:$8 sps:$4 sm:$0xff]  }
  0xbf   : > { %776 = vmatprep.subr.bf16.mxu1 %v2558_v12  ;;  %v2631_v12 = vld [vmem:[#allocation7 + $0xe4] ss:$8 sps:$4 sm:$0xff]  }
  0xc2   : > { %777 = vmatpush1.bf16.msra.mxu1 %v2556_v16  ;;  %v2636_v16 = vld [vmem:[#allocation7 + $0xf0] ss:$8 sps:$4 sm:$0xff]  }
  0xc3   : > { %778 = vmatprep.subr.bf16.mxu1 %v2561_v19 }
  0xc5   : > { %716 = vmatmul.mubr.bf16.gmra.mrb[12].mxu1 %v3226_v23 }
  0xc6   : > { %779 = vmatpush1.bf16.msra.mxu1 %v2559_v24  ;;  %725 = vmatprep.mubr.bf16.mxu1 %v3228_v25 }
  0xc7   : > { %780 = vmatprep.subr.bf16.mxu1 %v2564_v26 }
  0xca   : > { %781 = vmatpush1.bf16.msra.mxu1 %v2562_v27 }
  0xcb   : > { %782 = vmatprep.subr.bf16.mxu1 %v2567_v30 }
  0xcd   : > { %726 = vmatmul.mubr.bf16.gmra.mrb[16].mxu1 %v3236_v33 }
  0xce   : > { %783 = vmatpush1.bf16.msra.mxu1 %v2565_v34  ;;  %735 = vmatprep.mubr.bf16.mxu1 %v3238_v35 }
  0xcf   : > { %784 = vmatprep.subr.bf16.mxu1 %v2570_v36 }
  0xd2   : > { %785 = vmatpush1.bf16.msra.mxu1 %v2568_v37 }
  0xd3   : > { %786 = vmatprep.subr.bf16.mxu1 %v2573_v40 }
  0xd5   : > { %736 = vmatmul.mubr.bf16.gmra.mrb[20].mxu1 %v3246_v43 }
  0xd6   : > { %787 = vmatpush1.bf16.msra.mxu1 %v2571_v45  ;;  %745 = vmatprep.mubr.bf16.mxu1 %v3248_v46 }
  0xd7   : > { %788 = vmatprep.subr.bf16.mxu1 %v2576_v47 }
  0xda   : > { %789 = vmatpush1.bf16.msra.mxu1 %v2574_v49 }
  0xdb   : > { %790 = vmatprep.subr.bf16.mxu1 %v2579_v52 }
  0xdd   : > { %746 = vmatmul.mubr.bf16.gmra.mrb[24].mxu1 %v3256_v55 }
  0xde   : > { %791 = vmatpush1.bf16.msra.mxu1 %v2577_v56  ;;  %755 = vmatprep.mubr.bf16.mxu1 %v3258_v57 }
  0xdf   : > { %792 = vmatprep.subr.bf16.mxu1 %v2582_v58 }
  0xe2   : > { %793 = vmatpush1.bf16.msra.mxu1 %v2580_v59 }
  0xe3   : > { %794 = vmatprep.subr.bf16.mxu1 %v2585_v0 }
  0xe5   : > { %756 = vmatmul.mubr.bf16.gmra.mrb[28].mxu1 %v267_v1 }
  0xe6   : > { %795 = vmatpush1.bf16.msra.mxu1 %v2583_v2  ;;  %798 = vmatprep.mubr.bf16.mxu1 %v3189_v15  ;;  %v2618_v15 = vld [vmem:[#allocation7 + $0x90] ss:$8 sps:$4 sm:$0xff]  }
  0xe7   : > { %796 = vmatprep.subr.bf16.mxu1 %v2588_v3  ;;  %1890 = vmatpush1.bf16.msra.mxu0 %v2618_v15 }
  0xea   : > { %797 = vmatpush1.bf16.msra.mxu1 %v2586_v4 }
  0xed   : > { %799 = vmatmul.mubr.bf16.vlgmr.msra.gmra.mrb[32].mxu1 %v3196_v44  ;;  %v2619_v44 = vld [vmem:[#allocation7 + $0xa4] ss:$8 sps:$4 sm:$0xff]  }
  0xee   : > { %808 = vmatprep.mubr.bf16.mxu1 %v3198_v48  ;;  %v2621_v48 = vld [vmem:[#allocation7 + $0xa0] ss:$8 sps:$4 sm:$0xff]   ;;  %1891 = vmatprep.subr.bf16.mxu0 %v2619_v44 }
  0xef   : > { %1892 = vmatpush1.bf16.msra.mxu0 %v2621_v48 }
  0xf5   : > { %809 = vmatmul.mubr.bf16.gmra.mrb[36].mxu1 %v3206_v60  ;;  %v2622_v60 = vld [vmem:[#allocation7 + $0xb4] ss:$8 sps:$4 sm:$0xff]  }
  0xf6   : > { %818 = vmatprep.mubr.bf16.mxu1 %v3208_v62  ;;  %v2624_v62 = vld [vmem:[#allocation7 + $0xb0] ss:$8 sps:$4 sm:$0xff]   ;;  %1893 = vmatprep.subr.bf16.mxu0 %v2622_v60 }
  0xf7   : > { %1894 = vmatpush1.bf16.msra.mxu0 %v2624_v62 }
  0xf8   : > { %1895 = vmatprep.subr.bf16.mxu0 %v2625_v8 }
  0xfb   : > { %1896 = vmatpush1.bf16.msra.mxu0 %v2627_v9 }
  0xfd   : > { %819 = vmatmul.mubr.bf16.gmra.mrb[40].mxu1 %v3216_v10  ;;  %v2628_v10 = vld [vmem:[#allocation7 + $0xd4] ss:$8 sps:$4 sm:$0xff]  }
  0xfe   : > { %828 = vmatprep.mubr.bf16.mxu1 %v3218_v11  ;;  %v2630_v11 = vld [vmem:[#allocation7 + $0xd0] ss:$8 sps:$4 sm:$0xff]   ;;  %1897 = vmatprep.subr.bf16.mxu0 %v2628_v10 }
  0xff   : > { %1898 = vmatpush1.bf16.msra.mxu0 %v2630_v11 }
 0x100   : > { %1899 = vmatprep.subr.bf16.mxu0 %v2631_v12 }
 0x103   : > { %1900 = vmatpush1.bf16.msra.mxu0 %v2633_v13 }
 0x104   : > { %1901 = vmatprep.subr.bf16.mxu0 %v2634_v14 }
 0x105   : > { %829 = vmatmul.mubr.bf16.gmra.mrb[44].mxu1 %v3226_v23 }
 0x106   : > { %838 = vmatprep.mubr.bf16.mxu1 %v3228_v25 }
 0x107   : > { %1902 = vmatpush1.bf16.msra.mxu0 %v2636_v16 }
 0x108   : > { %1984 = vmatprep.subr.bf16.mxu0 %v2639_v17 }
 0x10d   : > { %839 = vmatmul.mubr.bf16.gmra.mrb[48].mxu1 %v3236_v33 }
 0x10e   : > { %848 = vmatprep.mubr.bf16.mxu1 %v3238_v35 }
 0x115   : > { %849 = vmatmul.mubr.bf16.gmra.mrb[52].mxu1 %v3246_v43 }
 0x116   : > { %858 = vmatprep.mubr.bf16.mxu1 %v3248_v46 }
 0x11d   : > { %859 = vmatmul.mubr.bf16.gmra.mrb[56].mxu1 %v3256_v55 }
 0x11e   : > { %868 = vmatprep.mubr.bf16.mxu1 %v3258_v57 }
 0x125   : > { %869 = vmatmul.mubr.bf16.gmra.mrb[60].mxu1 %v267_v1 }
 0x180   : > { %v687_v18 = vpop.f32.mrb[0].mxu1 }
 0x181   : > { %v943_v19 = vmul.f32 0.044715, %v687_v18  ;;  %v689_v20 = vpop.f32.mrb[1].mxu1  ;;  %v3279_v41 = vmul.f32 0.5, %v687_v18 }
 0x182   : > { %v944_v21 = vmul.f32 0.044715, %v689_v20  ;;  %v691_v22 = vpop.f32.mrb[2].mxu1  ;;  %v3281_v45 = vmul.f32 0.5, %v689_v20 }
 0x183   : > { %v1007_v23 = vmul.f32 %v943_v19, %v687_v18  ;;  %v947_v24 = vmul.f32 0.044715, %v691_v22  ;;  %v693_v25 = vpop.f32.mrb[3].mxu1  ;;  %v3283_v58 = vmul.f32 0.5, %v691_v22 }
 0x184   : > { %v1008_v26 = vmul.f32 %v944_v21, %v689_v20  ;;  %v948_v27 = vmul.f32 0.044715, %v693_v25  ;;  %v3285_v63 = vmul.f32 0.5, %v693_v25 }
 0x185   : > { %v1071_v28 = vmul.f32 %v1007_v23, %v687_v18  ;;  %v1011_v29 = vmul.f32 %v947_v24, %v691_v22 }
 0x186   : > { %v1072_v30 = vmul.f32 %v1008_v26, %v689_v20  ;;  %v1012_v31 = vmul.f32 %v948_v27, %v693_v25 }
 0x187   : > { %v1135_v32 = vadd.f32 %v1071_v28, %v687_v18  ;;  %v1075_v33 = vmul.f32 %v1011_v29, %v691_v22 }
 0x188   : > { %v1076_v34 = vmul.f32 %v1012_v31, %v693_v25  ;;  %v697_v35 = vpop.f32.mrb[4].mxu1  ;;  %v1136_v36 = vadd.f32 %v1072_v30, %v689_v20 }
 0x189   : > { %v1199_v37 = vmul.f32 0.7978846, %v1135_v32  ;;  %v1139_v38 = vadd.f32 %v1075_v33, %v691_v22  ;;  %v951_v39 = vmul.f32 0.044715, %v697_v35  ;;  %v699_v40 = vpop.f32.mrb[5].mxu1  ;;  %v3289_v3 = vmul.f32 0.5, %v697_v35 }
 0x18a   : > { %v952_v42 = vmul.f32 0.044715, %v699_v40  ;;  %v701_v43 = vpop.f32.mrb[6].mxu1  ;;  %v1140_v46 = vadd.f32 %v1076_v34, %v693_v25  ;;  %v1200_v47 = vmul.f32 0.7978846, %v1136_v36  ;;  %v3287_v2 = vmul.f32 0.5, %v699_v40 }
 0x18b   : > { %2685 = vtanh.f32 %v1199_v37  ;;  %v1203_v49 = vmul.f32 0.7978846, %v1139_v38  ;;  %v1015_v50 = vmul.f32 %v951_v39, %v697_v35  ;;  %v955_v51 = vmul.f32 0.044715, %v701_v43  ;;  %v703_v52 = vpop.f32.mrb[7].mxu1 }
 0x18c   : > { %v1016_v53 = vmul.f32 %v952_v42, %v699_v40  ;;  %v956_v54 = vmul.f32 0.044715, %v703_v52  ;;  %v1204_v55 = vmul.f32 0.7978846, %v1140_v46  ;;  %2687 = vtanh.f32 %v1200_v47 }
 0x18d   : > { %2689 = vtanh.f32 %v1203_v49  ;;  %v1079_v56 = vmul.f32 %v1015_v50, %v697_v35  ;;  %v1019_v57 = vmul.f32 %v955_v51, %v701_v43  ;;  %v3291_v7 = vmul.f32 0.5, %v703_v52 }
 0x18e   : > { %v1080_v59 = vmul.f32 %v1016_v53, %v699_v40  ;;  %v1020_v61 = vmul.f32 %v956_v54, %v703_v52  ;;  %2691 = vtanh.f32 %v1204_v55  ;;  %v3293_v15 = vmul.f32 0.5, %v701_v43 }
 0x18f   : > { %v1143_v0 = vadd.f32 %v1079_v56, %v697_v35  ;;  %v1083_v1 = vmul.f32 %v1019_v57, %v701_v43 }
 0x190   : > { %v1144_v4 = vadd.f32 %v1080_v59, %v699_v40  ;;  %v1084_v5 = vmul.f32 %v1020_v61, %v703_v52  ;;  %v707_v6 = vpop.f32.mrb[8].mxu1 }
 0x191   : > { %v1207_v44 = vmul.f32 0.7978846, %v1143_v0  ;;  %v1147_v48 = vadd.f32 %v1083_v1, %v701_v43  ;;  %v959_v60 = vmul.f32 0.044715, %v707_v6  ;;  %v709_v62 = vpop.f32.mrb[9].mxu1  ;;  %v3295_v8 = vmul.f32 0.5, %v707_v6 }
 0x192   : > { %v1208_v9 = vmul.f32 0.7978846, %v1144_v4  ;;  %v1148_v10 = vadd.f32 %v1084_v5, %v703_v52  ;;  %v960_v11 = vmul.f32 0.044715, %v709_v62  ;;  %v711_v12 = vpop.f32.mrb[10].mxu1  ;;  %v3297_v13 = vmul.f32 0.5, %v709_v62 }
 0x193   : > { %2693 = vtanh.f32 %v1207_v44  ;;  %v1211_v14 = vmul.f32 0.7978846, %v1147_v48  ;;  %v1023_v16 = vmul.f32 %v959_v60, %v707_v6  ;;  %v963_v17 = vmul.f32 0.044715, %v711_v12  ;;  %v713_v18 = vpop.f32.mrb[11].mxu1 }
 0x194   : > { %2695 = vtanh.f32 %v1208_v9  ;;  %v1212_v19 = vmul.f32 0.7978846, %v1148_v10  ;;  %v1024_v20 = vmul.f32 %v960_v11, %v709_v62  ;;  %v964_v21 = vmul.f32 0.044715, %v713_v18 }
 0x195   : > { %v2686_v22 = vpop.eup %2685  ;;  %2697 = vtanh.f32 %v1211_v14  ;;  %v1087_v23 = vmul.f32 %v1023_v16, %v707_v6  ;;  %v1027_v24 = vmul.f32 %v963_v17, %v711_v12  ;;  %v3299_v25 = vmul.f32 0.5, %v713_v18 }
 0x196   : > { %v2688_v26 = vpop.eup %2687  ;;  %2699 = vtanh.f32 %v1212_v19  ;;  %v1088_v27 = vmul.f32 %v1024_v20, %v709_v62  ;;  %v1028_v28 = vmul.f32 %v964_v21, %v713_v18  ;;  %v1327_v29 = vadd.f32 1.0, %v2686_v22  ;;  %v2642_v20 = vld [vmem:[#allocation7 + $0x114] ss:$8 sps:$4 sm:$0xff]  }
 0x197   : > { %v2690_v30 = vpop.eup %2689  ;;  %v1151_v31 = vadd.f32 %v1087_v23, %v707_v6  ;;  %v1091_v32 = vmul.f32 %v1027_v24, %v711_v12  ;;  %v1328_v33 = vadd.f32 1.0, %v2688_v26  ;;  %v3301_v34 = vmul.f32 0.5, %v711_v12  ;;  %v2640_v26 = vld [vmem:[#allocation7 + $0x110] ss:$8 sps:$4 sm:$0xff]  }
 0x198   : > { %v2692_v35 = vpop.eup %2691  ;;  %v1152_v36 = vadd.f32 %v1088_v27, %v709_v62  ;;  %v1092_v37 = vmul.f32 %v1028_v28, %v713_v18  ;;  %v3303_v38 = vpop.f32.mrb[12].mxu1  ;;  %v1331_v39 = vadd.f32 1.0, %v2690_v30  ;;  %v1391_v40 = vmul.f32 %v1327_v29, %v3279_v41 }
 0x199   : > { %v1215_v42 = vmul.f32 0.7978846, %v1151_v31  ;;  %v1155_v43 = vadd.f32 %v1091_v32, %v711_v12  ;;  %v967_v46 = vmul.f32 0.044715, %v3303_v38  ;;  %v3307_v47 = vpop.f32.mrb[13].mxu1  ;;  %v1332_v49 = vadd.f32 1.0, %v2692_v35 }
 0x19a   : > { %v1216_v50 = vmul.f32 0.7978846, %v1152_v36  ;;  %v1156_v51 = vadd.f32 %v1092_v37, %v713_v18  ;;  %v968_v52 = vmul.f32 0.044715, %v3307_v47  ;;  %v3310_v53 = vpop.f32.mrb[14].mxu1  ;;  %v1392_v54 = vmul.f32 %v1328_v33, %v3281_v45 }
 0x19b   : > { %2701 = vtanh.f32 %v1215_v42  ;;  %v1219_v55 = vmul.f32 0.7978846, %v1155_v43  ;;  %v1031_v56 = vmul.f32 %v967_v46, %v3303_v38  ;;  %v971_v41 = vmul.f32 0.044715, %v3310_v53  ;;  %v3315_v57 = vpop.f32.mrb[15].mxu1 }
 0x19c   : > { %2703 = vtanh.f32 %v1216_v50  ;;  %v1220_v59 = vmul.f32 0.7978846, %v1156_v51  ;;  %v1032_v61 = vmul.f32 %v968_v52, %v3307_v47  ;;  %v972_v0 = vmul.f32 0.044715, %v3315_v57  ;;  %v2637_v12 = vld [vmem:[#allocation7 + $0x100] ss:$8 sps:$4 sm:$0xff]  }
 0x19d   : > { %v2694_v1 = vpop.eup %2693  ;;  %2705 = vtanh.f32 %v1219_v55  ;;  %v1095_v4 = vmul.f32 %v1031_v56, %v3303_v38  ;;  %v1035_v45 = vmul.f32 %v971_v41, %v3310_v53  ;;  %v1396_v5 = vmul.f32 %v1332_v49, %v3285_v63  ;;  %v2645_v43 = vld [vmem:[#allocation7 + $0x124] ss:$8 sps:$4 sm:$0xff]  }
 0x19e   : > { %v2696_v6 = vpop.eup %2695  ;;  %2707 = vtanh.f32 %v1220_v59  ;;  %v1096_v44 = vmul.f32 %v1032_v61, %v3307_v47  ;;  %v1036_v48 = vmul.f32 %v972_v0, %v3315_v57  ;;  %v1395_v60 = vmul.f32 %v1331_v39, %v3283_v58 }
 0x19f   : > { %v2698_v62 = vpop.eup %2697  ;;  %v1159_v9 = vadd.f32 %v1095_v4, %v3303_v38  ;;  %v1099_v10 = vmul.f32 %v1035_v45, %v3310_v53  ;;  %v1456_v11 = vpack.c.bf16 %v1396_v5, %v1392_v54  ;;  %v1336_v14 = vadd.f32 1.0, %v2696_v6 }
 0x1a0   : > { %v2700_v16 = vpop.eup %2699  ;;  %v1160_v17 = vadd.f32 %v1096_v44, %v3307_v47  ;;  %v1100_v63 = vmul.f32 %v1036_v48, %v3315_v57  ;;  %v3329_v18 = vpop.f32.mrb[16].mxu1  ;;  %v1455_v19 = vpack.c.bf16 %v1395_v60, %v1391_v40  ;;  %v1335_v21 = vadd.f32 1.0, %v2694_v1  ;;  %v2643_v1 = vld [vmem:[#allocation7 + $0x120] ss:$8 sps:$4 sm:$0xff]   ;;  %v2648_v44 = vld [vmem:[#allocation7 + $0x134] ss:$8 sps:$4 sm:$0xff]  }
 0x1a1   : > { %v1223_v22 = vmul.f32 0.7978846, %v1159_v9  ;;  %v1163_v58 = vadd.f32 %v1099_v10, %v3310_v53  ;;  %1903 = vmatprep.mubr.bf16.mxu0 %v1456_v11  ;;  %v975_v23 = vmul.f32 0.044715, %v3329_v18  ;;  %v3333_v24 = vpop.f32.mrb[17].mxu1  ;;  %v1340_v27 = vadd.f32 1.0, %v2700_v16 }
 0x1a2   : > { %v1224_v28 = vmul.f32 0.7978846, %v1160_v17  ;;  %v1164_v29 = vadd.f32 %v1100_v63, %v3315_v57  ;;  %1904 = vmatmul.mubr.bf16.vlgmr.msra.gmra.mrb[0].mxu0 %v1455_v19  ;;  %v976_v30 = vmul.f32 0.044715, %v3333_v24  ;;  %v3337_v31 = vpop.f32.mrb[18].mxu1  ;;  %v1400_v32 = vmul.f32 %v1336_v14, %v3287_v2 }
 0x1a3   : > { %2709 = vtanh.f32 %v1223_v22  ;;  %v1227_v33 = vmul.f32 0.7978846, %v1163_v58  ;;  %v1039_v35 = vmul.f32 %v975_v23, %v3329_v18  ;;  %1985 = vmatpush1.bf16.msra.mxu0 %v2637_v12  ;;  %v979_v36 = vmul.f32 0.044715, %v3337_v31  ;;  %v3342_v37 = vpop.f32.mrb[19].mxu1 }
 0x1a4   : > { %2711 = vtanh.f32 %v1224_v28  ;;  %v1228_v39 = vmul.f32 0.7978846, %v1164_v29  ;;  %v1040_v40 = vmul.f32 %v976_v30, %v3333_v24  ;;  %v980_v42 = vmul.f32 0.044715, %v3342_v37  ;;  %1986 = vmatprep.subr.bf16.mxu0 %v2642_v20  ;;  %v2646_v10 = vld [vmem:[#allocation7 + $0x130] ss:$8 sps:$4 sm:$0xff]  }
 0x1a5   : > { %v3346_v46 = vpop.eup %2701  ;;  %2713 = vtanh.f32 %v1227_v33  ;;  %v1103_v2 = vmul.f32 %v1039_v35, %v3329_v18  ;;  %v1043_v49 = vmul.f32 %v979_v36, %v3337_v31  ;;  %v1404_v50 = vmul.f32 %v1340_v27, %v3291_v7 }
 0x1a6   : > { %v2704_v51 = vpop.eup %2703  ;;  %2715 = vtanh.f32 %v1228_v39  ;;  %v1104_v52 = vmul.f32 %v1040_v40, %v3333_v24  ;;  %v1044_v54 = vmul.f32 %v980_v42, %v3342_v37  ;;  %v1339_v55 = vadd.f32 1.0, %v2698_v62 }
 0x1a7   : > { %v2706_v56 = vpop.eup %2705  ;;  %v1167_v41 = vadd.f32 %v1103_v2, %v3329_v18  ;;  %v1107_v59 = vmul.f32 %v1043_v49, %v3337_v31  ;;  %1987 = vmatpush1.bf16.msra.mxu0 %v2640_v26  ;;  %v1460_v61 = vpack.c.bf16 %v1404_v50, %v1400_v32  ;;  %v1399_v0 = vmul.f32 %v1335_v21, %v3289_v3  ;;  %v2651_v26 = vld [vmem:[#allocation7 + $0x144] ss:$8 sps:$4 sm:$0xff]   ;;  %v2649_v49 = vld [vmem:[#allocation7 + $0x140] ss:$8 sps:$4 sm:$0xff]  }
 0x1a8   : > { %v2708_v4 = vpop.eup %2707  ;;  %v1168_v7 = vadd.f32 %v1104_v52, %v3333_v24  ;;  %v1108_v45 = vmul.f32 %v1044_v54, %v3342_v37  ;;  %v3358_v5 = vpop.f32.mrb[20].mxu1  ;;  %v1403_v6 = vmul.f32 %v1339_v55, %v3293_v15  ;;  %1988 = vmatprep.subr.bf16.mxu0 %v2645_v43  ;;  %v1344_v48 = vadd.f32 1.0, %v2704_v51 }
 0x1a9   : > { %v1231_v60 = vmul.f32 0.7978846, %v1167_v41  ;;  %v1171_v62 = vadd.f32 %v1107_v59, %v3337_v31  ;;  %1913 = vmatprep.mubr.bf16.mxu0 %v1460_v61  ;;  %v983_v9 = vmul.f32 0.044715, %v3358_v5  ;;  %v3363_v3 = vpop.f32.mrb[21].mxu1  ;;  %v1348_v11 = vadd.f32 1.0, %v2708_v4 }
 0x1aa   : > { %v1232_v12 = vmul.f32 0.7978846, %v1168_v7  ;;  %v1172_v14 = vadd.f32 %v1108_v45, %v3342_v37  ;;  %v1459_v16 = vpack.c.bf16 %v1403_v6, %v1399_v0  ;;  %v984_v17 = vmul.f32 0.044715, %v3363_v3  ;;  %v3367_v15 = vpop.f32.mrb[22].mxu1 }
 0x1ab   : > { %2717 = vtanh.f32 %v1231_v60  ;;  %v1235_v63 = vmul.f32 0.7978846, %v1171_v62  ;;  %v1047_v19 = vmul.f32 %v983_v9, %v3358_v5  ;;  %1989 = vmatpush1.bf16.msra.mxu0 %v2643_v1  ;;  %v987_v20 = vmul.f32 0.044715, %v3367_v15  ;;  %v3371_v21 = vpop.f32.mrb[23].mxu1 }
 0x1ac   : > { %2719 = vtanh.f32 %v1232_v12  ;;  %v1236_v22 = vmul.f32 0.7978846, %v1172_v14  ;;  %1914 = vmatmul.mubr.bf16.gmra.mrb[4].mxu0 %v1459_v16  ;;  %v1048_v58 = vmul.f32 %v984_v17, %v3363_v3  ;;  %v988_v23 = vmul.f32 0.044715, %v3371_v21  ;;  %1990 = vmatprep.subr.bf16.mxu0 %v2648_v44  ;;  %v2652_v0 = vld [vmem:[#allocation7 + $0x150] ss:$8 sps:$4 sm:$0xff]  }
 0x1ad   : > { %v3375_v27 = vpop.eup %2709  ;;  %2721 = vtanh.f32 %v1235_v63  ;;  %v1111_v28 = vmul.f32 %v1047_v19, %v3358_v5  ;;  %v1051_v29 = vmul.f32 %v987_v20, %v3367_v15  ;;  %v1408_v30 = vmul.f32 %v1344_v48, %v3297_v13 }
 0x1ae   : > { %v2712_v32 = vpop.eup %2711  ;;  %2723 = vtanh.f32 %v1236_v22  ;;  %v1112_v33 = vmul.f32 %v1048_v58, %v3363_v3  ;;  %v1052_v35 = vmul.f32 %v988_v23, %v3371_v21  ;;  %v1412_v36 = vmul.f32 %v1348_v11, %v3299_v25  ;;  %v2654_v25 = vld [vmem:[#allocation7 + $0x154] ss:$8 sps:$4 sm:$0xff]  }
 0x1af   : > { %v3383_v39 = vpop.eup %2713  ;;  %v1175_v40 = vadd.f32 %v1111_v28, %v3358_v5  ;;  %v1115_v42 = vmul.f32 %v1051_v29, %v3367_v15  ;;  %1991 = vmatpush1.bf16.msra.mxu0 %v2646_v10  ;;  %v1343_v43 = vadd.f32 1.0, %v3346_v46  ;;  %v1347_v2 = vadd.f32 1.0, %v2706_v56  ;;  %v2655_v28 = vld [vmem:[#allocation7 + $0x160] ss:$8 sps:$4 sm:$0xff]  }
 0x1b0   : > { %v2716_v13 = vpop.eup %2715  ;;  %v1176_v50 = vadd.f32 %v1112_v33, %v3363_v3  ;;  %v1116_v51 = vmul.f32 %v1052_v35, %v3371_v21  ;;  %v1464_v52 = vpack.c.bf16 %v1412_v36, %v1408_v30  ;;  %v3390_v54 = vpop.f32.mrb[24].mxu1  ;;  %1992 = vmatprep.subr.bf16.mxu0 %v2651_v26  ;;  %v904_v55 = vmul.f32 0.5, %v3307_v47  ;;  %v2660_v36 = vld [vmem:[#allocation7 + $0x174] ss:$8 sps:$4 sm:$0xff]  }
 0x1b1   : > { %v1239_v41 = vmul.f32 0.7978846, %v1175_v40  ;;  %v1179_v59 = vadd.f32 %v1115_v42, %v3367_v15  ;;  %v991_v61 = vmul.f32 0.044715, %v3390_v54  ;;  %v1407_v46 = vmul.f32 %v1343_v43, %v3295_v8  ;;  %v3396_v56 = vpop.f32.mrb[25].mxu1 }
 0x1b2   : > { %v1240_v1 = vmul.f32 0.7978846, %v1176_v50  ;;  %v1180_v4 = vadd.f32 %v1116_v51, %v3371_v21  ;;  %1923 = vmatprep.mubr.bf16.mxu0 %v1464_v52  ;;  %v1411_v7 = vmul.f32 %v1347_v2, %v3301_v34  ;;  %v992_v45 = vmul.f32 0.044715, %v3396_v56  ;;  %v3401_v6 = vpop.f32.mrb[26].mxu1 }
 0x1b3   : > { %2725 = vtanh.f32 %v1239_v41  ;;  %v1243_v47 = vmul.f32 0.7978846, %v1179_v59  ;;  %v1055_v44 = vmul.f32 %v991_v61, %v3390_v54  ;;  %1993 = vmatpush1.bf16.msra.mxu0 %v2649_v49  ;;  %v995_v8 = vmul.f32 0.044715, %v3401_v6  ;;  %v3405_v48 = vpop.f32.mrb[27].mxu1 }
 0x1b4   : > { %2727 = vtanh.f32 %v1240_v1  ;;  %v1244_v60 = vmul.f32 0.7978846, %v1180_v4  ;;  %v1463_v62 = vpack.c.bf16 %v1411_v7, %v1407_v46  ;;  %v1056_v9 = vmul.f32 %v992_v45, %v3396_v56  ;;  %1994 = vmatprep.subr.bf16.mxu0 %v2654_v25  ;;  %v2657_v34 = vld [vmem:[#allocation7 + $0x164] ss:$8 sps:$4 sm:$0xff]   ;;  %v2658_v41 = vld [vmem:[#allocation7 + $0x170] ss:$8 sps:$4 sm:$0xff]  }
 0x1b5   : > { %v3408_v10 = vpop.eup %2717  ;;  %2729 = vtanh.f32 %v1243_v47  ;;  %v1119_v11 = vmul.f32 %v1055_v44, %v3390_v54  ;;  %v1059_v12 = vmul.f32 %v995_v8, %v3401_v6  ;;  %v996_v14 = vmul.f32 0.044715, %v3405_v48 }
 0x1b6   : > { %v3413_v16 = vpop.eup %2719  ;;  %2731 = vtanh.f32 %v1244_v60  ;;  %1924 = vmatmul.mubr.bf16.gmra.mrb[8].mxu0 %v1463_v62  ;;  %v1120_v17 = vmul.f32 %v1056_v9, %v3396_v56  ;;  %v908_v63 = vmul.f32 0.5, %v3315_v57  ;;  %v1352_v19 = vadd.f32 1.0, %v2712_v32 }
 0x1b7   : > { %v3417_v20 = vpop.eup %2721  ;;  %v1183_v22 = vadd.f32 %v1119_v11, %v3390_v54  ;;  %v1123_v58 = vmul.f32 %v1059_v12, %v3401_v6  ;;  %v1060_v23 = vmul.f32 %v996_v14, %v3405_v48  ;;  %1995 = vmatpush1.bf16.msra.mxu0 %v2652_v0  ;;  %v1356_v26 = vadd.f32 1.0, %v2716_v13  ;;  %v2661_v12 = vld [vmem:[#allocation7 + $0x180] ss:$8 sps:$4 sm:$0xff]  }
 0x1b8   : > { %v2724_v29 = vpop.eup %2723  ;;  %v1184_v30 = vadd.f32 %v1120_v17, %v3396_v56  ;;  %v1416_v33 = vmul.f32 %v1352_v19, %v904_v55  ;;  %v3423_v35 = vpop.f32.mrb[28].mxu1  ;;  %v903_v57 = vmul.f32 0.5, %v3303_v38  ;;  %v907_v32 = vmul.f32 0.5, %v3310_v53  ;;  %1996 = vmatprep.subr.bf16.mxu0 %v2657_v34 }
 0x1b9   : > { %v1247_v40 = vmul.f32 0.7978846, %v1183_v22  ;;  %v1187_v42 = vadd.f32 %v1123_v58, %v3401_v6  ;;  %v1124_v43 = vmul.f32 %v1060_v23, %v3405_v48  ;;  %v1420_v2 = vmul.f32 %v1356_v26, %v908_v63  ;;  %v3429_v49 = vpop.f32.mrb[29].mxu1  ;;  %v2666_v58 = vld [vmem:[#allocation7 + $0x194] ss:$8 sps:$4 sm:$0xff]  }
 0x1ba   : > { %v1248_v13 = vmul.f32 0.7978846, %v1184_v30  ;;  %v999_v50 = vmul.f32 0.044715, %v3423_v35  ;;  %v1351_v51 = vadd.f32 1.0, %v3375_v27  ;;  %v1355_v52 = vadd.f32 1.0, %v3383_v39 }
 0x1bb   : > { %2733 = vtanh.f32 %v1247_v40  ;;  %v1251_v38 = vmul.f32 0.7978846, %v1187_v42  ;;  %v1188_v53 = vadd.f32 %v1124_v43, %v3405_v48  ;;  %v1468_v25 = vpack.c.bf16 %v1420_v2, %v1416_v33  ;;  %1997 = vmatpush1.bf16.msra.mxu0 %v2655_v28  ;;  %v3435_v55 = vpop.f32.mrb[30].mxu1  ;;  %v2663_v27 = vld [vmem:[#allocation7 + $0x184] ss:$8 sps:$4 sm:$0xff]  }
 0x1bc   : > { %2735 = vtanh.f32 %v1248_v13  ;;  %v1063_v59 = vmul.f32 %v999_v50, %v3423_v35  ;;  %v1415_v61 = vmul.f32 %v1351_v51, %v903_v57  ;;  %v1419_v46 = vmul.f32 %v1355_v52, %v907_v32  ;;  %v3438_v0 = vpop.f32.mrb[31].mxu1  ;;  %1998 = vmatprep.subr.bf16.mxu0 %v2660_v36  ;;  %v2664_v13 = vld [vmem:[#allocation7 + $0x190] ss:$8 sps:$4 sm:$0xff]  }
 0x1bd   : > { %v3440_v1 = vpop.eup %2725  ;;  %2737 = vtanh.f32 %v1251_v38  ;;  %v1252_v39 = vmul.f32 0.7978846, %v1188_v53  ;;  %1933 = vmatprep.mubr.bf16.mxu0 %v1468_v25  ;;  %v1000_v4 = vmul.f32 0.044715, %v3429_v49  ;;  %v1003_v7 = vmul.f32 0.044715, %v3435_v55 }
 0x1be   : > { %v3444_v45 = vpop.eup %2727  ;;  %v1127_v47 = vmul.f32 %v1063_v59, %v3423_v35  ;;  %v1467_v44 = vpack.c.bf16 %v1419_v46, %v1415_v61  ;;  %v1004_v8 = vmul.f32 0.044715, %v3438_v0  ;;  %v912_v60 = vmul.f32 0.5, %v3333_v24  ;;  %v2669_v38 = vld [vmem:[#allocation7 + $0x1a4] ss:$8 sps:$4 sm:$0xff]  }
 0x1bf   : > { %v3449_v62 = vpop.eup %2729  ;;  %2739 = vtanh.f32 %v1252_v39  ;;  %v1064_v9 = vmul.f32 %v1000_v4, %v3429_v49  ;;  %v1067_v34 = vmul.f32 %v1003_v7, %v3435_v55  ;;  %1999 = vmatpush1.bf16.msra.mxu0 %v2658_v41  ;;  %v916_v11 = vmul.f32 0.5, %v3342_v37 }
 0x1c0   : > { %v3454_v14 = vpop.eup %2731  ;;  %v1191_v17 = vadd.f32 %v1127_v47, %v3423_v35  ;;  %1934 = vmatmul.mubr.bf16.gmra.mrb[12].mxu0 %v1467_v44  ;;  %v1068_v63 = vmul.f32 %v1004_v8, %v3438_v0  ;;  %v1360_v24 = vadd.f32 1.0, %v3413_v16  ;;  %v1364_v19 = vadd.f32 1.0, %v2724_v29  ;;  %v800_v22 = vpop.f32.mrb[32].mxu1  ;;  %2000 = vmatprep.subr.bf16.mxu0 %v2663_v27 }
 0x1c1   : > { %v1128_v23 = vmul.f32 %v1064_v9, %v3429_v49  ;;  %v1131_v26 = vmul.f32 %v1067_v34, %v3435_v55  ;;  %v3461_v28 = vmul.f32 0.5, %v800_v22  ;;  %v945_v37 = vmul.f32 0.044715, %v800_v22  ;;  %v3463_v30 = vpop.f32.mrb[33].mxu1  ;;  %v2672_v34 = vld [vmem:[#allocation7 + $0x1b4] ss:$8 sps:$4 sm:$0xff]  }
 0x1c2   : > { %v1255_v33 = vmul.f32 0.7978846, %v1191_v17  ;;  %v1132_v57 = vmul.f32 %v1068_v63, %v3438_v0  ;;  %v1424_v32 = vmul.f32 %v1360_v24, %v912_v60  ;;  %v1428_v36 = vmul.f32 %v1364_v19, %v916_v11  ;;  %v3466_v40 = vpop.f32.mrb[34].mxu1 }
 0x1c3   : > { %v1192_v16 = vadd.f32 %v1128_v23, %v3429_v49  ;;  %v1195_v29 = vadd.f32 %v1131_v26, %v3435_v55  ;;  %v1009_v42 = vmul.f32 %v945_v37, %v800_v22  ;;  %v911_v43 = vmul.f32 0.5, %v3329_v18  ;;  %2001 = vmatpush1.bf16.msra.mxu0 %v2661_v12  ;;  %v3471_v2 = vpop.f32.mrb[35].mxu1 }
 0x1c4   : > { %2741 = vtanh.f32 %v1255_v33  ;;  %v1196_v50 = vadd.f32 %v1132_v57, %v3438_v0  ;;  %v1472_v51 = vpack.c.bf16 %v1428_v36, %v1424_v32  ;;  %v915_v52 = vmul.f32 0.5, %v3337_v31  ;;  %2002 = vmatprep.subr.bf16.mxu0 %v2666_v58  ;;  %v2670_v32 = vld [vmem:[#allocation7 + $0x1b0] ss:$8 sps:$4 sm:$0xff]  }
 0x1c5   : > { %v3475_v53 = vpop.eup %2733  ;;  %v1256_v25 = vmul.f32 0.7978846, %v1192_v16  ;;  %v1259_v41 = vmul.f32 0.7978846, %v1195_v29  ;;  %v1073_v59 = vmul.f32 %v1009_v42, %v800_v22  ;;  %v1359_v61 = vadd.f32 1.0, %v3408_v10 }
 0x1c6   : > { %v3478_v18 = vpop.eup %2735  ;;  %v1260_v46 = vmul.f32 0.7978846, %v1196_v50  ;;  %1943 = vmatprep.mubr.bf16.mxu0 %v1472_v51  ;;  %v1363_v27 = vadd.f32 1.0, %v3417_v20  ;;  %v946_v39 = vmul.f32 0.044715, %v3463_v30  ;;  %v3483_v4 = vmul.f32 0.5, %v3466_v40 }
 0x1c7   : > { %v3485_v31 = vpop.eup %2737  ;;  %2743 = vtanh.f32 %v1256_v25  ;;  %v1137_v7 = vadd.f32 %v1073_v59, %v800_v22  ;;  %v1423_v47 = vmul.f32 %v1359_v61, %v911_v43  ;;  %v949_v44 = vmul.f32 0.044715, %v3466_v40  ;;  %2003 = vmatpush1.bf16.msra.mxu0 %v2664_v13  ;;  %v2667_v10 = vld [vmem:[#allocation7 + $0x1a0] ss:$8 sps:$4 sm:$0xff]   ;;  %v2675_v42 = vld [vmem:[#allocation7 + $0x1c4] ss:$8 sps:$4 sm:$0xff]  }
 0x1c8   : > { %2745 = vtanh.f32 %v1259_v41  ;;  %v1427_v8 = vmul.f32 %v1363_v27, %v915_v52  ;;  %v1010_v60 = vmul.f32 %v946_v39, %v3463_v30  ;;  %v950_v20 = vmul.f32 0.044715, %v3471_v2  ;;  %v3490_v9 = vpop.f32.mrb[36].mxu1  ;;  %2004 = vmatprep.subr.bf16.mxu0 %v2669_v38  ;;  %v2673_v41 = vld [vmem:[#allocation7 + $0x1c0] ss:$8 sps:$4 sm:$0xff]  }
 0x1c9   : > { %v3492_v11 = vpop.eup %2739  ;;  %2747 = vtanh.f32 %v1260_v46  ;;  %v1201_v12 = vmul.f32 0.7978846, %v1137_v7  ;;  %v1013_v17 = vmul.f32 %v949_v44, %v3466_v40  ;;  %v920_v63 = vmul.f32 0.5, %v3363_v3  ;;  %v3496_v24 = vpop.f32.mrb[37].mxu1  ;;  %v2678_v7 = vld [vmem:[#allocation7 + $0x1d4] ss:$8 sps:$4 sm:$0xff]  }
 0x1ca   : > { %v1471_v19 = vpack.c.bf16 %v1427_v8, %v1423_v47  ;;  %v1074_v22 = vmul.f32 %v1010_v60, %v3463_v30  ;;  %v1014_v58 = vmul.f32 %v950_v20, %v3471_v2  ;;  %v924_v23 = vmul.f32 0.5, %v3371_v21  ;;  %v3501_v26 = vpop.f32.mrb[38].mxu1 }
 0x1cb   : > { %2749 = vtanh.f32 %v1201_v12  ;;  %v1077_v37 = vmul.f32 %v1013_v17, %v3466_v40  ;;  %v1368_v33 = vadd.f32 1.0, %v3444_v45  ;;  %v1372_v57 = vadd.f32 1.0, %v3454_v14  ;;  %2005 = vmatpush1.bf16.msra.mxu0 %v2667_v10  ;;  %v3506_v3 = vpop.f32.mrb[39].mxu1 }
 0x1cc   : > { %1944 = vmatmul.mubr.bf16.gmra.mrb[16].mxu0 %v1471_v19  ;;  %v1138_v36 = vadd.f32 %v1074_v22, %v3463_v30  ;;  %v1078_v16 = vmul.f32 %v1014_v58, %v3471_v2  ;;  %v953_v21 = vmul.f32 0.044715, %v3490_v9  ;;  %v919_v29 = vmul.f32 0.5, %v3358_v5  ;;  %2006 = vmatprep.subr.bf16.mxu0 %v2672_v34 }
 0x1cd   : > { %v1141_v43 = vadd.f32 %v1077_v37, %v3466_v40  ;;  %v1432_v45 = vmul.f32 %v1368_v33, %v920_v63  ;;  %v1436_v13 = vmul.f32 %v1372_v57, %v924_v23  ;;  %v923_v14 = vmul.f32 0.5, %v3367_v15  ;;  %v2676_v37 = vld [vmem:[#allocation7 + $0x1d0] ss:$8 sps:$4 sm:$0xff]  }
 0x1ce   : > { %v3514_v50 = vpop.eup %2741  ;;  %v1202_v51 = vmul.f32 0.7978846, %v1138_v36  ;;  %v1142_v52 = vadd.f32 %v1078_v16, %v3471_v2  ;;  %v1017_v38 = vmul.f32 %v953_v21, %v3490_v9  ;;  %v1367_v25 = vadd.f32 1.0, %v3440_v1  ;;  %v2681_v36 = vld [vmem:[#allocation7 + $0x1e4] ss:$8 sps:$4 sm:$0xff]  }
 0x1cf   : > { %v1205_v59 = vmul.f32 0.7978846, %v1141_v43  ;;  %v1476_v5 = vpack.c.bf16 %v1436_v13, %v1432_v45  ;;  %v1371_v61 = vadd.f32 1.0, %v3449_v62  ;;  %v954_v40 = vmul.f32 0.044715, %v3496_v24  ;;  %2007 = vmatpush1.bf16.msra.mxu0 %v2670_v32 }
 0x1d0   : > { %2751 = vtanh.f32 %v1202_v51  ;;  %v1206_v46 = vmul.f32 0.7978846, %v1142_v52  ;;  %v1081_v15 = vmul.f32 %v1017_v38, %v3490_v9  ;;  %v1431_v27 = vmul.f32 %v1367_v25, %v919_v29  ;;  %v3522_v39 = vpop.f32.mrb[40].mxu1  ;;  %2008 = vmatprep.subr.bf16.mxu0 %v2675_v42  ;;  %v2679_v52 = vld [vmem:[#allocation7 + $0x1e0] ss:$8 sps:$4 sm:$0xff]  }
 0x1d1   : > { %v3524_v47 = vpop.eup %2743  ;;  %2753 = vtanh.f32 %v1205_v59  ;;  %1953 = vmatprep.mubr.bf16.mxu0 %v1476_v5  ;;  %v1435_v1 = vmul.f32 %v1371_v61, %v923_v14  ;;  %v1018_v44 = vmul.f32 %v954_v40, %v3496_v24  ;;  %v957_v62 = vmul.f32 0.044715, %v3501_v26  ;;  %v3528_v10 = vpop.f32.mrb[41].mxu1  ;;  %v2684_v5 = vld [vmem:[#allocation7 + $0x1f4] ss:$8 sps:$4 sm:$0xff]  }
 0x1d2   : > { %v3530_v8 = vpop.eup %2745  ;;  %2755 = vtanh.f32 %v1206_v46  ;;  %v1145_v60 = vadd.f32 %v1081_v15, %v3490_v9  ;;  %v958_v20 = vmul.f32 0.044715, %v3506_v3  ;;  %v928_v34 = vmul.f32 0.5, %v3396_v56  ;;  %v3535_v12 = vpop.f32.mrb[42].mxu1 }
 0x1d3   : > { %v3537_v17 = vpop.eup %2747  ;;  %v1475_v63 = vpack.c.bf16 %v1435_v1, %v1431_v27  ;;  %v1082_v19 = vmul.f32 %v1018_v44, %v3496_v24  ;;  %v1021_v22 = vmul.f32 %v957_v62, %v3501_v26  ;;  %v932_v58 = vmul.f32 0.5, %v3405_v48  ;;  %2009 = vmatpush1.bf16.msra.mxu0 %v2673_v41  ;;  %v3542_v23 = vpop.f32.mrb[43].mxu1  ;;  %v2682_v27 = vld [vmem:[#allocation7 + $0x1f0] ss:$8 sps:$4 sm:$0xff]  }
 0x1d4   : > { %v1209_v33 = vmul.f32 0.7978846, %v1145_v60  ;;  %v1022_v57 = vmul.f32 %v958_v20, %v3506_v3  ;;  %v1376_v56 = vadd.f32 1.0, %v3478_v18  ;;  %v1380_v32 = vadd.f32 1.0, %v3492_v11  ;;  %2010 = vmatprep.subr.bf16.mxu0 %v2678_v7 }
 0x1d5   : > { %v2750_v16 = vpop.eup %2749  ;;  %1954 = vmatmul.mubr.bf16.gmra.mrb[20].mxu0 %v1475_v63  ;;  %v1146_v21 = vadd.f32 %v1082_v19, %v3496_v24  ;;  %v1085_v29 = vmul.f32 %v1021_v22, %v3501_v26  ;;  %v961_v48 = vmul.f32 0.044715, %v3522_v39  ;;  %v927_v42 = vmul.f32 0.5, %v3390_v54 }
 0x1d6   : > { %v1329_v43 = vadd.f32 1.0, %v2750_v16  ;;  %2757 = vtanh.f32 %v1209_v33  ;;  %v1086_v45 = vmul.f32 %v1022_v57, %v3506_v3  ;;  %v1440_v13 = vmul.f32 %v1376_v56, %v928_v34 }
 0x1d7   : > { %v1210_v18 = vmul.f32 0.7978846, %v1146_v21  ;;  %v1149_v11 = vadd.f32 %v1085_v29, %v3501_v26  ;;  %v1444_v14 = vmul.f32 %v1380_v32, %v932_v58  ;;  %v1025_v51 = vmul.f32 %v961_v48, %v3522_v39  ;;  %2011 = vmatpush1.bf16.msra.mxu0 %v2676_v37 }
 0x1d8   : > { %v3555_v38 = vmul.f32 %v1329_v43, %v3461_v28  ;;  %v1150_v25 = vadd.f32 %v1086_v45, %v3506_v3  ;;  %v931_v54 = vmul.f32 0.5, %v3401_v6  ;;  %v1375_v41 = vadd.f32 1.0, %v3475_v53  ;;  %v3560_v59 = vpop.f32.mrb[44].mxu1  ;;  %2012 = vmatprep.subr.bf16.mxu0 %v2681_v36 }
 0x1d9   : > { %2759 = vtanh.f32 %v1210_v18  ;;  %v1213_v61 = vmul.f32 0.7978846, %v1149_v11  ;;  %v1480_v40 = vpack.c.bf16 %v1444_v14, %v1440_v13  ;;  %v1089_v46 = vmul.f32 %v1025_v51, %v3522_v39  ;;  %v3563_v15 = vpop.f32.mrb[45].mxu1 }
 0x1da   : > { %v3565_v28 = vpop.eup %2751  ;;  %v1214_v7 = vmul.f32 0.7978846, %v1150_v25  ;;  %v1379_v1 = vadd.f32 1.0, %v3485_v31  ;;  %v1439_v6 = vmul.f32 %v1375_v41, %v927_v42  ;;  %v962_v53 = vmul.f32 0.044715, %v3528_v10  ;;  %v3569_v44 = vpop.f32.mrb[46].mxu1 }
 0x1db   : > { %v2754_v62 = vpop.eup %2753  ;;  %2761 = vtanh.f32 %v1213_v61  ;;  %1963 = vmatprep.mubr.bf16.mxu0 %v1480_v40  ;;  %v1153_v60 = vadd.f32 %v1089_v46, %v3522_v39  ;;  %v965_v20 = vmul.f32 0.044715, %v3535_v12  ;;  %v966_v34 = vmul.f32 0.044715, %v3542_v23  ;;  %2013 = vmatpush1.bf16.msra.mxu0 %v2679_v52  ;;  %v3574_v63 = vpop.f32.mrb[47].mxu1 }
 0x1dc   : > { %v3576_v19 = vpop.eup %2755  ;;  %v1333_v31 = vadd.f32 1.0, %v2754_v62  ;;  %2763 = vtanh.f32 %v1214_v7  ;;  %v1443_v22 = vmul.f32 %v1379_v1, %v931_v54  ;;  %v1026_v58 = vmul.f32 %v962_v53, %v3528_v10  ;;  %2014 = vmatprep.subr.bf16.mxu0 %v2684_v5 }
 0x1dd   : > { %v1217_v37 = vmul.f32 0.7978846, %v1153_v60  ;;  %v1029_v33 = vmul.f32 %v965_v20, %v3535_v12  ;;  %v1030_v57 = vmul.f32 %v966_v34, %v3542_v23  ;;  %v936_v56 = vmul.f32 0.5, %v3429_v49 }
 0x1de   : > { %v3583_v32 = vmul.f32 %v1333_v31, %v3483_v4  ;;  %v1479_v36 = vpack.c.bf16 %v1443_v22, %v1439_v6  ;;  %v1090_v16 = vmul.f32 %v1026_v58, %v3528_v10  ;;  %v940_v21 = vmul.f32 0.5, %v3438_v0 }
 0x1df   : > { %2765 = vtanh.f32 %v1217_v37  ;;  %v1093_v29 = vmul.f32 %v1029_v33, %v3535_v12  ;;  %v1094_v48 = vmul.f32 %v1030_v57, %v3542_v23  ;;  %v1384_v42 = vadd.f32 1.0, %v3524_v47  ;;  %2015 = vmatpush1.bf16.msra.mxu0 %v2682_v27 }
 0x1e0   : > { %v3590_v43 = vpop.eup %2757  ;;  %1964 = vmatmul.mubr.bf16.gmra.mrb[24].mxu0 %v1479_v36  ;;  %v1154_v49 = vadd.f32 %v1090_v16, %v3528_v10  ;;  %v1388_v4 = vadd.f32 1.0, %v3537_v17  ;;  %v969_v45 = vmul.f32 0.044715, %v3560_v59  ;;  %v935_v13 = vmul.f32 0.5, %v3423_v35  ;;  %v3596_v0 = vpop.f32.mrb[48].mxu1 }
 0x1e1   : > { %v1157_v18 = vadd.f32 %v1093_v29, %v3535_v12  ;;  %v1158_v11 = vadd.f32 %v1094_v48, %v3542_v23  ;;  %v1448_v14 = vmul.f32 %v1384_v42, %v936_v56  ;;  %v939_v47 = vmul.f32 0.5, %v3435_v55  ;;  %v3601_v51 = vpop.f32.mrb[49].mxu1 }
 0x1e2   : > { %v1218_v52 = vmul.f32 0.7978846, %v1154_v49  ;;  %v1452_v25 = vmul.f32 %v1388_v4, %v940_v21  ;;  %v1033_v54 = vmul.f32 %v969_v45, %v3560_v59  ;;  %v1383_v17 = vadd.f32 1.0, %v3514_v50  ;;  %v3605_v41 = vpop.f32.mrb[50].mxu1 }
 0x1e3   : > { %v3607_v35 = vpop.eup %2759  ;;  %v1221_v5 = vmul.f32 0.7978846, %v1157_v18  ;;  %v1222_v61 = vmul.f32 0.7978846, %v1158_v11  ;;  %v1387_v40 = vadd.f32 1.0, %v3530_v8  ;;  %v882_v46 = vmul.f32 0.5, %v3463_v30 }
 0x1e4   : > { %2767 = vtanh.f32 %v1218_v52  ;;  %v1484_v55 = vpack.c.bf16 %v1452_v25, %v1448_v14  ;;  %v1097_v27 = vmul.f32 %v1033_v54, %v3560_v59  ;;  %v1447_v7 = vmul.f32 %v1383_v17, %v935_v13  ;;  %v3612_v1 = vpop.f32.mrb[51].mxu1 }
 0x1e5   : > { %v3614_v6 = vpop.eup %2761  ;;  %2769 = vtanh.f32 %v1221_v5  ;;  %v1451_v50 = vmul.f32 %v1387_v40, %v939_v47  ;;  %v970_v53 = vmul.f32 0.044715, %v3563_v15  ;;  %v973_v62 = vmul.f32 0.044715, %v3569_v44 }
 0x1e6   : > { %v2764_v60 = vpop.eup %2763  ;;  %2771 = vtanh.f32 %v1222_v61  ;;  %1973 = vmatprep.mubr.bf16.mxu0 %v1484_v55  ;;  %v1161_v30 = vadd.f32 %v1097_v27, %v3560_v59  ;;  %v974_v8 = vmul.f32 0.044715, %v3574_v63  ;;  %v886_v20 = vmul.f32 0.5, %v3471_v2 }
 0x1e7   : > { %v1483_v34 = vpack.c.bf16 %v1451_v50, %v1447_v7  ;;  %v1034_v31 = vmul.f32 %v970_v53, %v3563_v15  ;;  %v1037_v22 = vmul.f32 %v973_v62, %v3569_v44  ;;  %v1330_v58 = vadd.f32 1.0, %v3565_v28 }
 0x1e8   : > { %v1225_v37 = vmul.f32 0.7978846, %v1161_v30  ;;  %v1038_v33 = vmul.f32 %v974_v8, %v3574_v63  ;;  %v1334_v57 = vadd.f32 1.0, %v3576_v19  ;;  %v977_v56 = vmul.f32 0.044715, %v3596_v0  ;;  %v3627_v36 = vpop.f32.mrb[52].mxu1 }
 0x1e9   : > { %v3629_v16 = vpop.eup %2765  ;;  %1974 = vmatmul.mubr.bf16.gmra.mrb[28].mxu0 %v1483_v34  ;;  %v1098_v2 = vmul.f32 %v1034_v31, %v3563_v15  ;;  %v1101_v21 = vmul.f32 %v1037_v22, %v3569_v44  ;;  %v1394_v29 = vmul.f32 %v1330_v58, %v882_v46  ;;  %v1457_v28 = vpack.c.bf16 %v3583_v32, %v3555_v38  ;;  %v3635_v48 = vpop.f32.mrb[53].mxu1 }
 0x1ea   : > { %2773 = vtanh.f32 %v1225_v37  ;;  %v1102_v19 = vmul.f32 %v1038_v33, %v3574_v63  ;;  %v1398_v42 = vmul.f32 %v1334_v57, %v886_v20  ;;  %v1041_v49 = vmul.f32 %v977_v56, %v3596_v0  ;;  %v3639_v4 = vpop.f32.mrb[54].mxu1 }
 0x1eb   : > { %v1162_v45 = vadd.f32 %v1098_v2, %v3563_v15  ;;  %v1165_v13 = vadd.f32 %v1101_v21, %v3569_v44  ;;  %v978_v18 = vmul.f32 0.044715, %v3601_v51  ;;  %v981_v11 = vmul.f32 0.044715, %v3605_v41  ;;  %v3645_v14 = vpop.f32.mrb[55].mxu1 }
 0x1ec   : > { %v1166_v38 = vadd.f32 %v1102_v19, %v3574_v63  ;;  %v1458_v32 = vpack.c.bf16 %v1398_v42, %v1394_v29  ;;  %v1105_v47 = vmul.f32 %v1041_v49, %v3596_v0  ;;  %v982_v52 = vmul.f32 0.044715, %v3612_v1 }
 0x1ed   : > { %v1226_v25 = vmul.f32 0.7978846, %v1162_v45  ;;  %v1229_v54 = vmul.f32 0.7978846, %v1165_v13  ;;  %v1042_v17 = vmul.f32 %v978_v18, %v3601_v51  ;;  %v1045_v5 = vmul.f32 %v981_v11, %v3605_v41 }
 0x1ee   : > { %v2768_v61 = vpop.eup %2767  ;;  %v1230_v40 = vmul.f32 0.7978846, %v1166_v38  ;;  %2016 = vmatprep.mubr.bf16.mxu0 %v1458_v32  ;;  %v1169_v46 = vadd.f32 %v1105_v47, %v3596_v0  ;;  %v1046_v55 = vmul.f32 %v982_v52, %v3612_v1  ;;  %v890_v27 = vmul.f32 0.5, %v3496_v24 }
 0x1ef   : > { %v3655_v7 = vpop.eup %2769  ;;  %2775 = vtanh.f32 %v1226_v25  ;;  %v1106_v50 = vmul.f32 %v1042_v17, %v3601_v51  ;;  %v1109_v53 = vmul.f32 %v1045_v5, %v3605_v41  ;;  %v894_v62 = vmul.f32 0.5, %v3506_v3 }
 0x1f0   : > { %v2772_v30 = vpop.eup %2771  ;;  %2777 = vtanh.f32 %v1229_v54  ;;  %v1233_v8 = vmul.f32 0.7978846, %v1169_v46  ;;  %v1110_v20 = vmul.f32 %v1046_v55, %v3612_v1  ;;  %v1338_v34 = vadd.f32 1.0, %v3607_v35  ;;  %v3662_v31 = vpop.f32.mrb[56].mxu1 }
 0x1f1   : > { %2779 = vtanh.f32 %v1230_v40  ;;  %2017 = vmatmul.mubr.bf16.vlgmr.msra.gmra.mrb[0].mxu0 %v1457_v28  ;;  %v1170_v24 = vadd.f32 %v1106_v50, %v3601_v51  ;;  %v1173_v22 = vadd.f32 %v1109_v53, %v3605_v41  ;;  %v1342_v58 = vadd.f32 1.0, %v2764_v60  ;;  %v3666_v37 = vpop.f32.mrb[57].mxu1 }
 0x1f2   : > { %2781 = vtanh.f32 %v1233_v8  ;;  %v1174_v3 = vadd.f32 %v1110_v20, %v3612_v1  ;;  %v1402_v33 = vmul.f32 %v1338_v34, %v890_v27  ;;  %v985_v57 = vmul.f32 0.044715, %v3627_v36  ;;  %v3670_v56 = vpop.f32.mrb[58].mxu1 }
 0x1f3   : > { %v1234_v35 = vmul.f32 0.7978846, %v1170_v24  ;;  %v1237_v2 = vmul.f32 0.7978846, %v1173_v22  ;;  %v1406_v21 = vmul.f32 %v1342_v58, %v894_v62  ;;  %v889_v29 = vmul.f32 0.5, %v3490_v9  ;;  %v3673_v28 = vpop.f32.mrb[59].mxu1 }
 0x1f4   : > { %v3675_v19 = vpop.eup %2773  ;;  %v1238_v60 = vmul.f32 0.7978846, %v1174_v3  ;;  %v1049_v42 = vmul.f32 %v985_v57, %v3627_v36  ;;  %v893_v49 = vmul.f32 0.5, %v3501_v26  ;;  %v1337_v45 = vadd.f32 1.0, %v3590_v43 }
 0x1f5   : > { %2783 = vtanh.f32 %v1234_v35  ;;  %v1462_v13 = vpack.c.bf16 %v1406_v21, %v1402_v33  ;;  %v1341_v18 = vadd.f32 1.0, %v3614_v6  ;;  %v986_v11 = vmul.f32 0.044715, %v3635_v48 }
 0x1f6   : > { %2785 = vtanh.f32 %v1237_v2  ;;  %v1113_v9 = vmul.f32 %v1049_v42, %v3627_v36  ;;  %v1401_v38 = vmul.f32 %v1337_v45, %v889_v29  ;;  %v989_v32 = vmul.f32 0.044715, %v3639_v4 }
 0x1f7   : > { %2787 = vtanh.f32 %v1238_v60  ;;  %2026 = vmatprep.mubr.bf16.mxu0 %v1462_v13  ;;  %v1405_v47 = vmul.f32 %v1341_v18, %v893_v49  ;;  %v1050_v52 = vmul.f32 %v986_v11, %v3635_v48  ;;  %v990_v26 = vmul.f32 0.044715, %v3645_v14 }
 0x1f8   : > { %v1177_v43 = vadd.f32 %v1113_v9, %v3627_v36  ;;  %v1053_v25 = vmul.f32 %v989_v32, %v3639_v4  ;;  %v898_v6 = vmul.f32 0.5, %v3528_v10  ;;  %v902_v54 = vmul.f32 0.5, %v3542_v23  ;;  %v3690_v17 = vpop.f32.mrb[60].mxu1 }
 0x1f9   : > { %v2776_v5 = vpop.eup %2775  ;;  %v1461_v40 = vpack.c.bf16 %v1405_v47, %v1401_v38  ;;  %v1114_v46 = vmul.f32 %v1050_v52, %v3635_v48  ;;  %v1054_v55 = vmul.f32 %v990_v26, %v3645_v14  ;;  %v1346_v27 = vadd.f32 1.0, %v2768_v61  ;;  %v3694_v50 = vpop.f32.mrb[61].mxu1 }
 0x1fa   : > { %v3696_v53 = vpop.eup %2777  ;;  %v1241_v62 = vmul.f32 0.7978846, %v1177_v43  ;;  %v1117_v8 = vmul.f32 %v1053_v25, %v3639_v4  ;;  %v1350_v20 = vadd.f32 1.0, %v2772_v30  ;;  %v993_v10 = vmul.f32 0.044715, %v3662_v31  ;;  %v3700_v23 = vpop.f32.mrb[62].mxu1 }
 0x1fb   : > { %v2780_v34 = vpop.eup %2779  ;;  %2027 = vmatmul.mubr.bf16.gmra.mrb[4].mxu0 %v1461_v40  ;;  %v1178_v24 = vadd.f32 %v1114_v46, %v3635_v48  ;;  %v1118_v22 = vmul.f32 %v1054_v55, %v3645_v14  ;;  %v1410_v58 = vmul.f32 %v1346_v27, %v898_v6  ;;  %v897_v61 = vmul.f32 0.5, %v3522_v39  ;;  %v3705_v3 = vpop.f32.mrb[63].mxu1 }
 0x1fc   : > { %v3707_v33 = vpop.eup %2781  ;;  %2789 = vtanh.f32 %v1241_v62  ;;  %v1181_v30 = vadd.f32 %v1117_v8, %v3639_v4  ;;  %v1414_v57 = vmul.f32 %v1350_v20, %v902_v54  ;;  %v1057_v35 = vmul.f32 %v993_v10, %v3662_v31 }
 0x1fd   : > { %v1242_v2 = vmul.f32 0.7978846, %v1178_v24  ;;  %v1182_v21 = vadd.f32 %v1118_v22, %v3645_v14  ;;  %v901_v29 = vmul.f32 0.5, %v3535_v12  ;;  %v1345_v60 = vadd.f32 1.0, %v3629_v16 }
 0x1fe   : > { %v1245_v42 = vmul.f32 0.7978846, %v1181_v30  ;;  %v1466_v49 = vpack.c.bf16 %v1414_v57, %v1410_v58  ;;  %v1121_v39 = vmul.f32 %v1057_v35, %v3662_v31  ;;  %v1349_v45 = vadd.f32 1.0, %v3655_v7 }
 0x1ff   : > { %v3716_v13 = vpop.eup %2783  ;;  %2791 = vtanh.f32 %v1242_v2  ;;  %v1246_v18 = vmul.f32 0.7978846, %v1182_v21  ;;  %v1409_v11 = vmul.f32 %v1345_v60, %v897_v61  ;;  %v994_v9 = vmul.f32 0.044715, %v3666_v37 }
 0x200   : > { %v3719_v38 = vpop.eup %2785  ;;  %2793 = vtanh.f32 %v1245_v42  ;;  %2036 = vmatprep.mubr.bf16.mxu0 %v1466_v49  ;;  %v1185_v12 = vadd.f32 %v1121_v39, %v3662_v31  ;;  %v1413_v16 = vmul.f32 %v1349_v45, %v901_v29  ;;  %v997_v32 = vmul.f32 0.044715, %v3670_v56 }
 0x201   : > { %v2788_v47 = vpop.eup %2787  ;;  %2795 = vtanh.f32 %v1246_v18  ;;  %v1058_v7 = vmul.f32 %v994_v9, %v3666_v37  ;;  %v998_v52 = vmul.f32 0.044715, %v3673_v28  ;;  %v906_v26 = vmul.f32 0.5, %v3563_v15 }
 0x202   : > { %v1249_v43 = vmul.f32 0.7978846, %v1185_v12  ;;  %v1465_v25 = vpack.c.bf16 %v1413_v16, %v1409_v11  ;;  %v1061_v6 = vmul.f32 %v997_v32, %v3670_v56  ;;  %v910_v54 = vmul.f32 0.5, %v3574_v63 }
 0x203   : > { %v1122_v40 = vmul.f32 %v1058_v7, %v3666_v37  ;;  %v1062_v46 = vmul.f32 %v998_v52, %v3673_v28  ;;  %v1354_v55 = vadd.f32 1.0, %v2776_v5  ;;  %v1358_v27 = vadd.f32 1.0, %v2780_v34 }
 0x204   : > { %2797 = vtanh.f32 %v1249_v43  ;;  %2037 = vmatmul.mubr.bf16.gmra.mrb[8].mxu0 %v1465_v25  ;;  %v1125_v62 = vmul.f32 %v1061_v6, %v3670_v56  ;;  %v1001_v8 = vmul.f32 0.044715, %v3690_v17  ;;  %v905_v15 = vmul.f32 0.5, %v3560_v59 }
 0x205   : > { %v1186_v20 = vadd.f32 %v1122_v40, %v3666_v37  ;;  %v1126_v10 = vmul.f32 %v1062_v46, %v3673_v28  ;;  %v1418_v24 = vmul.f32 %v1354_v55, %v906_v26  ;;  %v1422_v63 = vmul.f32 %v1358_v27, %v910_v54 }
 0x206   : > { %v3735_v22 = vpop.eup %2789  ;;  %v1189_v58 = vadd.f32 %v1125_v62, %v3670_v56  ;;  %v1065_v5 = vmul.f32 %v1001_v8, %v3690_v17  ;;  %v909_v34 = vmul.f32 0.5, %v3569_v44  ;;  %v1353_v61 = vadd.f32 1.0, %v3675_v19 }
 0x207   : > { %v1250_v30 = vmul.f32 0.7978846, %v1186_v20  ;;  %v1190_v57 = vadd.f32 %v1126_v10, %v3673_v28  ;;  %v1470_v59 = vpack.c.bf16 %v1422_v63, %v1418_v24  ;;  %v1357_v35 = vadd.f32 1.0, %v3696_v53 }
 0x208   : > { %v1253_v2 = vmul.f32 0.7978846, %v1189_v58  ;;  %v1129_v21 = vmul.f32 %v1065_v5, %v3690_v17  ;;  %v1417_v29 = vmul.f32 %v1353_v61, %v905_v15  ;;  %v1002_v60 = vmul.f32 0.044715, %v3694_v50 }
 0x209   : > { %v2792_v42 = vpop.eup %2791  ;;  %2799 = vtanh.f32 %v1250_v30  ;;  %v1254_v49 = vmul.f32 0.7978846, %v1190_v57  ;;  %2046 = vmatprep.mubr.bf16.mxu0 %v1470_v59  ;;  %v1421_v39 = vmul.f32 %v1357_v35, %v909_v34  ;;  %v1005_v44 = vmul.f32 0.044715, %v3700_v23 }
 0x20a   : > { %v2794_v19 = vpop.eup %2793  ;;  %2801 = vtanh.f32 %v1253_v2  ;;  %v1193_v45 = vadd.f32 %v1129_v21, %v3690_v17  ;;  %v1066_v18 = vmul.f32 %v1002_v60, %v3694_v50  ;;  %v1006_v12 = vmul.f32 0.044715, %v3705_v3 }
 0x20b   : > { %v2796_v53 = vpop.eup %2795  ;;  %2803 = vtanh.f32 %v1254_v49  ;;  %v1469_v11 = vpack.c.bf16 %v1421_v39, %v1417_v29  ;;  %v1069_v9 = vmul.f32 %v1005_v44, %v3700_v23  ;;  %v914_v7 = vmul.f32 0.5, %v3601_v51 }
 0x20c   : > { %v1257_v16 = vmul.f32 0.7978846, %v1193_v45  ;;  %v1130_v32 = vmul.f32 %v1066_v18, %v3694_v50  ;;  %v918_v52 = vmul.f32 0.5, %v3612_v1  ;;  %v1070_v43 = vmul.f32 %v1006_v12, %v3705_v3 }
 0x20d   : > { %2047 = vmatmul.mubr.bf16.gmra.mrb[12].mxu0 %v1469_v11  ;;  %v1133_v26 = vmul.f32 %v1069_v9, %v3700_v23  ;;  %v1362_v25 = vadd.f32 1.0, %v3716_v13  ;;  %v1366_v6 = vadd.f32 1.0, %v2788_v47  ;;  %v913_v46 = vmul.f32 0.5, %v3596_v0 }
 0x20e   : > { %v2798_v54 = vpop.eup %2797  ;;  %2805 = vtanh.f32 %v1257_v16  ;;  %v1194_v40 = vadd.f32 %v1130_v32, %v3694_v50  ;;  %v917_v55 = vmul.f32 0.5, %v3605_v41  ;;  %v1134_v1 = vmul.f32 %v1070_v43, %v3705_v3 }
 0x20f   : > { %v1197_v51 = vadd.f32 %v1133_v26, %v3700_v23  ;;  %v1426_v27 = vmul.f32 %v1362_v25, %v914_v7  ;;  %v1430_v62 = vmul.f32 %v1366_v6, %v918_v52  ;;  %v1361_v15 = vadd.f32 1.0, %v3707_v33 }
 0x210   : > { %v1258_v8 = vmul.f32 0.7978846, %v1194_v40  ;;  %v1365_v13 = vadd.f32 1.0, %v3719_v38  ;;  %v922_v47 = vmul.f32 0.5, %v3635_v48  ;;  %v1198_v10 = vadd.f32 %v1134_v1, %v3705_v3 }
 0x211   : > { %v1261_v20 = vmul.f32 0.7978846, %v1197_v51  ;;  %v1474_v24 = vpack.c.bf16 %v1430_v62, %v1426_v27  ;;  %v926_v0 = vmul.f32 0.5, %v3645_v14  ;;  %v1425_v41 = vmul.f32 %v1361_v15, %v913_v46 }
 0x212   : > { %2807 = vtanh.f32 %v1258_v8  ;;  %v1429_v63 = vmul.f32 %v1365_v13, %v917_v55  ;;  %v1370_v58 = vadd.f32 1.0, %v2792_v42  ;;  %v1262_v34 = vmul.f32 0.7978846, %v1198_v10 }
 0x213   : > { %v2800_v5 = vpop.eup %2799  ;;  %2809 = vtanh.f32 %v1261_v20  ;;  %2056 = vmatprep.mubr.bf16.mxu0 %v1474_v24  ;;  %v1374_v61 = vadd.f32 1.0, %v2796_v53  ;;  %v921_v33 = vmul.f32 0.5, %v3627_v36  ;;  %v925_v57 = vmul.f32 0.5, %v3639_v4 }
 0x214   : > { %v2802_v38 = vpop.eup %2801  ;;  %v1473_v30 = vpack.c.bf16 %v1429_v63, %v1425_v41  ;;  %v1434_v48 = vmul.f32 %v1370_v58, %v922_v47  ;;  %v1369_v59 = vadd.f32 1.0, %v3735_v22  ;;  %2811 = vtanh.f32 %v1262_v34 }
 0x215   : > { %v2804_v35 = vpop.eup %2803  ;;  %v1438_v14 = vmul.f32 %v1374_v61, %v926_v0  ;;  %v1373_v2 = vadd.f32 1.0, %v2794_v19  ;;  %v930_v21 = vmul.f32 0.5, %v3666_v37  ;;  %v934_v60 = vmul.f32 0.5, %v3673_v28 }
 0x216   : > { %2057 = vmatmul.mubr.bf16.gmra.mrb[16].mxu0 %v1473_v30  ;;  %v1433_v29 = vmul.f32 %v1369_v59, %v921_v33  ;;  %v1378_v42 = vadd.f32 1.0, %v2800_v5  ;;  %v1382_v49 = vadd.f32 1.0, %v2804_v35  ;;  %v929_v44 = vmul.f32 0.5, %v3662_v31 }
 0x217   : > { %v1478_v36 = vpack.c.bf16 %v1438_v14, %v1434_v48  ;;  %v1437_v39 = vmul.f32 %v1373_v2, %v925_v57  ;;  %v933_v4 = vmul.f32 0.5, %v3670_v56  ;;  %v1377_v53 = vadd.f32 1.0, %v2798_v54 }
 0x218   : > { %v2806_v45 = vpop.eup %2805  ;;  %v1442_v22 = vmul.f32 %v1378_v42, %v930_v21  ;;  %v1446_v18 = vmul.f32 %v1382_v49, %v934_v60  ;;  %v1381_v11 = vadd.f32 1.0, %v2802_v38  ;;  %v937_v31 = vmul.f32 0.5, %v3690_v17 }
 0x219   : > { %2066 = vmatprep.mubr.bf16.mxu0 %v1478_v36  ;;  %v1477_v19 = vpack.c.bf16 %v1437_v39, %v1433_v29  ;;  %v1441_v9 = vmul.f32 %v1377_v53, %v929_v44  ;;  %v1385_v32 = vadd.f32 1.0, %v2806_v45  ;;  %v941_v56 = vmul.f32 0.5, %v3700_v23 }
 0x21a   : > { %v1482_v37 = vpack.c.bf16 %v1446_v18, %v1442_v22  ;;  %v1445_v12 = vmul.f32 %v1381_v11, %v933_v4  ;;  %v942_v25 = vmul.f32 0.5, %v3705_v3  ;;  %v938_v6 = vmul.f32 0.5, %v3694_v50 }
 0x21b   : > { %v1449_v40 = vmul.f32 %v1385_v32, %v937_v31 }
 0x21c   : > { %v2808_v16 = vpop.eup %2807  ;;  %v1481_v28 = vpack.c.bf16 %v1445_v12, %v1441_v9 }
 0x21d   : > { %v2810_v7 = vpop.eup %2809  ;;  %v1386_v52 = vadd.f32 1.0, %v2808_v16 }
 0x21e   : > { %2067 = vmatmul.mubr.bf16.gmra.mrb[20].mxu0 %v1477_v19  ;;  %v1389_v26 = vadd.f32 1.0, %v2810_v7  ;;  %v2812_v43 = vpop.eup %2811 }
 0x21f   : > { %2076 = vmatprep.mubr.bf16.mxu0 %v1482_v37  ;;  %v1390_v54 = vadd.f32 1.0, %v2812_v43  ;;  %v1450_v55 = vmul.f32 %v1386_v52, %v938_v6 }
 0x220   : > { %v1453_v46 = vmul.f32 %v1389_v26, %v941_v56 }
 0x221   : > { %v1454_v51 = vmul.f32 %v1390_v54, %v942_v25 }
 0x222   : > { %v1485_v1 = vpack.c.bf16 %v1453_v46, %v1449_v40 }
 0x223   : > { %v1486_v27 = vpack.c.bf16 %v1454_v51, %v1450_v55 }
 0x226   : > { %2077 = vmatmul.mubr.bf16.gmra.mrb[24].mxu0 %v1481_v28 }
 0x227   : > { %2086 = vmatprep.mubr.bf16.mxu0 %v1486_v27 }
 0x22e   : > { %2087 = vmatmul.mubr.bf16.gmra.mrb[28].mxu0 %v1485_v1 }
 0x2c4   : > { %v2018_v17 = vpop.f32.mrb[0].mxu0 }
 0x2c5   : > { %2097 = vst [vmem:[%s3779_s18] sm:$0xff] %v2018_v17  ;;  %v2020_v50 = vpop.f32.mrb[1].mxu0 }
 0x2c6   : > { %2098 = vst [vmem:[%s3779_s18 + $0x8] sm:$0xff] %v2020_v50  ;;  %v2022_v23 = vpop.f32.mrb[2].mxu0 }
 0x2c7   : > { %2099 = vst [vmem:[%s3779_s18 + $0x10] sm:$0xff] %v2022_v23  ;;  %v2024_v3 = vpop.f32.mrb[3].mxu0 }
 0x2c8   : > { %2100 = vst [vmem:[%s3779_s18 + $0x18] sm:$0xff] %v2024_v3 }
 0x2ce   : > { %v2028_v62 = vpop.f32.mrb[4].mxu0 }
 0x2cf   : > { %2101 = vst [vmem:[%s3779_s18 + $0x20] sm:$0xff] %v2028_v62  ;;  %v2030_v8 = vpop.f32.mrb[5].mxu0 }
 0x2d0   : > { %2102 = vst [vmem:[%s3779_s18 + $0x28] sm:$0xff] %v2030_v8  ;;  %v2032_v15 = vpop.f32.mrb[6].mxu0 }
 0x2d1   : > { %2103 = vst [vmem:[%s3779_s18 + $0x30] sm:$0xff] %v2032_v15  ;;  %v2034_v13 = vpop.f32.mrb[7].mxu0 }
 0x2d2   : > { %2104 = vst [vmem:[%s3779_s18 + $0x38] sm:$0xff] %v2034_v13 }
 0x2d7   : > { %v2038_v47 = vpop.f32.mrb[8].mxu0 }
 0x2d8   : > { %2105 = vst [vmem:[%s3779_s18 + $0x40] sm:$0xff] %v2038_v47  ;;  %v2040_v20 = vpop.f32.mrb[9].mxu0 }
 0x2d9   : > { %2106 = vst [vmem:[%s3779_s18 + $0x48] sm:$0xff] %v2040_v20  ;;  %v2042_v10 = vpop.f32.mrb[10].mxu0 }
 0x2da   : > { %2107 = vst [vmem:[%s3779_s18 + $0x50] sm:$0xff] %v2042_v10  ;;  %v2044_v24 = vpop.f32.mrb[11].mxu0 }
 0x2db   : > { %2108 = vst [vmem:[%s3779_s18 + $0x58] sm:$0xff] %v2044_v24 }
 0x2e0   : > { %v2048_v0 = vpop.f32.mrb[12].mxu0 }
 0x2e1   : > { %2109 = vst [vmem:[%s3779_s18 + $0x60] sm:$0xff] %v2048_v0  ;;  %v2050_v41 = vpop.f32.mrb[13].mxu0 }
 0x2e2   : > { %2110 = vst [vmem:[%s3779_s18 + $0x68] sm:$0xff] %v2050_v41  ;;  %v2052_v63 = vpop.f32.mrb[14].mxu0 }
 0x2e3   : > { %2111 = vst [vmem:[%s3779_s18 + $0x70] sm:$0xff] %v2052_v63  ;;  %v2054_v58 = vpop.f32.mrb[15].mxu0 }
 0x2e4   : > { %2112 = vst [vmem:[%s3779_s18 + $0x78] sm:$0xff] %v2054_v58 }
 0x2e9   : > { %v2058_v5 = vpop.f32.mrb[16].mxu0 }
 0x2ea   : > { %2113 = vst [vmem:[%s3779_s18 + $0x80] sm:$0xff] %v2058_v5  ;;  %v2060_v34 = vpop.f32.mrb[17].mxu0 }
 0x2eb   : > { %2114 = vst [vmem:[%s3779_s18 + $0x88] sm:$0xff] %v2060_v34  ;;  %v2062_v61 = vpop.f32.mrb[18].mxu0 }
 0x2ec   : > { %2115 = vst [vmem:[%s3779_s18 + $0x90] sm:$0xff] %v2062_v61  ;;  %v2064_v33 = vpop.f32.mrb[19].mxu0 }
 0x2ed   : > { %2116 = vst [vmem:[%s3779_s18 + $0x98] sm:$0xff] %v2064_v33 }
 0x2f1   : > { %v2068_v38 = vpop.f32.mrb[20].mxu0 }
 0x2f2   : > { %2117 = vst [vmem:[%s3779_s18 + $0xa0] sm:$0xff] %v2068_v38  ;;  %v2070_v30 = vpop.f32.mrb[21].mxu0 }
 0x2f3   : > { %2118 = vst [vmem:[%s3779_s18 + $0xa8] sm:$0xff] %v2070_v30  ;;  %v2072_v48 = vpop.f32.mrb[22].mxu0 }
 0x2f4   : > { %2119 = vst [vmem:[%s3779_s18 + $0xb0] sm:$0xff] %v2072_v48  ;;  %v2074_v57 = vpop.f32.mrb[23].mxu0 }
 0x2f5   : > { %2120 = vst [vmem:[%s3779_s18 + $0xb8] sm:$0xff] %v2074_v57 }
 0x2f9   : > { %v2078_v59 = vpop.f32.mrb[24].mxu0 }
 0x2fa   : > { %2121 = vst [vmem:[%s3779_s18 + $0xc0] sm:$0xff] %v2078_v59  ;;  %v2080_v35 = vpop.f32.mrb[25].mxu0 }
 0x2fb   : > { %2122 = vst [vmem:[%s3779_s18 + $0xc8] sm:$0xff] %v2080_v35  ;;  %v2082_v14 = vpop.f32.mrb[26].mxu0 }
 0x2fc   : > { %2123 = vst [vmem:[%s3779_s18 + $0xd0] sm:$0xff] %v2082_v14  ;;  %v2084_v2 = vpop.f32.mrb[27].mxu0 }
 0x2fd   : > { %2124 = vst [vmem:[%s3779_s18 + $0xd8] sm:$0xff] %v2084_v2 }
 0x301   : > { %v2088_v21 = vpop.f32.mrb[28].mxu0 }
 0x302   : > { %2125 = vst [vmem:[%s3779_s18 + $0xe0] sm:$0xff] %v2088_v21  ;;  %v2090_v29 = vpop.f32.mrb[29].mxu0 }
 0x303   : > { %2126 = vst [vmem:[%s3779_s18 + $0xe8] sm:$0xff] %v2090_v29  ;;  %v2092_v60 = vpop.f32.mrb[30].mxu0 }
 0x304   : > { %2127 = vst [vmem:[%s3779_s18 + $0xf0] sm:$0xff] %v2092_v60  ;;  %v2094_v42 = vpop.f32.mrb[31].mxu0 }
 0x305   : > { %2128 = vst [vmem:[%s3779_s18 + $0xf8] sm:$0xff] %v2094_v42 }
 0x306   : > { %2912 = shalt.err (!%p2909_p7)
}
 0x307   : > { %s2913_s23 = scalar_lea.hbm %s3815_s22, 4096  ;;  %s2917_s28 = scalar_lea.hbm %s3866_s3, 16384 }
 0x308   : > { %p2914_p9 = scmp.ne.s32.totalorder %s3815_s22, %s2913_s23  ;;  %p2918_p5 = scmp.lt.u32.totalorder %s3815_s22, %s3866_s3 }
 0x309   : > { %p2919_p10 = scmp.lt.u32.totalorder %s2917_s28, %s2913_s23  ;;  %p2921_p2 = scmp.lt.u32.totalorder %s2913_s23, %s3815_s22 }
 0x30a   : > { %p2915_p12 = pnand %p2914_p9, %p3119_p8 }
 0x30b   : > { %p2920_p1 = por %p2919_p10, %p2918_p5 }
 0x30c   : > { %p2916_p0 = pneg %p2915_p12 }
 0x30d   : > { %p2922_p4 = por %p2921_p2, %p2920_p1 }
 0x30f   : > { %p2923_p6 = pnand %p2922_p4, %p2916_p0 }
 0x311   : > { %2926 = shalt.err (!%p2923_p6)
}
 0x312   : > { %s2979_s29 = smov 256   ;;  %s2980_s18 = smov 16  }
 0x313   : > { %2430 = dma.vmem_to_hbm [thread:$0]  (%p3119_p8), %s3817_s7, 4096, %s3815_s22, %s2130_s16, %s2979_s29, %s2979_s29, %s2980_s18  }
 0x314 PF: > { %p2452_p11 = scmp.ge.s32.totalorder %s2969_s15, 2  ;;  %s2159_s20 = sand.u32 1, %s2957_s12  }
 0x315   : > { %p3881_p13 = scmp.ne.s32.totalorder %s3871_s19, 0  ;;  %s2160_s8 = scalar_lea.sflag [#allocation4], %s2159_s20 }
 0x317   : > { %p2444_p3 = pnand %p2452_p11, %p3881_p13 }
 0x319   : > { %2952 = dma.done.wait (!%p2444_p3), %s2160_s8, 4096  }
 0x31a   : > { %2954 = vsyncadd (!%p2444_p3), %s2160_s8, 4294963200  ;;  %p17_p7 = scmp.ge.s32.totalorder %s3106_s6, 6   ;;  %s3882_s12 = smov %s2961_s13 }
 0x31b   : > { %s3883_s13 = smov %s2965_s14  ;;  %s3884_s14 = smov %s3115_s11 }
 0x31c   : > { %s3885_s15 = smov %s3106_s6  ;;  %19 = sbr.rel (!%p17_p7) target bundleno = 6 (0x6), region = 85 }
 0x323   :  { %2165 = vsyncpa [#allocation3], 1 }
 0x324   :  { %2167 = vsyncpa [#allocation3 + $0x1], 1 }
 0x325   :  { %2168 = vsyncpa [#allocation6], 1 }
 0x326   :  { %2169 = vsyncpa [#allocation4], 1 }
 0x327   :  { %2171 = vsyncpa [#allocation4 + $0x1], 1 }

// kernel: tpu_custom_call.1
= control target key start
LH: loop header
LB: loop body
LE: loop exit
PB: predicated region body
PF: predicated region fallthrough
CT: control target
= control target key end

     0   :  { %8 = vsyncpa [#allocation3], 0  ;;  %s3863_s0 = inlined_call_operand.hbm [shape: f32[512,256], index: 0, kind: input, shape index: {}]   ;;  %s3864_s1 = inlined_call_operand.hbm [shape: bf16[256,512], index: 1, kind: input, shape index: {}]   ;;  %s3865_s2 = inlined_call_operand.hbm [shape: bf16[512,256], index: 2, kind: input, shape index: {}]   ;;  %s3866_s3 = inlined_call_operand.hbm [shape: f32[512,256], index: 3, kind: output, shape index: {}]  }
   0x1   :  { %10 = vsyncpa [#allocation3 + $0x1], 0 }
   0x2   :  { %11 = vsyncpa [#allocation6], 0 }
   0x3   :  { %12 = vsyncpa [#allocation4], 0 }
   0x4   :  { %14 = vsyncpa [#allocation4 + $0x1], 0  ;;  %s3001_s12 = smov 0   ;;  %s3003_s13 = smov 0  }
   0x5   :  { %s3005_s14 = smov 0   ;;  %s3007_s15 = smov 0  }
   0x6 LB: > { %s3022_s16 = sadd.s32 4294967295, %s2969_s15   ;;  %s2236_s17 = sadd.s32 4294967294, %s2969_s15   ;;  %s2969_s15 = sphi %s3007_s15, %s3885_s15   ;;  %s2965_s14 = sphi %s3005_s14, %s3884_s14   ;;  %s2961_s13 = sphi %s3003_s13, %s3883_s13   ;;  %s2957_s12 = sphi %s3001_s12, %s3882_s12  }
   0x7   : > { %p40_p0 = scmp.ne.s32.totalorder %s2961_s13, %s2957_s12  ;;  %p3867_p1 = scmp.eq.s32.totalorder %s3022_s16, 0 }
   0x8   : > { %p112_p3 = scmp.eq.s32.totalorder %s2236_s17, 3  ;;  %p2237_p5 = scmp.ge.s32.totalorder %s2969_s15, 1 }
   0x9   : > { %p3031_p4 = por %p3867_p1, %p40_p0  ;;  %p119_p7 = scmp.lt.s32.totalorder %s2969_s15, 5 }
   0xa   : > { %p3036_p6 = por %p112_p3, %p40_p0  ;;  %s2971_s21 = smov [#allocation5]  }
   0xb   : > { %s3870_s18 = scalar_select %p3031_p4, 1, 0 }
   0xc   : > { %s3871_s19 = scalar_select %p3036_p6, 1, 0 }
   0xd   : > { %p3041_p8 = pnand %p2237_p5, %p119_p7  ;;  %s131_s22 = sshll.u32 %s2971_s21, 4  ;;  %s132_s22 = int_to_ptr.vmem [resolvable:$true] %s131_s22 }
   0xe   : > { %s2972_s24 = smov [#allocation7]   ;;  %s2813_s28 = scalar_lea.hbm %s3864_s1, 8192 }
   0xf   : > { %s3872_s20 = scalar_select %p3041_p8, 1, 0 }
  0x10   : > { %p2432_p9 = pneg %p3041_p8  ;;  %s144_s25 = sshll.u32 %s2972_s24, 4  ;;  %s3053_s25 = int_to_ptr.vmem [resolvable:$true] %s144_s25 }
  0x11   : > { %p2814_p11 = scmp.ne.s32.totalorder %s3864_s1, %s2813_s28  ;;  %p2820_p3 = scmp.lt.u32.totalorder %s2813_s28, %s3864_s1 }
  0x12   : > { %p3049_p10 = pnand %p2432_p9, %p3867_p1 }
  0x14   : > { %p2815_p12 = pneg %p3049_p10 }
  0x16   : > { %p2816_p13 = pnand %p2815_p12, %p2814_p11 }
  0x18   : > { %p2817_p0 = pneg %p2816_p13 }
  0x1a   : > { %p2822_p5 = pnand %p2820_p3, %p2817_p0 }
  0x1c   : > { %2825 = shalt.err (!%p2822_p5)
}
  0x1d   : > { %s2826_s6 = scalar_lea.vmem %s132_s22, 8192  ;;  %p2834_p2 = scmp.lt.s32.totalorder %s132_s22, %s132_s22 }
  0x1e   : > { %p2827_p7 = scmp.ne.s32.totalorder %s132_s22, %s2826_s6  ;;  %p2835_p6 = scmp.lt.s32.totalorder %s2826_s6, %s2826_s6 }
  0x20   : > { %p2829_p9 = pnand %p2827_p7, %p2815_p12  ;;  %p2836_p4 = por %p2835_p6, %p2834_p2 }
  0x22   : > { %p2830_p1 = pneg %p2829_p9 }
  0x24   : > { %p2837_p8 = pnand %p2836_p4, %p2830_p1 }
  0x26   : > { %2840 = shalt.err (!%p2837_p8)
}
  0x27   : > { %s2973_s7 = smov 256   ;;  %s2974_s8 = smov 16  }
  0x28   : > { %2435 = dma.hbm_to_vmem [thread:$0]  (!%p3049_p10), %s3864_s1, 8192, %s132_s22, [#allocation6], %s2973_s7, %s2973_s7, %s2974_s8  }
  0x29   : > { %s2841_s21 = scalar_lea.hbm %s3865_s2, 8192 }
  0x2a   : > { %p2842_p1 = scmp.ne.s32.totalorder %s3865_s2, %s2841_s21  ;;  %p2848_p6 = scmp.lt.u32.totalorder %s2841_s21, %s3865_s2 }
  0x2c   : > { %p2844_p2 = pnand %p2842_p1, %p2815_p12 }
  0x2e   : > { %p2845_p4 = pneg %p2844_p2 }
  0x30   : > { %p2850_p8 = pnand %p2848_p6, %p2845_p4 }
  0x32   : > { %2853 = shalt.err (!%p2850_p8)
}
  0x33   : > { %s2854_s22 = scalar_lea.vmem %s3053_s25, 8192  ;;  %p2862_p3 = scmp.lt.s32.totalorder %s3053_s25, %s3053_s25 }
  0x34   : > { %p2855_p11 = scmp.ne.s32.totalorder %s3053_s25, %s2854_s22  ;;  %p2863_p5 = scmp.lt.s32.totalorder %s2854_s22, %s2854_s22 }
  0x36   : > { %p2857_p13 = pnand %p2855_p11, %p2815_p12  ;;  %p2864_p7 = por %p2863_p5, %p2862_p3 }
  0x38   : > { %p2858_p0 = pneg %p2857_p13 }
  0x3a   : > { %p2865_p9 = pnand %p2864_p7, %p2858_p0 }
  0x3c   : > { %2868 = shalt.err (!%p2865_p9)
}
  0x3d   : > { %s2975_s29 = smov 128   ;;  %s2976_s30 = smov 8  }
  0x3e   : > { %2438 = dma.hbm_to_vmem [thread:$0]  (!%p3049_p10), %s3865_s2, 8192, %s3053_s25, [#allocation6], %s2975_s29, %s2975_s29, %s2976_s30  }
  0x3f   : > { %s3106_s6 = sadd.s32 1, %s2969_s15   ;;  %s27_s10 = sadd.s32 1, %s2965_s14 }
  0x40   : > { %s24_s9 = ssub.s32 %s2969_s15, %s3106_s6  ;;  %p34_p1 = scmp.ne.s32.totalorder %s2965_s14, %s2961_s13 }
  0x41   : > { %p25_p12 = scmp.eq.s32.totalorder %s24_s9, 0  ;;  %p35_p2 = scmp.eq.s32.totalorder %s2969_s15, 0 }
  0x42   : > { %p3874_p6 = scmp.eq.s32.totalorder %s3022_s16, 3  ;;  %p2449_p11 = scmp.lt.s32.totalorder %s2969_s15, 4 }
  0x43   : > { %s3115_s11 = scalar_select %p25_p12, %s2965_s14, %s27_s10  }
  0x44   : > { %p36_p4 = por %p35_p2, %p34_p1  ;;  %p3119_p8 = por %p3874_p6, %p34_p1 }
  0x45   : > { %s158_s23 = sand.u32 1, %s2965_s14   ;;  %s2385_s25 = sshll.u32 %s2969_s15, 12 }
  0x46   : > { %s2241_s21 = sshll.u32 %s158_s23, 8  ;;  %s3129_s27 = scalar_lea.hbm %s3863_s0, %s2385_s25 }
  0x47   : > { %s162_s28 = scalar_lea.vmem [#allocation2], %s2241_s21  ;;  %p3133_p10 = pnand %p2449_p11, %p36_p4 }
  0x48   : > { %s170_s22 = sshll.u32 %s162_s28, 4  ;;  %s3137_s30 = scalar_lea.sflag [#allocation3], %s158_s23  ;;  %s3131_s22 = int_to_ptr.vmem [resolvable:$true] %s170_s22 }
  0x49   : > { %s2869_s4 = scalar_lea.hbm %s3129_s27, 4096  ;;  %p2871_p0 = pneg %p3133_p10 }
  0x4a   : > { %p2870_p13 = scmp.ne.s32.totalorder %s3129_s27, %s2869_s4  ;;  %s2874_s10 = scalar_lea.hbm %s3863_s0, 16384 }
  0x4b   : > { %p2875_p7 = scmp.lt.u32.totalorder %s3129_s27, %s3863_s0  ;;  %p2876_p9 = scmp.lt.u32.totalorder %s2874_s10, %s2869_s4 }
  0x4c   : > { %p2872_p3 = pnand %p2871_p0, %p2870_p13  ;;  %p2878_p1 = scmp.lt.u32.totalorder %s2869_s4, %s3129_s27 }
  0x4d   : > { %p2877_p12 = por %p2876_p9, %p2875_p7 }
  0x4e   : > { %p2873_p5 = pneg %p2872_p3 }
  0x4f   : > { %p2879_p2 = por %p2878_p1, %p2877_p12 }
  0x51   : > { %p2880_p4 = pnand %p2879_p2, %p2873_p5 }
  0x53   : > { %2883 = shalt.err (!%p2880_p4)
}
  0x54   : > { %s2884_s23 = scalar_lea.vmem %s3131_s22, 4096  ;;  %s2977_s24 = smov [#allocation2]  }
  0x55   : > { %p2885_p6 = scmp.ne.s32.totalorder %s3131_s22, %s2884_s23  ;;  %s2889_s26 = sshll.u32 %s2977_s24, 4  ;;  %s2890_s26 = int_to_ptr.vmem [resolvable:$false] %s2889_s26 }
  0x56   : > { %s2891_s28 = scalar_lea.vmem %s2890_s26, 8192  ;;  %p2892_p3 = scmp.lt.s32.totalorder %s3131_s22, %s2890_s26 }
  0x57   : > { %p2887_p11 = pnand %p2885_p6, %p2871_p0  ;;  %p2893_p7 = scmp.lt.s32.totalorder %s2891_s28, %s2884_s23 }
  0x59   : > { %p2888_p13 = pneg %p2887_p11  ;;  %p2894_p9 = por %p2893_p7, %p2892_p3 }
  0x5b   : > { %p2895_p12 = pnand %p2894_p9, %p2888_p13 }
  0x5d   : > { %2898 = shalt.err (!%p2895_p12)
}
  0x5e   : > { %2442 = dma.hbm_to_vmem [thread:$0]  (!%p3133_p10), %s3129_s27, 4096, %s3131_s22, %s3137_s30, %s2973_s7, %s2973_s7, %s2974_s8  }
  0x5f   : > { %p3877_p0 = scmp.ne.s32.totalorder %s3872_s20, 0 }
  0x60   : > { %s3171_s4 = sand.u32 (!%p3877_p0), 1, %s2961_s13   ;;  %p3878_p5 = scmp.ne.s32.totalorder (!%p3877_p0), %s3870_s18, 0 }
  0x61   : > { %182 = sbr.rel (%p3877_p0) target bundleno = 788 (0x314), region = 32  ;;  %s2246_s5 = sshll.u32 (!%p3877_p0), %s3171_s4, 8 }
  0x62   : > { %s185_s9 = scalar_lea.sflag (!%p3877_p0), [#allocation3], %s3171_s4  ;;  %s3177_s29 = scalar_lea.vmem (!%p3877_p0), [#allocation2], %s2246_s5 }
  0x68   : > { %2944 = dma.done.wait (%p3878_p5), %s185_s9, 4096  }
  0x69   : > { %2946 = vsyncadd (%p3878_p5), %s185_s9, 4294963200  ;;  %p3879_p10 = scmp.eq.s32.totalorder %s3022_s16, 0 }
  0x6b   : > { %2948 = dma.done.wait (%p3879_p10), [#allocation6], 16384   ;;  %p3880_p1 = pmov %p3879_p10 }
  0x6c   : > { %v2493_v0 = vld [vmem:[#allocation5 + $0x4] ss:$16 sps:$4 sm:$0xff]   ;;  %v2495_v1 = vld [vmem:[#allocation5] ss:$16 sps:$4 sm:$0xff]   ;;  %v222_v13 = vld [vmem:[%s3177_s29 + $0x8] sm:$0xff]  ;;  %s3779_s18 = scalar_lea.vmem [#allocation8], %s2246_s5 }
  0x6d   : > { %2950 = vsyncadd (%p3880_p1), [#allocation6], 4294950912  ;;  %653 = vmatprep.subr.bf16.mxu1 %v2493_v0  ;;  %v2496_v2 = vld [vmem:[#allocation5 + $0x24] ss:$16 sps:$4 sm:$0xff]   ;;  %v2498_v3 = vld [vmem:[#allocation5 + $0x20] ss:$16 sps:$4 sm:$0xff]  }
  0x6e   : > { %654 = vmatpush1.bf16.msra.mxu1 %v2495_v1  ;;  %v2499_v4 = vld [vmem:[#allocation5 + $0x44] ss:$16 sps:$4 sm:$0xff]   ;;  %v2501_v5 = vld [vmem:[#allocation5 + $0x40] ss:$16 sps:$4 sm:$0xff]   ;;  %v224_v14 = vld [vmem:[%s3177_s29 + $0x18] sm:$0xff]  ;;  %s2387_s20 = sshll.u32 %s3022_s16, 12 }
  0x6f   : > { %655 = vmatprep.subr.bf16.mxu1 %v2496_v2  ;;  %v2502_v6 = vld [vmem:[#allocation5 + $0x64] ss:$16 sps:$4 sm:$0xff]   ;;  %v2504_v7 = vld [vmem:[#allocation5 + $0x60] ss:$16 sps:$4 sm:$0xff]   ;;  %v3189_v15 = vpack.c.bf16 %v224_v14, %v222_v13  ;;  %v2543_v40 = vld [vmem:[#allocation5 + $0xc] ss:$16 sps:$4 sm:$0xff]   ;;  %s3815_s22 = scalar_lea.hbm %s3866_s3, %s2387_s20 }
  0x70   : > { %v2505_v8 = vld [vmem:[#allocation5 + $0x84] ss:$16 sps:$4 sm:$0xff]   ;;  %v2507_v9 = vld [vmem:[#allocation5 + $0x80] ss:$16 sps:$4 sm:$0xff]   ;;  %v226_v41 = vld [vmem:[%s3177_s29 + $0x28] sm:$0xff]  ;;  %s2144_s7 = sshll.u32 %s3779_s18, 4  ;;  %s3817_s7 = int_to_ptr.vmem [resolvable:$true] %s2144_s7 }
  0x71   : > { %v2508_v10 = vld [vmem:[#allocation5 + $0xa4] ss:$16 sps:$4 sm:$0xff]   ;;  %v2510_v11 = vld [vmem:[#allocation5 + $0xa0] ss:$16 sps:$4 sm:$0xff]   ;;  %685 = vmatprep.mubr.bf16.mxu1 %v3189_v15  ;;  %v228_v42 = vld [vmem:[%s3177_s29 + $0x38] sm:$0xff]  ;;  %s2130_s16 = scalar_lea.sflag [#allocation4], %s3171_s4 }
  0x72   : > { %656 = vmatpush1.bf16.msra.mxu1 %v2498_v3  ;;  %v2511_v12 = vld [vmem:[#allocation5 + $0xc4] ss:$16 sps:$4 sm:$0xff]   ;;  %v2513_v16 = vld [vmem:[#allocation5 + $0xc0] ss:$16 sps:$4 sm:$0xff]   ;;  %v2541_v45 = vld [vmem:[#allocation5 + $0x8] ss:$16 sps:$4 sm:$0xff]   ;;  %v3198_v48 = vpack.c.bf16 %v228_v42, %v226_v41 }
  0x73   : > { %657 = vmatprep.subr.bf16.mxu1 %v2499_v4  ;;  %v2514_v17 = vld [vmem:[#allocation5 + $0xe4] ss:$16 sps:$4 sm:$0xff]   ;;  %v2516_v18 = vld [vmem:[#allocation5 + $0xe0] ss:$16 sps:$4 sm:$0xff]   ;;  %v2546_v47 = vld [vmem:[#allocation5 + $0x2c] ss:$16 sps:$4 sm:$0xff]  }
  0x74   : > { %v2517_v19 = vld [vmem:[#allocation5 + $0x104] ss:$16 sps:$4 sm:$0xff]   ;;  %v2519_v20 = vld [vmem:[#allocation5 + $0x100] ss:$16 sps:$4 sm:$0xff]   ;;  %v2544_v51 = vld [vmem:[#allocation5 + $0x28] ss:$16 sps:$4 sm:$0xff]  }
  0x75   : > { %v2520_v21 = vld [vmem:[#allocation5 + $0x124] ss:$16 sps:$4 sm:$0xff]   ;;  %v2522_v22 = vld [vmem:[#allocation5 + $0x120] ss:$16 sps:$4 sm:$0xff]   ;;  %v2549_v54 = vld [vmem:[#allocation5 + $0x4c] ss:$16 sps:$4 sm:$0xff]  }
  0x76   : > { %658 = vmatpush1.bf16.msra.mxu1 %v2501_v5  ;;  %v2523_v23 = vld [vmem:[#allocation5 + $0x144] ss:$16 sps:$4 sm:$0xff]   ;;  %v2525_v24 = vld [vmem:[#allocation5 + $0x140] ss:$16 sps:$4 sm:$0xff]   ;;  %v230_v55 = vld [vmem:[%s3177_s29 + $0x48] sm:$0xff]  ;;  %s2899_s30 = scalar_lea.vmem %s3817_s7, 4096 }
  0x77   : > { %659 = vmatprep.subr.bf16.mxu1 %v2502_v6  ;;  %v2526_v25 = vld [vmem:[#allocation5 + $0x164] ss:$16 sps:$4 sm:$0xff]   ;;  %v2528_v26 = vld [vmem:[#allocation5 + $0x160] ss:$16 sps:$4 sm:$0xff]   ;;  %v232_v56 = vld [vmem:[%s3177_s29 + $0x58] sm:$0xff]  ;;  %p2900_p2 = scmp.ne.s32.totalorder %s3817_s7, %s2899_s30  ;;  %s2978_s10 = smov [#allocation8]  }
  0x78   : > { %v2529_v27 = vld [vmem:[#allocation5 + $0x184] ss:$16 sps:$4 sm:$0xff]   ;;  %v2531_v28 = vld [vmem:[#allocation5 + $0x180] ss:$16 sps:$4 sm:$0xff]   ;;  %v2547_v59 = vld [vmem:[#allocation5 + $0x48] ss:$16 sps:$4 sm:$0xff]   ;;  %v3208_v62 = vpack.c.bf16 %v232_v56, %v230_v55 }
  0x79   : > { %v2532_v29 = vld [vmem:[#allocation5 + $0x1a4] ss:$16 sps:$4 sm:$0xff]   ;;  %v2534_v30 = vld [vmem:[#allocation5 + $0x1a0] ss:$16 sps:$4 sm:$0xff]   ;;  %v2552_v61 = vld [vmem:[#allocation5 + $0x6c] ss:$16 sps:$4 sm:$0xff]   ;;  %p2901_p4 = pnand %p2900_p2, %p3119_p8 }
  0x7a   : > { %660 = vmatpush1.bf16.msra.mxu1 %v2504_v7  ;;  %v2535_v31 = vld [vmem:[#allocation5 + $0x1c4] ss:$16 sps:$4 sm:$0xff]   ;;  %v2537_v32 = vld [vmem:[#allocation5 + $0x1c0] ss:$16 sps:$4 sm:$0xff]   ;;  %v2550_v1 = vld [vmem:[#allocation5 + $0x68] ss:$16 sps:$4 sm:$0xff]  }
  0x7b   : > { %661 = vmatprep.subr.bf16.mxu1 %v2505_v8  ;;  %v2538_v33 = vld [vmem:[#allocation5 + $0x1e4] ss:$16 sps:$4 sm:$0xff]   ;;  %v2591_v35 = vld [vmem:[#allocation7] ss:$8 sps:$4 sm:$0xff]   ;;  %v2594_v43 = vld [vmem:[#allocation7 + $0x10] ss:$8 sps:$4 sm:$0xff]   ;;  %p2902_p6 = pneg %p2901_p4 }
  0x7c   : > { %v2589_v34 = vld [vmem:[#allocation7 + $0x4] ss:$8 sps:$4 sm:$0xff]   ;;  %v2592_v36 = vld [vmem:[#allocation7 + $0x14] ss:$8 sps:$4 sm:$0xff]   ;;  %v2540_v37 = vld [vmem:[#allocation5 + $0x1e0] ss:$16 sps:$4 sm:$0xff]  }
  0x7d   : > { %v221_v38 = vld [vmem:[%s3177_s29] sm:$0xff]  ;;  %v223_v39 = vld [vmem:[%s3177_s29 + $0x10] sm:$0xff]  ;;  %1871 = vmatprep.subr.bf16.mxu0 %v2589_v34  ;;  %v2555_v4 = vld [vmem:[#allocation5 + $0x8c] ss:$16 sps:$4 sm:$0xff]   ;;  %s2903_s21 = sshll.u32 %s2978_s10, 4  ;;  %s2904_s21 = int_to_ptr.vmem [resolvable:$false] %s2903_s21 }
  0x7e   : > { %662 = vmatpush1.bf16.msra.mxu1 %v2507_v9  ;;  %1872 = vmatpush1.bf16.msra.mxu0 %v2591_v35  ;;  %v3196_v44 = vpack.c.bf16 %v223_v39, %v221_v38  ;;  %v2595_v46 = vld [vmem:[#allocation7 + $0x24] ss:$8 sps:$4 sm:$0xff]   ;;  %v2597_v49 = vld [vmem:[#allocation7 + $0x20] ss:$8 sps:$4 sm:$0xff]   ;;  %v2598_v50 = vld [vmem:[#allocation7 + $0x34] ss:$8 sps:$4 sm:$0xff]   ;;  %p2906_p11 = scmp.lt.s32.totalorder %s3817_s7, %s2904_s21 }
  0x7f   : > { %663 = vmatprep.subr.bf16.mxu1 %v2508_v10  ;;  %1873 = vmatprep.subr.bf16.mxu0 %v2592_v36  ;;  %v225_v52 = vld [vmem:[%s3177_s29 + $0x20] sm:$0xff]  ;;  %v227_v53 = vld [vmem:[%s3177_s29 + $0x30] sm:$0xff]  ;;  %v234_v5 = vld [vmem:[%s3177_s29 + $0x68] sm:$0xff]  ;;  %s2905_s25 = scalar_lea.vmem %s2904_s21, 8192 }
  0x80   : > { %v2600_v57 = vld [vmem:[#allocation7 + $0x30] ss:$8 sps:$4 sm:$0xff]   ;;  %v2601_v58 = vld [vmem:[#allocation7 + $0x44] ss:$8 sps:$4 sm:$0xff]   ;;  %v3206_v60 = vpack.c.bf16 %v227_v53, %v225_v52  ;;  %v2603_v63 = vld [vmem:[#allocation7 + $0x40] ss:$8 sps:$4 sm:$0xff]   ;;  %p2907_p13 = scmp.lt.s32.totalorder %s2905_s25, %s2899_s30 }
  0x81   : > { %v2604_v0 = vld [vmem:[#allocation7 + $0x54] ss:$8 sps:$4 sm:$0xff]   ;;  %v229_v2 = vld [vmem:[%s3177_s29 + $0x40] sm:$0xff]  ;;  %v2606_v7 = vld [vmem:[#allocation7 + $0x50] ss:$8 sps:$4 sm:$0xff]  }
  0x82   : > { %664 = vmatpush1.bf16.msra.mxu1 %v2510_v11  ;;  %1874 = vmatpush1.bf16.msra.mxu0 %v2594_v43  ;;  %v231_v3 = vld [vmem:[%s3177_s29 + $0x50] sm:$0xff]  ;;  %v236_v6 = vld [vmem:[%s3177_s29 + $0x78] sm:$0xff]  ;;  %v2607_v8 = vld [vmem:[#allocation7 + $0x64] ss:$8 sps:$4 sm:$0xff]   ;;  %p2908_p3 = por %p2907_p13, %p2906_p11 }
  0x83   : > { %665 = vmatprep.subr.bf16.mxu1 %v2511_v12  ;;  %1875 = vmatprep.subr.bf16.mxu0 %v2595_v46  ;;  %v2553_v9 = vld [vmem:[#allocation5 + $0x88] ss:$16 sps:$4 sm:$0xff]   ;;  %v3216_v10 = vpack.c.bf16 %v231_v3, %v229_v2  ;;  %v3218_v11 = vpack.c.bf16 %v236_v6, %v234_v5  ;;  %v2558_v12 = vld [vmem:[#allocation5 + $0xac] ss:$16 sps:$4 sm:$0xff]   ;;  %v241_v38 = vld [vmem:[%s3177_s29 + $0xa0] sm:$0xff] }
  0x84   : > { %v2609_v13 = vld [vmem:[#allocation7 + $0x60] ss:$8 sps:$4 sm:$0xff]   ;;  %v2610_v14 = vld [vmem:[#allocation7 + $0x74] ss:$8 sps:$4 sm:$0xff]   ;;  %v2613_v5 = vld [vmem:[#allocation7 + $0x84] ss:$8 sps:$4 sm:$0xff]   ;;  %p2909_p7 = pnand %p2908_p3, %p2902_p6 }
  0x85   : > { %v2565_v34 = vld [vmem:[#allocation5 + $0x108] ss:$16 sps:$4 sm:$0xff]   ;;  %v2570_v36 = vld [vmem:[#allocation5 + $0x12c] ss:$16 sps:$4 sm:$0xff]   ;;  %v243_v39 = vld [vmem:[%s3177_s29 + $0xb0] sm:$0xff] }
  0x86   : > { %666 = vmatpush1.bf16.msra.mxu1 %v2513_v16  ;;  %1876 = vmatpush1.bf16.msra.mxu0 %v2597_v49  ;;  %v2556_v16 = vld [vmem:[#allocation5 + $0xa8] ss:$16 sps:$4 sm:$0xff]   ;;  %v3246_v43 = vpack.c.bf16 %v243_v39, %v241_v38  ;;  %v2579_v52 = vld [vmem:[#allocation5 + $0x18c] ss:$16 sps:$4 sm:$0xff]  }
  0x87   : > { %667 = vmatprep.subr.bf16.mxu1 %v2514_v17  ;;  %1877 = vmatprep.subr.bf16.mxu0 %v2598_v50  ;;  %v233_v17 = vld [vmem:[%s3177_s29 + $0x60] sm:$0xff]  ;;  %v246_v41 = vld [vmem:[%s3177_s29 + $0xc8] sm:$0xff]  ;;  %v248_v42 = vld [vmem:[%s3177_s29 + $0xd8] sm:$0xff] }
  0x88   : > { %v3248_v46 = vpack.c.bf16 %v248_v42, %v246_v41  ;;  %v2574_v49 = vld [vmem:[#allocation5 + $0x168] ss:$16 sps:$4 sm:$0xff]   ;;  %v245_v50 = vld [vmem:[%s3177_s29 + $0xc0] sm:$0xff]  ;;  %v2588_v3 = vld [vmem:[#allocation5 + $0x1ec] ss:$16 sps:$4 sm:$0xff]  }
  0x89   : > { %v250_v53 = vld [vmem:[%s3177_s29 + $0xe8] sm:$0xff] }
  0x8a   : > { %668 = vmatpush1.bf16.msra.mxu1 %v2516_v18  ;;  %1878 = vmatpush1.bf16.msra.mxu0 %v2600_v57  ;;  %v235_v18 = vld [vmem:[%s3177_s29 + $0x70] sm:$0xff]  ;;  %v2577_v56 = vld [vmem:[#allocation5 + $0x188] ss:$16 sps:$4 sm:$0xff]  }
  0x8b   : > { %669 = vmatprep.subr.bf16.mxu1 %v2517_v19  ;;  %1879 = vmatprep.subr.bf16.mxu0 %v2601_v58  ;;  %v2561_v19 = vld [vmem:[#allocation5 + $0xcc] ss:$16 sps:$4 sm:$0xff]   ;;  %v2583_v2 = vld [vmem:[#allocation5 + $0x1c8] ss:$16 sps:$4 sm:$0xff]  }
  0x8c   : > { %v2582_v58 = vld [vmem:[#allocation5 + $0x1ac] ss:$16 sps:$4 sm:$0xff]   ;;  %v2615_v6 = vld [vmem:[#allocation7 + $0x80] ss:$8 sps:$4 sm:$0xff]  }
  0x8e   : > { %670 = vmatpush1.bf16.msra.mxu1 %v2519_v20  ;;  %1880 = vmatpush1.bf16.msra.mxu0 %v2603_v63  ;;  %v238_v20 = vld [vmem:[%s3177_s29 + $0x88] sm:$0xff]  ;;  %v251_v63 = vld [vmem:[%s3177_s29 + $0xf0] sm:$0xff] }
  0x8f   : > { %671 = vmatprep.subr.bf16.mxu1 %v2520_v21  ;;  %1881 = vmatprep.subr.bf16.mxu0 %v2604_v0  ;;  %v240_v21 = vld [vmem:[%s3177_s29 + $0x98] sm:$0xff] }
  0x90   : > { %v2585_v0 = vld [vmem:[#allocation5 + $0x1cc] ss:$16 sps:$4 sm:$0xff]  }
  0x92   : > { %672 = vmatpush1.bf16.msra.mxu1 %v2522_v22  ;;  %1882 = vmatpush1.bf16.msra.mxu0 %v2606_v7  ;;  %v2612_v22 = vld [vmem:[#allocation7 + $0x70] ss:$8 sps:$4 sm:$0xff]   ;;  %v2616_v7 = vld [vmem:[#allocation7 + $0x94] ss:$8 sps:$4 sm:$0xff]  }
  0x93   : > { %673 = vmatprep.subr.bf16.mxu1 %v2523_v23  ;;  %1883 = vmatprep.subr.bf16.mxu0 %v2607_v8  ;;  %v3226_v23 = vpack.c.bf16 %v235_v18, %v233_v17  ;;  %v2625_v8 = vld [vmem:[#allocation7 + $0xc4] ss:$8 sps:$4 sm:$0xff]  }
  0x94   : > { %v2639_v17 = vld [vmem:[#allocation7 + $0x104] ss:$8 sps:$4 sm:$0xff]  }
  0x96   : > { %674 = vmatpush1.bf16.msra.mxu1 %v2525_v24  ;;  %1884 = vmatpush1.bf16.msra.mxu0 %v2609_v13  ;;  %v2559_v24 = vld [vmem:[#allocation5 + $0xc8] ss:$16 sps:$4 sm:$0xff]  }
  0x97   : > { %675 = vmatprep.subr.bf16.mxu1 %v2526_v25  ;;  %1885 = vmatprep.subr.bf16.mxu0 %v2610_v14  ;;  %v3228_v25 = vpack.c.bf16 %v240_v21, %v238_v20  ;;  %v2633_v13 = vld [vmem:[#allocation7 + $0xe0] ss:$8 sps:$4 sm:$0xff]   ;;  %v2634_v14 = vld [vmem:[#allocation7 + $0xf4] ss:$8 sps:$4 sm:$0xff]  }
  0x9a   : > { %676 = vmatpush1.bf16.msra.mxu1 %v2528_v26  ;;  %v2564_v26 = vld [vmem:[#allocation5 + $0xec] ss:$16 sps:$4 sm:$0xff]   ;;  %1886 = vmatpush1.bf16.msra.mxu0 %v2612_v22 }
  0x9b   : > { %677 = vmatprep.subr.bf16.mxu1 %v2529_v27  ;;  %v2562_v27 = vld [vmem:[#allocation5 + $0xe8] ss:$16 sps:$4 sm:$0xff]   ;;  %1887 = vmatprep.subr.bf16.mxu0 %v2613_v5 }
  0x9e   : > { %678 = vmatpush1.bf16.msra.mxu1 %v2531_v28  ;;  %v237_v28 = vld [vmem:[%s3177_s29 + $0x80] sm:$0xff]  ;;  %1888 = vmatpush1.bf16.msra.mxu0 %v2615_v6 }
  0x9f   : > { %679 = vmatprep.subr.bf16.mxu1 %v2532_v29  ;;  %v239_v29 = vld [vmem:[%s3177_s29 + $0x90] sm:$0xff]  ;;  %1889 = vmatprep.subr.bf16.mxu0 %v2616_v7 }
  0xa2   : > { %680 = vmatpush1.bf16.msra.mxu1 %v2534_v30  ;;  %v2567_v30 = vld [vmem:[#allocation5 + $0x10c] ss:$16 sps:$4 sm:$0xff]  }
  0xa3   : > { %681 = vmatprep.subr.bf16.mxu1 %v2535_v31  ;;  %v242_v31 = vld [vmem:[%s3177_s29 + $0xa8] sm:$0xff] }
  0xa6   : > { %682 = vmatpush1.bf16.msra.mxu1 %v2537_v32  ;;  %v244_v32 = vld [vmem:[%s3177_s29 + $0xb8] sm:$0xff] }
  0xa7   : > { %683 = vmatprep.subr.bf16.mxu1 %v2538_v33  ;;  %v3236_v33 = vpack.c.bf16 %v239_v29, %v237_v28  ;;  %v3238_v35 = vpack.c.bf16 %v244_v32, %v242_v31 }
  0xaa   : > { %684 = vmatpush1.bf16.msra.mxu1 %v2540_v37  ;;  %v2568_v37 = vld [vmem:[#allocation5 + $0x128] ss:$16 sps:$4 sm:$0xff]  }
  0xab   : > { %766 = vmatprep.subr.bf16.mxu1 %v2543_v40  ;;  %v2573_v40 = vld [vmem:[#allocation5 + $0x14c] ss:$16 sps:$4 sm:$0xff]  }
  0xad   : > { %686 = vmatmul.mubr.bf16.vlgmr.msra.gmra.mrb[0].mxu1 %v3196_v44 }
  0xae   : > { %767 = vmatpush1.bf16.msra.mxu1 %v2541_v45  ;;  %695 = vmatprep.mubr.bf16.mxu1 %v3198_v48  ;;  %v2571_v45 = vld [vmem:[#allocation5 + $0x148] ss:$16 sps:$4 sm:$0xff]  }
  0xaf   : > { %768 = vmatprep.subr.bf16.mxu1 %v2546_v47  ;;  %v2576_v47 = vld [vmem:[#allocation5 + $0x16c] ss:$16 sps:$4 sm:$0xff]  }
  0xb2   : > { %769 = vmatpush1.bf16.msra.mxu1 %v2544_v51  ;;  %v247_v51 = vld [vmem:[%s3177_s29 + $0xd0] sm:$0xff] }
  0xb3   : > { %770 = vmatprep.subr.bf16.mxu1 %v2549_v54  ;;  %v252_v54 = vld [vmem:[%s3177_s29 + $0xf8] sm:$0xff]  ;;  %v3256_v55 = vpack.c.bf16 %v247_v51, %v245_v50 }
  0xb4   : > { %v3258_v57 = vpack.c.bf16 %v252_v54, %v250_v53 }
  0xb5   : > { %696 = vmatmul.mubr.bf16.gmra.mrb[4].mxu1 %v3206_v60 }
  0xb6   : > { %771 = vmatpush1.bf16.msra.mxu1 %v2547_v59  ;;  %705 = vmatprep.mubr.bf16.mxu1 %v3208_v62  ;;  %v2580_v59 = vld [vmem:[#allocation5 + $0x1a8] ss:$16 sps:$4 sm:$0xff]  }
  0xb7   : > { %772 = vmatprep.subr.bf16.mxu1 %v2552_v61  ;;  %v249_v61 = vld [vmem:[%s3177_s29 + $0xe0] sm:$0xff] }
  0xba   : > { %773 = vmatpush1.bf16.msra.mxu1 %v2550_v1  ;;  %v267_v1 = vpack.c.bf16 %v251_v63, %v249_v61 }
  0xbb   : > { %774 = vmatprep.subr.bf16.mxu1 %v2555_v4  ;;  %v2586_v4 = vld [vmem:[#allocation5 + $0x1e8] ss:$16 sps:$4 sm:$0xff]  }
  0xbd   : > { %706 = vmatmul.mubr.bf16.gmra.mrb[8].mxu1 %v3216_v10 }
  0xbe   : > { %775 = vmatpush1.bf16.msra.mxu1 %v2553_v9  ;;  %715 = vmatprep.mubr.bf16.mxu1 %v3218_v11  ;;  %v2627_v9 = vld [vmem:[#allocation7 + $0xc0] ss:$8 sps:$4 sm:$0xff]  }
  0xbf   : > { %776 = vmatprep.subr.bf16.mxu1 %v2558_v12  ;;  %v2631_v12 = vld [vmem:[#allocation7 + $0xe4] ss:$8 sps:$4 sm:$0xff]  }
  0xc2   : > { %777 = vmatpush1.bf16.msra.mxu1 %v2556_v16  ;;  %v2636_v16 = vld [vmem:[#allocation7 + $0xf0] ss:$8 sps:$4 sm:$0xff]  }
  0xc3   : > { %778 = vmatprep.subr.bf16.mxu1 %v2561_v19 }
  0xc5   : > { %716 = vmatmul.mubr.bf16.gmra.mrb[12].mxu1 %v3226_v23 }
  0xc6   : > { %779 = vmatpush1.bf16.msra.mxu1 %v2559_v24  ;;  %725 = vmatprep.mubr.bf16.mxu1 %v3228_v25 }
  0xc7   : > { %780 = vmatprep.subr.bf16.mxu1 %v2564_v26 }
  0xca   : > { %781 = vmatpush1.bf16.msra.mxu1 %v2562_v27 }
  0xcb   : > { %782 = vmatprep.subr.bf16.mxu1 %v2567_v30 }
  0xcd   : > { %726 = vmatmul.mubr.bf16.gmra.mrb[16].mxu1 %v3236_v33 }
  0xce   : > { %783 = vmatpush1.bf16.msra.mxu1 %v2565_v34  ;;  %735 = vmatprep.mubr.bf16.mxu1 %v3238_v35 }
  0xcf   : > { %784 = vmatprep.subr.bf16.mxu1 %v2570_v36 }
  0xd2   : > { %785 = vmatpush1.bf16.msra.mxu1 %v2568_v37 }
  0xd3   : > { %786 = vmatprep.subr.bf16.mxu1 %v2573_v40 }
  0xd5   : > { %736 = vmatmul.mubr.bf16.gmra.mrb[20].mxu1 %v3246_v43 }
  0xd6   : > { %787 = vmatpush1.bf16.msra.mxu1 %v2571_v45  ;;  %745 = vmatprep.mubr.bf16.mxu1 %v3248_v46 }
  0xd7   : > { %788 = vmatprep.subr.bf16.mxu1 %v2576_v47 }
  0xda   : > { %789 = vmatpush1.bf16.msra.mxu1 %v2574_v49 }
  0xdb   : > { %790 = vmatprep.subr.bf16.mxu1 %v2579_v52 }
  0xdd   : > { %746 = vmatmul.mubr.bf16.gmra.mrb[24].mxu1 %v3256_v55 }
  0xde   : > { %791 = vmatpush1.bf16.msra.mxu1 %v2577_v56  ;;  %755 = vmatprep.mubr.bf16.mxu1 %v3258_v57 }
  0xdf   : > { %792 = vmatprep.subr.bf16.mxu1 %v2582_v58 }
  0xe2   : > { %793 = vmatpush1.bf16.msra.mxu1 %v2580_v59 }
  0xe3   : > { %794 = vmatprep.subr.bf16.mxu1 %v2585_v0 }
  0xe5   : > { %756 = vmatmul.mubr.bf16.gmra.mrb[28].mxu1 %v267_v1 }
  0xe6   : > { %795 = vmatpush1.bf16.msra.mxu1 %v2583_v2  ;;  %798 = vmatprep.mubr.bf16.mxu1 %v3189_v15  ;;  %v2618_v15 = vld [vmem:[#allocation7 + $0x90] ss:$8 sps:$4 sm:$0xff]  }
  0xe7   : > { %796 = vmatprep.subr.bf16.mxu1 %v2588_v3  ;;  %1890 = vmatpush1.bf16.msra.mxu0 %v2618_v15 }
  0xea   : > { %797 = vmatpush1.bf16.msra.mxu1 %v2586_v4 }
  0xed   : > { %799 = vmatmul.mubr.bf16.vlgmr.msra.gmra.mrb[32].mxu1 %v3196_v44  ;;  %v2619_v44 = vld [vmem:[#allocation7 + $0xa4] ss:$8 sps:$4 sm:$0xff]  }
  0xee   : > { %808 = vmatprep.mubr.bf16.mxu1 %v3198_v48  ;;  %v2621_v48 = vld [vmem:[#allocation7 + $0xa0] ss:$8 sps:$4 sm:$0xff]   ;;  %1891 = vmatprep.subr.bf16.mxu0 %v2619_v44 }
  0xef   : > { %1892 = vmatpush1.bf16.msra.mxu0 %v2621_v48 }
  0xf5   : > { %809 = vmatmul.mubr.bf16.gmra.mrb[36].mxu1 %v3206_v60  ;;  %v2622_v60 = vld [vmem:[#allocation7 + $0xb4] ss:$8 sps:$4 sm:$0xff]  }
  0xf6   : > { %818 = vmatprep.mubr.bf16.mxu1 %v3208_v62  ;;  %v2624_v62 = vld [vmem:[#allocation7 + $0xb0] ss:$8 sps:$4 sm:$0xff]   ;;  %1893 = vmatprep.subr.bf16.mxu0 %v2622_v60 }
  0xf7   : > { %1894 = vmatpush1.bf16.msra.mxu0 %v2624_v62 }
  0xf8   : > { %1895 = vmatprep.subr.bf16.mxu0 %v2625_v8 }
  0xfb   : > { %1896 = vmatpush1.bf16.msra.mxu0 %v2627_v9 }
  0xfd   : > { %819 = vmatmul.mubr.bf16.gmra.mrb[40].mxu1 %v3216_v10  ;;  %v2628_v10 = vld [vmem:[#allocation7 + $0xd4] ss:$8 sps:$4 sm:$0xff]  }
  0xfe   : > { %828 = vmatprep.mubr.bf16.mxu1 %v3218_v11  ;;  %v2630_v11 = vld [vmem:[#allocation7 + $0xd0] ss:$8 sps:$4 sm:$0xff]   ;;  %1897 = vmatprep.subr.bf16.mxu0 %v2628_v10 }
  0xff   : > { %1898 = vmatpush1.bf16.msra.mxu0 %v2630_v11 }
 0x100   : > { %1899 = vmatprep.subr.bf16.mxu0 %v2631_v12 }
 0x103   : > { %1900 = vmatpush1.bf16.msra.mxu0 %v2633_v13 }
 0x104   : > { %1901 = vmatprep.subr.bf16.mxu0 %v2634_v14 }
 0x105   : > { %829 = vmatmul.mubr.bf16.gmra.mrb[44].mxu1 %v3226_v23 }
 0x106   : > { %838 = vmatprep.mubr.bf16.mxu1 %v3228_v25 }
 0x107   : > { %1902 = vmatpush1.bf16.msra.mxu0 %v2636_v16 }
 0x108   : > { %1984 = vmatprep.subr.bf16.mxu0 %v2639_v17 }
 0x10d   : > { %839 = vmatmul.mubr.bf16.gmra.mrb[48].mxu1 %v3236_v33 }
 0x10e   : > { %848 = vmatprep.mubr.bf16.mxu1 %v3238_v35 }
 0x115   : > { %849 = vmatmul.mubr.bf16.gmra.mrb[52].mxu1 %v3246_v43 }
 0x116   : > { %858 = vmatprep.mubr.bf16.mxu1 %v3248_v46 }
 0x11d   : > { %859 = vmatmul.mubr.bf16.gmra.mrb[56].mxu1 %v3256_v55 }
 0x11e   : > { %868 = vmatprep.mubr.bf16.mxu1 %v3258_v57 }
 0x125   : > { %869 = vmatmul.mubr.bf16.gmra.mrb[60].mxu1 %v267_v1 }
 0x180   : > { %v687_v18 = vpop.f32.mrb[0].mxu1 }
 0x181   : > { %v943_v19 = vmul.f32 0.044715, %v687_v18  ;;  %v689_v20 = vpop.f32.mrb[1].mxu1  ;;  %v3279_v41 = vmul.f32 0.5, %v687_v18 }
 0x182   : > { %v944_v21 = vmul.f32 0.044715, %v689_v20  ;;  %v691_v22 = vpop.f32.mrb[2].mxu1  ;;  %v3281_v45 = vmul.f32 0.5, %v689_v20 }
 0x183   : > { %v1007_v23 = vmul.f32 %v943_v19, %v687_v18  ;;  %v947_v24 = vmul.f32 0.044715, %v691_v22  ;;  %v693_v25 = vpop.f32.mrb[3].mxu1  ;;  %v3283_v58 = vmul.f32 0.5, %v691_v22 }
 0x184   : > { %v1008_v26 = vmul.f32 %v944_v21, %v689_v20  ;;  %v948_v27 = vmul.f32 0.044715, %v693_v25  ;;  %v3285_v63 = vmul.f32 0.5, %v693_v25 }
 0x185   : > { %v1071_v28 = vmul.f32 %v1007_v23, %v687_v18  ;;  %v1011_v29 = vmul.f32 %v947_v24, %v691_v22 }
 0x186   : > { %v1072_v30 = vmul.f32 %v1008_v26, %v689_v20  ;;  %v1012_v31 = vmul.f32 %v948_v27, %v693_v25 }
 0x187   : > { %v1135_v32 = vadd.f32 %v1071_v28, %v687_v18  ;;  %v1075_v33 = vmul.f32 %v1011_v29, %v691_v22 }
 0x188   : > { %v1076_v34 = vmul.f32 %v1012_v31, %v693_v25  ;;  %v697_v35 = vpop.f32.mrb[4].mxu1  ;;  %v1136_v36 = vadd.f32 %v1072_v30, %v689_v20 }
 0x189   : > { %v1199_v37 = vmul.f32 0.7978846, %v1135_v32  ;;  %v1139_v38 = vadd.f32 %v1075_v33, %v691_v22  ;;  %v951_v39 = vmul.f32 0.044715, %v697_v35  ;;  %v699_v40 = vpop.f32.mrb[5].mxu1  ;;  %v3289_v3 = vmul.f32 0.5, %v697_v35 }
 0x18a   : > { %v952_v42 = vmul.f32 0.044715, %v699_v40  ;;  %v701_v43 = vpop.f32.mrb[6].mxu1  ;;  %v1140_v46 = vadd.f32 %v1076_v34, %v693_v25  ;;  %v1200_v47 = vmul.f32 0.7978846, %v1136_v36  ;;  %v3287_v2 = vmul.f32 0.5, %v699_v40 }
 0x18b   : > { %2685 = vtanh.f32 %v1199_v37  ;;  %v1203_v49 = vmul.f32 0.7978846, %v1139_v38  ;;  %v1015_v50 = vmul.f32 %v951_v39, %v697_v35  ;;  %v955_v51 = vmul.f32 0.044715, %v701_v43  ;;  %v703_v52 = vpop.f32.mrb[7].mxu1 }
 0x18c   : > { %v1016_v53 = vmul.f32 %v952_v42, %v699_v40  ;;  %v956_v54 = vmul.f32 0.044715, %v703_v52  ;;  %v1204_v55 = vmul.f32 0.7978846, %v1140_v46  ;;  %2687 = vtanh.f32 %v1200_v47 }
 0x18d   : > { %2689 = vtanh.f32 %v1203_v49  ;;  %v1079_v56 = vmul.f32 %v1015_v50, %v697_v35  ;;  %v1019_v57 = vmul.f32 %v955_v51, %v701_v43  ;;  %v3291_v7 = vmul.f32 0.5, %v703_v52 }
 0x18e   : > { %v1080_v59 = vmul.f32 %v1016_v53, %v699_v40  ;;  %v1020_v61 = vmul.f32 %v956_v54, %v703_v52  ;;  %2691 = vtanh.f32 %v1204_v55  ;;  %v3293_v15 = vmul.f32 0.5, %v701_v43 }
 0x18f   : > { %v1143_v0 = vadd.f32 %v1079_v56, %v697_v35  ;;  %v1083_v1 = vmul.f32 %v1019_v57, %v701_v43 }
 0x190   : > { %v1144_v4 = vadd.f32 %v1080_v59, %v699_v40  ;;  %v1084_v5 = vmul.f32 %v1020_v61, %v703_v52  ;;  %v707_v6 = vpop.f32.mrb[8].mxu1 }
 0x191   : > { %v1207_v44 = vmul.f32 0.7978846, %v1143_v0  ;;  %v1147_v48 = vadd.f32 %v1083_v1, %v701_v43  ;;  %v959_v60 = vmul.f32 0.044715, %v707_v6  ;;  %v709_v62 = vpop.f32.mrb[9].mxu1  ;;  %v3295_v8 = vmul.f32 0.5, %v707_v6 }
 0x192   : > { %v1208_v9 = vmul.f32 0.7978846, %v1144_v4  ;;  %v1148_v10 = vadd.f32 %v1084_v5, %v703_v52  ;;  %v960_v11 = vmul.f32 0.044715, %v709_v62  ;;  %v711_v12 = vpop.f32.mrb[10].mxu1  ;;  %v3297_v13 = vmul.f32 0.5, %v709_v62 }
 0x193   : > { %2693 = vtanh.f32 %v1207_v44  ;;  %v1211_v14 = vmul.f32 0.7978846, %v1147_v48  ;;  %v1023_v16 = vmul.f32 %v959_v60, %v707_v6  ;;  %v963_v17 = vmul.f32 0.044715, %v711_v12  ;;  %v713_v18 = vpop.f32.mrb[11].mxu1 }
 0x194   : > { %2695 = vtanh.f32 %v1208_v9  ;;  %v1212_v19 = vmul.f32 0.7978846, %v1148_v10  ;;  %v1024_v20 = vmul.f32 %v960_v11, %v709_v62  ;;  %v964_v21 = vmul.f32 0.044715, %v713_v18 }
 0x195   : > { %v2686_v22 = vpop.eup %2685  ;;  %2697 = vtanh.f32 %v1211_v14  ;;  %v1087_v23 = vmul.f32 %v1023_v16, %v707_v6  ;;  %v1027_v24 = vmul.f32 %v963_v17, %v711_v12  ;;  %v3299_v25 = vmul.f32 0.5, %v713_v18 }
 0x196   : > { %v2688_v26 = vpop.eup %2687  ;;  %2699 = vtanh.f32 %v1212_v19  ;;  %v1088_v27 = vmul.f32 %v1024_v20, %v709_v62  ;;  %v1028_v28 = vmul.f32 %v964_v21, %v713_v18  ;;  %v1327_v29 = vadd.f32 1.0, %v2686_v22  ;;  %v2642_v20 = vld [vmem:[#allocation7 + $0x114] ss:$8 sps:$4 sm:$0xff]  }
 0x197   : > { %v2690_v30 = vpop.eup %2689  ;;  %v1151_v31 = vadd.f32 %v1087_v23, %v707_v6  ;;  %v1091_v32 = vmul.f32 %v1027_v24, %v711_v12  ;;  %v1328_v33 = vadd.f32 1.0, %v2688_v26  ;;  %v3301_v34 = vmul.f32 0.5, %v711_v12  ;;  %v2640_v26 = vld [vmem:[#allocation7 + $0x110] ss:$8 sps:$4 sm:$0xff]  }
 0x198   : > { %v2692_v35 = vpop.eup %2691  ;;  %v1152_v36 = vadd.f32 %v1088_v27, %v709_v62  ;;  %v1092_v37 = vmul.f32 %v1028_v28, %v713_v18  ;;  %v3303_v38 = vpop.f32.mrb[12].mxu1  ;;  %v1331_v39 = vadd.f32 1.0, %v2690_v30  ;;  %v1391_v40 = vmul.f32 %v1327_v29, %v3279_v41 }
 0x199   : > { %v1215_v42 = vmul.f32 0.7978846, %v1151_v31  ;;  %v1155_v43 = vadd.f32 %v1091_v32, %v711_v12  ;;  %v967_v46 = vmul.f32 0.044715, %v3303_v38  ;;  %v3307_v47 = vpop.f32.mrb[13].mxu1  ;;  %v1332_v49 = vadd.f32 1.0, %v2692_v35 }
 0x19a   : > { %v1216_v50 = vmul.f32 0.7978846, %v1152_v36  ;;  %v1156_v51 = vadd.f32 %v1092_v37, %v713_v18  ;;  %v968_v52 = vmul.f32 0.044715, %v3307_v47  ;;  %v3310_v53 = vpop.f32.mrb[14].mxu1  ;;  %v1392_v54 = vmul.f32 %v1328_v33, %v3281_v45 }
 0x19b   : > { %2701 = vtanh.f32 %v1215_v42  ;;  %v1219_v55 = vmul.f32 0.7978846, %v1155_v43  ;;  %v1031_v56 = vmul.f32 %v967_v46, %v3303_v38  ;;  %v971_v41 = vmul.f32 0.044715, %v3310_v53  ;;  %v3315_v57 = vpop.f32.mrb[15].mxu1 }
 0x19c   : > { %2703 = vtanh.f32 %v1216_v50  ;;  %v1220_v59 = vmul.f32 0.7978846, %v1156_v51  ;;  %v1032_v61 = vmul.f32 %v968_v52, %v3307_v47  ;;  %v972_v0 = vmul.f32 0.044715, %v3315_v57  ;;  %v2637_v12 = vld [vmem:[#allocation7 + $0x100] ss:$8 sps:$4 sm:$0xff]  }
 0x19d   : > { %v2694_v1 = vpop.eup %2693  ;;  %2705 = vtanh.f32 %v1219_v55  ;;  %v1095_v4 = vmul.f32 %v1031_v56, %v3303_v38  ;;  %v1035_v45 = vmul.f32 %v971_v41, %v3310_v53  ;;  %v1396_v5 = vmul.f32 %v1332_v49, %v3285_v63  ;;  %v2645_v43 = vld [vmem:[#allocation7 + $0x124] ss:$8 sps:$4 sm:$0xff]  }
 0x19e   : > { %v2696_v6 = vpop.eup %2695  ;;  %2707 = vtanh.f32 %v1220_v59  ;;  %v1096_v44 = vmul.f32 %v1032_v61, %v3307_v47  ;;  %v1036_v48 = vmul.f32 %v972_v0, %v3315_v57  ;;  %v1395_v60 = vmul.f32 %v1331_v39, %v3283_v58 }
 0x19f   : > { %v2698_v62 = vpop.eup %2697  ;;  %v1159_v9 = vadd.f32 %v1095_v4, %v3303_v38  ;;  %v1099_v10 = vmul.f32 %v1035_v45, %v3310_v53  ;;  %v1456_v11 = vpack.c.bf16 %v1396_v5, %v1392_v54  ;;  %v1336_v14 = vadd.f32 1.0, %v2696_v6 }
 0x1a0   : > { %v2700_v16 = vpop.eup %2699  ;;  %v1160_v17 = vadd.f32 %v1096_v44, %v3307_v47  ;;  %v1100_v63 = vmul.f32 %v1036_v48, %v3315_v57  ;;  %v3329_v18 = vpop.f32.mrb[16].mxu1  ;;  %v1455_v19 = vpack.c.bf16 %v1395_v60, %v1391_v40  ;;  %v1335_v21 = vadd.f32 1.0, %v2694_v1  ;;  %v2643_v1 = vld [vmem:[#allocation7 + $0x120] ss:$8 sps:$4 sm:$0xff]   ;;  %v2648_v44 = vld [vmem:[#allocation7 + $0x134] ss:$8 sps:$4 sm:$0xff]  }
 0x1a1   : > { %v1223_v22 = vmul.f32 0.7978846, %v1159_v9  ;;  %v1163_v58 = vadd.f32 %v1099_v10, %v3310_v53  ;;  %1903 = vmatprep.mubr.bf16.mxu0 %v1456_v11  ;;  %v975_v23 = vmul.f32 0.044715, %v3329_v18  ;;  %v3333_v24 = vpop.f32.mrb[17].mxu1  ;;  %v1340_v27 = vadd.f32 1.0, %v2700_v16 }
 0x1a2   : > { %v1224_v28 = vmul.f32 0.7978846, %v1160_v17  ;;  %v1164_v29 = vadd.f32 %v1100_v63, %v3315_v57  ;;  %1904 = vmatmul.mubr.bf16.vlgmr.msra.gmra.mrb[0].mxu0 %v1455_v19  ;;  %v976_v30 = vmul.f32 0.044715, %v3333_v24  ;;  %v3337_v31 = vpop.f32.mrb[18].mxu1  ;;  %v1400_v32 = vmul.f32 %v1336_v14, %v3287_v2 }
 0x1a3   : > { %2709 = vtanh.f32 %v1223_v22  ;;  %v1227_v33 = vmul.f32 0.7978846, %v1163_v58  ;;  %v1039_v35 = vmul.f32 %v975_v23, %v3329_v18  ;;  %1985 = vmatpush1.bf16.msra.mxu0 %v2637_v12  ;;  %v979_v36 = vmul.f32 0.044715, %v3337_v31  ;;  %v3342_v37 = vpop.f32.mrb[19].mxu1 }
 0x1a4   : > { %2711 = vtanh.f32 %v1224_v28  ;;  %v1228_v39 = vmul.f32 0.7978846, %v1164_v29  ;;  %v1040_v40 = vmul.f32 %v976_v30, %v3333_v24  ;;  %v980_v42 = vmul.f32 0.044715, %v3342_v37  ;;  %1986 = vmatprep.subr.bf16.mxu0 %v2642_v20  ;;  %v2646_v10 = vld [vmem:[#allocation7 + $0x130] ss:$8 sps:$4 sm:$0xff]  }
 0x1a5   : > { %v3346_v46 = vpop.eup %2701  ;;  %2713 = vtanh.f32 %v1227_v33  ;;  %v1103_v2 = vmul.f32 %v1039_v35, %v3329_v18  ;;  %v1043_v49 = vmul.f32 %v979_v36, %v3337_v31  ;;  %v1404_v50 = vmul.f32 %v1340_v27, %v3291_v7 }
 0x1a6   : > { %v2704_v51 = vpop.eup %2703  ;;  %2715 = vtanh.f32 %v1228_v39  ;;  %v1104_v52 = vmul.f32 %v1040_v40, %v3333_v24  ;;  %v1044_v54 = vmul.f32 %v980_v42, %v3342_v37  ;;  %v1339_v55 = vadd.f32 1.0, %v2698_v62 }
 0x1a7   : > { %v2706_v56 = vpop.eup %2705  ;;  %v1167_v41 = vadd.f32 %v1103_v2, %v3329_v18  ;;  %v1107_v59 = vmul.f32 %v1043_v49, %v3337_v31  ;;  %1987 = vmatpush1.bf16.msra.mxu0 %v2640_v26  ;;  %v1460_v61 = vpack.c.bf16 %v1404_v50, %v1400_v32  ;;  %v1399_v0 = vmul.f32 %v1335_v21, %v3289_v3  ;;  %v2651_v26 = vld [vmem:[#allocation7 + $0x144] ss:$8 sps:$4 sm:$0xff]   ;;  %v2649_v49 = vld [vmem:[#allocation7 + $0x140] ss:$8 sps:$4 sm:$0xff]  }
 0x1a8   : > { %v2708_v4 = vpop.eup %2707  ;;  %v1168_v7 = vadd.f32 %v1104_v52, %v3333_v24  ;;  %v1108_v45 = vmul.f32 %v1044_v54, %v3342_v37  ;;  %v3358_v5 = vpop.f32.mrb[20].mxu1  ;;  %v1403_v6 = vmul.f32 %v1339_v55, %v3293_v15  ;;  %1988 = vmatprep.subr.bf16.mxu0 %v2645_v43  ;;  %v1344_v48 = vadd.f32 1.0, %v2704_v51 }
 0x1a9   : > { %v1231_v60 = vmul.f32 0.7978846, %v1167_v41  ;;  %v1171_v62 = vadd.f32 %v1107_v59, %v3337_v31  ;;  %1913 = vmatprep.mubr.bf16.mxu0 %v1460_v61  ;;  %v983_v9 = vmul.f32 0.044715, %v3358_v5  ;;  %v3363_v3 = vpop.f32.mrb[21].mxu1  ;;  %v1348_v11 = vadd.f32 1.0, %v2708_v4 }
 0x1aa   : > { %v1232_v12 = vmul.f32 0.7978846, %v1168_v7  ;;  %v1172_v14 = vadd.f32 %v1108_v45, %v3342_v37  ;;  %v1459_v16 = vpack.c.bf16 %v1403_v6, %v1399_v0  ;;  %v984_v17 = vmul.f32 0.044715, %v3363_v3  ;;  %v3367_v15 = vpop.f32.mrb[22].mxu1 }
 0x1ab   : > { %2717 = vtanh.f32 %v1231_v60  ;;  %v1235_v63 = vmul.f32 0.7978846, %v1171_v62  ;;  %v1047_v19 = vmul.f32 %v983_v9, %v3358_v5  ;;  %1989 = vmatpush1.bf16.msra.mxu0 %v2643_v1  ;;  %v987_v20 = vmul.f32 0.044715, %v3367_v15  ;;  %v3371_v21 = vpop.f32.mrb[23].mxu1 }
 0x1ac   : > { %2719 = vtanh.f32 %v1232_v12  ;;  %v1236_v22 = vmul.f32 0.7978846, %v1172_v14  ;;  %1914 = vmatmul.mubr.bf16.gmra.mrb[4].mxu0 %v1459_v16  ;;  %v1048_v58 = vmul.f32 %v984_v17, %v3363_v3  ;;  %v988_v23 = vmul.f32 0.044715, %v3371_v21  ;;  %1990 = vmatprep.subr.bf16.mxu0 %v2648_v44  ;;  %v2652_v0 = vld [vmem:[#allocation7 + $0x150] ss:$8 sps:$4 sm:$0xff]  }
 0x1ad   : > { %v3375_v27 = vpop.eup %2709  ;;  %2721 = vtanh.f32 %v1235_v63  ;;  %v1111_v28 = vmul.f32 %v1047_v19, %v3358_v5  ;;  %v1051_v29 = vmul.f32 %v987_v20, %v3367_v15  ;;  %v1408_v30 = vmul.f32 %v1344_v48, %v3297_v13 }
 0x1ae   : > { %v2712_v32 = vpop.eup %2711  ;;  %2723 = vtanh.f32 %v1236_v22  ;;  %v1112_v33 = vmul.f32 %v1048_v58, %v3363_v3  ;;  %v1052_v35 = vmul.f32 %v988_v23, %v3371_v21  ;;  %v1412_v36 = vmul.f32 %v1348_v11, %v3299_v25  ;;  %v2654_v25 = vld [vmem:[#allocation7 + $0x154] ss:$8 sps:$4 sm:$0xff]  }
 0x1af   : > { %v3383_v39 = vpop.eup %2713  ;;  %v1175_v40 = vadd.f32 %v1111_v28, %v3358_v5  ;;  %v1115_v42 = vmul.f32 %v1051_v29, %v3367_v15  ;;  %1991 = vmatpush1.bf16.msra.mxu0 %v2646_v10  ;;  %v1343_v43 = vadd.f32 1.0, %v3346_v46  ;;  %v1347_v2 = vadd.f32 1.0, %v2706_v56  ;;  %v2655_v28 = vld [vmem:[#allocation7 + $0x160] ss:$8 sps:$4 sm:$0xff]  }
 0x1b0   : > { %v2716_v13 = vpop.eup %2715  ;;  %v1176_v50 = vadd.f32 %v1112_v33, %v3363_v3  ;;  %v1116_v51 = vmul.f32 %v1052_v35, %v3371_v21  ;;  %v1464_v52 = vpack.c.bf16 %v1412_v36, %v1408_v30  ;;  %v3390_v54 = vpop.f32.mrb[24].mxu1  ;;  %1992 = vmatprep.subr.bf16.mxu0 %v2651_v26  ;;  %v904_v55 = vmul.f32 0.5, %v3307_v47  ;;  %v2660_v36 = vld [vmem:[#allocation7 + $0x174] ss:$8 sps:$4 sm:$0xff]  }
 0x1b1   : > { %v1239_v41 = vmul.f32 0.7978846, %v1175_v40  ;;  %v1179_v59 = vadd.f32 %v1115_v42, %v3367_v15  ;;  %v991_v61 = vmul.f32 0.044715, %v3390_v54  ;;  %v1407_v46 = vmul.f32 %v1343_v43, %v3295_v8  ;;  %v3396_v56 = vpop.f32.mrb[25].mxu1 }
 0x1b2   : > { %v1240_v1 = vmul.f32 0.7978846, %v1176_v50  ;;  %v1180_v4 = vadd.f32 %v1116_v51, %v3371_v21  ;;  %1923 = vmatprep.mubr.bf16.mxu0 %v1464_v52  ;;  %v1411_v7 = vmul.f32 %v1347_v2, %v3301_v34  ;;  %v992_v45 = vmul.f32 0.044715, %v3396_v56  ;;  %v3401_v6 = vpop.f32.mrb[26].mxu1 }
 0x1b3   : > { %2725 = vtanh.f32 %v1239_v41  ;;  %v1243_v47 = vmul.f32 0.7978846, %v1179_v59  ;;  %v1055_v44 = vmul.f32 %v991_v61, %v3390_v54  ;;  %1993 = vmatpush1.bf16.msra.mxu0 %v2649_v49  ;;  %v995_v8 = vmul.f32 0.044715, %v3401_v6  ;;  %v3405_v48 = vpop.f32.mrb[27].mxu1 }
 0x1b4   : > { %2727 = vtanh.f32 %v1240_v1  ;;  %v1244_v60 = vmul.f32 0.7978846, %v1180_v4  ;;  %v1463_v62 = vpack.c.bf16 %v1411_v7, %v1407_v46  ;;  %v1056_v9 = vmul.f32 %v992_v45, %v3396_v56  ;;  %1994 = vmatprep.subr.bf16.mxu0 %v2654_v25  ;;  %v2657_v34 = vld [vmem:[#allocation7 + $0x164] ss:$8 sps:$4 sm:$0xff]   ;;  %v2658_v41 = vld [vmem:[#allocation7 + $0x170] ss:$8 sps:$4 sm:$0xff]  }
 0x1b5   : > { %v3408_v10 = vpop.eup %2717  ;;  %2729 = vtanh.f32 %v1243_v47  ;;  %v1119_v11 = vmul.f32 %v1055_v44, %v3390_v54  ;;  %v1059_v12 = vmul.f32 %v995_v8, %v3401_v6  ;;  %v996_v14 = vmul.f32 0.044715, %v3405_v48 }
 0x1b6   : > { %v3413_v16 = vpop.eup %2719  ;;  %2731 = vtanh.f32 %v1244_v60  ;;  %1924 = vmatmul.mubr.bf16.gmra.mrb[8].mxu0 %v1463_v62  ;;  %v1120_v17 = vmul.f32 %v1056_v9, %v3396_v56  ;;  %v908_v63 = vmul.f32 0.5, %v3315_v57  ;;  %v1352_v19 = vadd.f32 1.0, %v2712_v32 }
 0x1b7   : > { %v3417_v20 = vpop.eup %2721  ;;  %v1183_v22 = vadd.f32 %v1119_v11, %v3390_v54  ;;  %v1123_v58 = vmul.f32 %v1059_v12, %v3401_v6  ;;  %v1060_v23 = vmul.f32 %v996_v14, %v3405_v48  ;;  %1995 = vmatpush1.bf16.msra.mxu0 %v2652_v0  ;;  %v1356_v26 = vadd.f32 1.0, %v2716_v13  ;;  %v2661_v12 = vld [vmem:[#allocation7 + $0x180] ss:$8 sps:$4 sm:$0xff]  }
 0x1b8   : > { %v2724_v29 = vpop.eup %2723  ;;  %v1184_v30 = vadd.f32 %v1120_v17, %v3396_v56  ;;  %v1416_v33 = vmul.f32 %v1352_v19, %v904_v55  ;;  %v3423_v35 = vpop.f32.mrb[28].mxu1  ;;  %v903_v57 = vmul.f32 0.5, %v3303_v38  ;;  %v907_v32 = vmul.f32 0.5, %v3310_v53  ;;  %1996 = vmatprep.subr.bf16.mxu0 %v2657_v34 }
 0x1b9   : > { %v1247_v40 = vmul.f32 0.7978846, %v1183_v22  ;;  %v1187_v42 = vadd.f32 %v1123_v58, %v3401_v6  ;;  %v1124_v43 = vmul.f32 %v1060_v23, %v3405_v48  ;;  %v1420_v2 = vmul.f32 %v1356_v26, %v908_v63  ;;  %v3429_v49 = vpop.f32.mrb[29].mxu1  ;;  %v2666_v58 = vld [vmem:[#allocation7 + $0x194] ss:$8 sps:$4 sm:$0xff]  }
 0x1ba   : > { %v1248_v13 = vmul.f32 0.7978846, %v1184_v30  ;;  %v999_v50 = vmul.f32 0.044715, %v3423_v35  ;;  %v1351_v51 = vadd.f32 1.0, %v3375_v27  ;;  %v1355_v52 = vadd.f32 1.0, %v3383_v39 }
 0x1bb   : > { %2733 = vtanh.f32 %v1247_v40  ;;  %v1251_v38 = vmul.f32 0.7978846, %v1187_v42  ;;  %v1188_v53 = vadd.f32 %v1124_v43, %v3405_v48  ;;  %v1468_v25 = vpack.c.bf16 %v1420_v2, %v1416_v33  ;;  %1997 = vmatpush1.bf16.msra.mxu0 %v2655_v28  ;;  %v3435_v55 = vpop.f32.mrb[30].mxu1  ;;  %v2663_v27 = vld [vmem:[#allocation7 + $0x184] ss:$8 sps:$4 sm:$0xff]  }
 0x1bc   : > { %2735 = vtanh.f32 %v1248_v13  ;;  %v1063_v59 = vmul.f32 %v999_v50, %v3423_v35  ;;  %v1415_v61 = vmul.f32 %v1351_v51, %v903_v57  ;;  %v1419_v46 = vmul.f32 %v1355_v52, %v907_v32  ;;  %v3438_v0 = vpop.f32.mrb[31].mxu1  ;;  %1998 = vmatprep.subr.bf16.mxu0 %v2660_v36  ;;  %v2664_v13 = vld [vmem:[#allocation7 + $0x190] ss:$8 sps:$4 sm:$0xff]  }
 0x1bd   : > { %v3440_v1 = vpop.eup %2725  ;;  %2737 = vtanh.f32 %v1251_v38  ;;  %v1252_v39 = vmul.f32 0.7978846, %v1188_v53  ;;  %1933 = vmatprep.mubr.bf16.mxu0 %v1468_v25  ;;  %v1000_v4 = vmul.f32 0.044715, %v3429_v49  ;;  %v1003_v7 = vmul.f32 0.044715, %v3435_v55 }
 0x1be   : > { %v3444_v45 = vpop.eup %2727  ;;  %v1127_v47 = vmul.f32 %v1063_v59, %v3423_v35  ;;  %v1467_v44 = vpack.c.bf16 %v1419_v46, %v1415_v61  ;;  %v1004_v8 = vmul.f32 0.044715, %v3438_v0  ;;  %v912_v60 = vmul.f32 0.5, %v3333_v24  ;;  %v2669_v38 = vld [vmem:[#allocation7 + $0x1a4] ss:$8 sps:$4 sm:$0xff]  }
 0x1bf   : > { %v3449_v62 = vpop.eup %2729  ;;  %2739 = vtanh.f32 %v1252_v39  ;;  %v1064_v9 = vmul.f32 %v1000_v4, %v3429_v49  ;;  %v1067_v34 = vmul.f32 %v1003_v7, %v3435_v55  ;;  %1999 = vmatpush1.bf16.msra.mxu0 %v2658_v41  ;;  %v916_v11 = vmul.f32 0.5, %v3342_v37 }
 0x1c0   : > { %v3454_v14 = vpop.eup %2731  ;;  %v1191_v17 = vadd.f32 %v1127_v47, %v3423_v35  ;;  %1934 = vmatmul.mubr.bf16.gmra.mrb[12].mxu0 %v1467_v44  ;;  %v1068_v63 = vmul.f32 %v1004_v8, %v3438_v0  ;;  %v1360_v24 = vadd.f32 1.0, %v3413_v16  ;;  %v1364_v19 = vadd.f32 1.0, %v2724_v29  ;;  %v800_v22 = vpop.f32.mrb[32].mxu1  ;;  %2000 = vmatprep.subr.bf16.mxu0 %v2663_v27 }
 0x1c1   : > { %v1128_v23 = vmul.f32 %v1064_v9, %v3429_v49  ;;  %v1131_v26 = vmul.f32 %v1067_v34, %v3435_v55  ;;  %v3461_v28 = vmul.f32 0.5, %v800_v22  ;;  %v945_v37 = vmul.f32 0.044715, %v800_v22  ;;  %v3463_v30 = vpop.f32.mrb[33].mxu1  ;;  %v2672_v34 = vld [vmem:[#allocation7 + $0x1b4] ss:$8 sps:$4 sm:$0xff]  }
 0x1c2   : > { %v1255_v33 = vmul.f32 0.7978846, %v1191_v17  ;;  %v1132_v57 = vmul.f32 %v1068_v63, %v3438_v0  ;;  %v1424_v32 = vmul.f32 %v1360_v24, %v912_v60  ;;  %v1428_v36 = vmul.f32 %v1364_v19, %v916_v11  ;;  %v3466_v40 = vpop.f32.mrb[34].mxu1 }
 0x1c3   : > { %v1192_v16 = vadd.f32 %v1128_v23, %v3429_v49  ;;  %v1195_v29 = vadd.f32 %v1131_v26, %v3435_v55  ;;  %v1009_v42 = vmul.f32 %v945_v37, %v800_v22  ;;  %v911_v43 = vmul.f32 0.5, %v3329_v18  ;;  %2001 = vmatpush1.bf16.msra.mxu0 %v2661_v12  ;;  %v3471_v2 = vpop.f32.mrb[35].mxu1 }
 0x1c4   : > { %2741 = vtanh.f32 %v1255_v33  ;;  %v1196_v50 = vadd.f32 %v1132_v57, %v3438_v0  ;;  %v1472_v51 = vpack.c.bf16 %v1428_v36, %v1424_v32  ;;  %v915_v52 = vmul.f32 0.5, %v3337_v31  ;;  %2002 = vmatprep.subr.bf16.mxu0 %v2666_v58  ;;  %v2670_v32 = vld [vmem:[#allocation7 + $0x1b0] ss:$8 sps:$4 sm:$0xff]  }
 0x1c5   : > { %v3475_v53 = vpop.eup %2733  ;;  %v1256_v25 = vmul.f32 0.7978846, %v1192_v16  ;;  %v1259_v41 = vmul.f32 0.7978846, %v1195_v29  ;;  %v1073_v59 = vmul.f32 %v1009_v42, %v800_v22  ;;  %v1359_v61 = vadd.f32 1.0, %v3408_v10 }
 0x1c6   : > { %v3478_v18 = vpop.eup %2735  ;;  %v1260_v46 = vmul.f32 0.7978846, %v1196_v50  ;;  %1943 = vmatprep.mubr.bf16.mxu0 %v1472_v51  ;;  %v1363_v27 = vadd.f32 1.0, %v3417_v20  ;;  %v946_v39 = vmul.f32 0.044715, %v3463_v30  ;;  %v3483_v4 = vmul.f32 0.5, %v3466_v40 }
 0x1c7   : > { %v3485_v31 = vpop.eup %2737  ;;  %2743 = vtanh.f32 %v1256_v25  ;;  %v1137_v7 = vadd.f32 %v1073_v59, %v800_v22  ;;  %v1423_v47 = vmul.f32 %v1359_v61, %v911_v43  ;;  %v949_v44 = vmul.f32 0.044715, %v3466_v40  ;;  %2003 = vmatpush1.bf16.msra.mxu0 %v2664_v13  ;;  %v2667_v10 = vld [vmem:[#allocation7 + $0x1a0] ss:$8 sps:$4 sm:$0xff]   ;;  %v2675_v42 = vld [vmem:[#allocation7 + $0x1c4] ss:$8 sps:$4 sm:$0xff]  }
 0x1c8   : > { %2745 = vtanh.f32 %v1259_v41  ;;  %v1427_v8 = vmul.f32 %v1363_v27, %v915_v52  ;;  %v1010_v60 = vmul.f32 %v946_v39, %v3463_v30  ;;  %v950_v20 = vmul.f32 0.044715, %v3471_v2  ;;  %v3490_v9 = vpop.f32.mrb[36].mxu1  ;;  %2004 = vmatprep.subr.bf16.mxu0 %v2669_v38  ;;  %v2673_v41 = vld [vmem:[#allocation7 + $0x1c0] ss:$8 sps:$4 sm:$0xff]  }
 0x1c9   : > { %v3492_v11 = vpop.eup %2739  ;;  %2747 = vtanh.f32 %v1260_v46  ;;  %v1201_v12 = vmul.f32 0.7978846, %v1137_v7  ;;  %v1013_v17 = vmul.f32 %v949_v44, %v3466_v40  ;;  %v920_v63 = vmul.f32 0.5, %v3363_v3  ;;  %v3496_v24 = vpop.f32.mrb[37].mxu1  ;;  %v2678_v7 = vld [vmem:[#allocation7 + $0x1d4] ss:$8 sps:$4 sm:$0xff]  }
 0x1ca   : > { %v1471_v19 = vpack.c.bf16 %v1427_v8, %v1423_v47  ;;  %v1074_v22 = vmul.f32 %v1010_v60, %v3463_v30  ;;  %v1014_v58 = vmul.f32 %v950_v20, %v3471_v2  ;;  %v924_v23 = vmul.f32 0.5, %v3371_v21  ;;  %v3501_v26 = vpop.f32.mrb[38].mxu1 }
 0x1cb   : > { %2749 = vtanh.f32 %v1201_v12  ;;  %v1077_v37 = vmul.f32 %v1013_v17, %v3466_v40  ;;  %v1368_v33 = vadd.f32 1.0, %v3444_v45  ;;  %v1372_v57 = vadd.f32 1.0, %v3454_v14  ;;  %2005 = vmatpush1.bf16.msra.mxu0 %v2667_v10  ;;  %v3506_v3 = vpop.f32.mrb[39].mxu1 }
 0x1cc   : > { %1944 = vmatmul.mubr.bf16.gmra.mrb[16].mxu0 %v1471_v19  ;;  %v1138_v36 = vadd.f32 %v1074_v22, %v3463_v30  ;;  %v1078_v16 = vmul.f32 %v1014_v58, %v3471_v2  ;;  %v953_v21 = vmul.f32 0.044715, %v3490_v9  ;;  %v919_v29 = vmul.f32 0.5, %v3358_v5  ;;  %2006 = vmatprep.subr.bf16.mxu0 %v2672_v34 }
 0x1cd   : > { %v1141_v43 = vadd.f32 %v1077_v37, %v3466_v40  ;;  %v1432_v45 = vmul.f32 %v1368_v33, %v920_v63  ;;  %v1436_v13 = vmul.f32 %v1372_v57, %v924_v23  ;;  %v923_v14 = vmul.f32 0.5, %v3367_v15  ;;  %v2676_v37 = vld [vmem:[#allocation7 + $0x1d0] ss:$8 sps:$4 sm:$0xff]  }
 0x1ce   : > { %v3514_v50 = vpop.eup %2741  ;;  %v1202_v51 = vmul.f32 0.7978846, %v1138_v36  ;;  %v1142_v52 = vadd.f32 %v1078_v16, %v3471_v2  ;;  %v1017_v38 = vmul.f32 %v953_v21, %v3490_v9  ;;  %v1367_v25 = vadd.f32 1.0, %v3440_v1  ;;  %v2681_v36 = vld [vmem:[#allocation7 + $0x1e4] ss:$8 sps:$4 sm:$0xff]  }
 0x1cf   : > { %v1205_v59 = vmul.f32 0.7978846, %v1141_v43  ;;  %v1476_v5 = vpack.c.bf16 %v1436_v13, %v1432_v45  ;;  %v1371_v61 = vadd.f32 1.0, %v3449_v62  ;;  %v954_v40 = vmul.f32 0.044715, %v3496_v24  ;;  %2007 = vmatpush1.bf16.msra.mxu0 %v2670_v32 }
 0x1d0   : > { %2751 = vtanh.f32 %v1202_v51  ;;  %v1206_v46 = vmul.f32 0.7978846, %v1142_v52  ;;  %v1081_v15 = vmul.f32 %v1017_v38, %v3490_v9  ;;  %v1431_v27 = vmul.f32 %v1367_v25, %v919_v29  ;;  %v3522_v39 = vpop.f32.mrb[40].mxu1  ;;  %2008 = vmatprep.subr.bf16.mxu0 %v2675_v42  ;;  %v2679_v52 = vld [vmem:[#allocation7 + $0x1e0] ss:$8 sps:$4 sm:$0xff]  }
 0x1d1   : > { %v3524_v47 = vpop.eup %2743  ;;  %2753 = vtanh.f32 %v1205_v59  ;;  %1953 = vmatprep.mubr.bf16.mxu0 %v1476_v5  ;;  %v1435_v1 = vmul.f32 %v1371_v61, %v923_v14  ;;  %v1018_v44 = vmul.f32 %v954_v40, %v3496_v24  ;;  %v957_v62 = vmul.f32 0.044715, %v3501_v26  ;;  %v3528_v10 = vpop.f32.mrb[41].mxu1  ;;  %v2684_v5 = vld [vmem:[#allocation7 + $0x1f4] ss:$8 sps:$4 sm:$0xff]  }
 0x1d2   : > { %v3530_v8 = vpop.eup %2745  ;;  %2755 = vtanh.f32 %v1206_v46  ;;  %v1145_v60 = vadd.f32 %v1081_v15, %v3490_v9  ;;  %v958_v20 = vmul.f32 0.044715, %v3506_v3  ;;  %v928_v34 = vmul.f32 0.5, %v3396_v56  ;;  %v3535_v12 = vpop.f32.mrb[42].mxu1 }
 0x1d3   : > { %v3537_v17 = vpop.eup %2747  ;;  %v1475_v63 = vpack.c.bf16 %v1435_v1, %v1431_v27  ;;  %v1082_v19 = vmul.f32 %v1018_v44, %v3496_v24  ;;  %v1021_v22 = vmul.f32 %v957_v62, %v3501_v26  ;;  %v932_v58 = vmul.f32 0.5, %v3405_v48  ;;  %2009 = vmatpush1.bf16.msra.mxu0 %v2673_v41  ;;  %v3542_v23 = vpop.f32.mrb[43].mxu1  ;;  %v2682_v27 = vld [vmem:[#allocation7 + $0x1f0] ss:$8 sps:$4 sm:$0xff]  }
 0x1d4   : > { %v1209_v33 = vmul.f32 0.7978846, %v1145_v60  ;;  %v1022_v57 = vmul.f32 %v958_v20, %v3506_v3  ;;  %v1376_v56 = vadd.f32 1.0, %v3478_v18  ;;  %v1380_v32 = vadd.f32 1.0, %v3492_v11  ;;  %2010 = vmatprep.subr.bf16.mxu0 %v2678_v7 }
 0x1d5   : > { %v2750_v16 = vpop.eup %2749  ;;  %1954 = vmatmul.mubr.bf16.gmra.mrb[20].mxu0 %v1475_v63  ;;  %v1146_v21 = vadd.f32 %v1082_v19, %v3496_v24  ;;  %v1085_v29 = vmul.f32 %v1021_v22, %v3501_v26  ;;  %v961_v48 = vmul.f32 0.044715, %v3522_v39  ;;  %v927_v42 = vmul.f32 0.5, %v3390_v54 }
 0x1d6   : > { %v1329_v43 = vadd.f32 1.0, %v2750_v16  ;;  %2757 = vtanh.f32 %v1209_v33  ;;  %v1086_v45 = vmul.f32 %v1022_v57, %v3506_v3  ;;  %v1440_v13 = vmul.f32 %v1376_v56, %v928_v34 }
 0x1d7   : > { %v1210_v18 = vmul.f32 0.7978846, %v1146_v21  ;;  %v1149_v11 = vadd.f32 %v1085_v29, %v3501_v26  ;;  %v1444_v14 = vmul.f32 %v1380_v32, %v932_v58  ;;  %v1025_v51 = vmul.f32 %v961_v48, %v3522_v39  ;;  %2011 = vmatpush1.bf16.msra.mxu0 %v2676_v37 }
 0x1d8   : > { %v3555_v38 = vmul.f32 %v1329_v43, %v3461_v28  ;;  %v1150_v25 = vadd.f32 %v1086_v45, %v3506_v3  ;;  %v931_v54 = vmul.f32 0.5, %v3401_v6  ;;  %v1375_v41 = vadd.f32 1.0, %v3475_v53  ;;  %v3560_v59 = vpop.f32.mrb[44].mxu1  ;;  %2012 = vmatprep.subr.bf16.mxu0 %v2681_v36 }
 0x1d9   : > { %2759 = vtanh.f32 %v1210_v18  ;;  %v1213_v61 = vmul.f32 0.7978846, %v1149_v11  ;;  %v1480_v40 = vpack.c.bf16 %v1444_v14, %v1440_v13  ;;  %v1089_v46 = vmul.f32 %v1025_v51, %v3522_v39  ;;  %v3563_v15 = vpop.f32.mrb[45].mxu1 }
 0x1da   : > { %v3565_v28 = vpop.eup %2751  ;;  %v1214_v7 = vmul.f32 0.7978846, %v1150_v25  ;;  %v1379_v1 = vadd.f32 1.0, %v3485_v31  ;;  %v1439_v6 = vmul.f32 %v1375_v41, %v927_v42  ;;  %v962_v53 = vmul.f32 0.044715, %v3528_v10  ;;  %v3569_v44 = vpop.f32.mrb[46].mxu1 }
 0x1db   : > { %v2754_v62 = vpop.eup %2753  ;;  %2761 = vtanh.f32 %v1213_v61  ;;  %1963 = vmatprep.mubr.bf16.mxu0 %v1480_v40  ;;  %v1153_v60 = vadd.f32 %v1089_v46, %v3522_v39  ;;  %v965_v20 = vmul.f32 0.044715, %v3535_v12  ;;  %v966_v34 = vmul.f32 0.044715, %v3542_v23  ;;  %2013 = vmatpush1.bf16.msra.mxu0 %v2679_v52  ;;  %v3574_v63 = vpop.f32.mrb[47].mxu1 }
 0x1dc   : > { %v3576_v19 = vpop.eup %2755  ;;  %v1333_v31 = vadd.f32 1.0, %v2754_v62  ;;  %2763 = vtanh.f32 %v1214_v7  ;;  %v1443_v22 = vmul.f32 %v1379_v1, %v931_v54  ;;  %v1026_v58 = vmul.f32 %v962_v53, %v3528_v10  ;;  %2014 = vmatprep.subr.bf16.mxu0 %v2684_v5 }
 0x1dd   : > { %v1217_v37 = vmul.f32 0.7978846, %v1153_v60  ;;  %v1029_v33 = vmul.f32 %v965_v20, %v3535_v12  ;;  %v1030_v57 = vmul.f32 %v966_v34, %v3542_v23  ;;  %v936_v56 = vmul.f32 0.5, %v3429_v49 }
 0x1de   : > { %v3583_v32 = vmul.f32 %v1333_v31, %v3483_v4  ;;  %v1479_v36 = vpack.c.bf16 %v1443_v22, %v1439_v6  ;;  %v1090_v16 = vmul.f32 %v1026_v58, %v3528_v10  ;;  %v940_v21 = vmul.f32 0.5, %v3438_v0 }
 0x1df   : > { %2765 = vtanh.f32 %v1217_v37  ;;  %v1093_v29 = vmul.f32 %v1029_v33, %v3535_v12  ;;  %v1094_v48 = vmul.f32 %v1030_v57, %v3542_v23  ;;  %v1384_v42 = vadd.f32 1.0, %v3524_v47  ;;  %2015 = vmatpush1.bf16.msra.mxu0 %v2682_v27 }
 0x1e0   : > { %v3590_v43 = vpop.eup %2757  ;;  %1964 = vmatmul.mubr.bf16.gmra.mrb[24].mxu0 %v1479_v36  ;;  %v1154_v49 = vadd.f32 %v1090_v16, %v3528_v10  ;;  %v1388_v4 = vadd.f32 1.0, %v3537_v17  ;;  %v969_v45 = vmul.f32 0.044715, %v3560_v59  ;;  %v935_v13 = vmul.f32 0.5, %v3423_v35  ;;  %v3596_v0 = vpop.f32.mrb[48].mxu1 }
 0x1e1   : > { %v1157_v18 = vadd.f32 %v1093_v29, %v3535_v12  ;;  %v1158_v11 = vadd.f32 %v1094_v48, %v3542_v23  ;;  %v1448_v14 = vmul.f32 %v1384_v42, %v936_v56  ;;  %v939_v47 = vmul.f32 0.5, %v3435_v55  ;;  %v3601_v51 = vpop.f32.mrb[49].mxu1 }
 0x1e2   : > { %v1218_v52 = vmul.f32 0.7978846, %v1154_v49  ;;  %v1452_v25 = vmul.f32 %v1388_v4, %v940_v21  ;;  %v1033_v54 = vmul.f32 %v969_v45, %v3560_v59  ;;  %v1383_v17 = vadd.f32 1.0, %v3514_v50  ;;  %v3605_v41 = vpop.f32.mrb[50].mxu1 }
 0x1e3   : > { %v3607_v35 = vpop.eup %2759  ;;  %v1221_v5 = vmul.f32 0.7978846, %v1157_v18  ;;  %v1222_v61 = vmul.f32 0.7978846, %v1158_v11  ;;  %v1387_v40 = vadd.f32 1.0, %v3530_v8  ;;  %v882_v46 = vmul.f32 0.5, %v3463_v30 }
 0x1e4   : > { %2767 = vtanh.f32 %v1218_v52  ;;  %v1484_v55 = vpack.c.bf16 %v1452_v25, %v1448_v14  ;;  %v1097_v27 = vmul.f32 %v1033_v54, %v3560_v59  ;;  %v1447_v7 = vmul.f32 %v1383_v17, %v935_v13  ;;  %v3612_v1 = vpop.f32.mrb[51].mxu1 }
 0x1e5   : > { %v3614_v6 = vpop.eup %2761  ;;  %2769 = vtanh.f32 %v1221_v5  ;;  %v1451_v50 = vmul.f32 %v1387_v40, %v939_v47  ;;  %v970_v53 = vmul.f32 0.044715, %v3563_v15  ;;  %v973_v62 = vmul.f32 0.044715, %v3569_v44 }
 0x1e6   : > { %v2764_v60 = vpop.eup %2763  ;;  %2771 = vtanh.f32 %v1222_v61  ;;  %1973 = vmatprep.mubr.bf16.mxu0 %v1484_v55  ;;  %v1161_v30 = vadd.f32 %v1097_v27, %v3560_v59  ;;  %v974_v8 = vmul.f32 0.044715, %v3574_v63  ;;  %v886_v20 = vmul.f32 0.5, %v3471_v2 }
 0x1e7   : > { %v1483_v34 = vpack.c.bf16 %v1451_v50, %v1447_v7  ;;  %v1034_v31 = vmul.f32 %v970_v53, %v3563_v15  ;;  %v1037_v22 = vmul.f32 %v973_v62, %v3569_v44  ;;  %v1330_v58 = vadd.f32 1.0, %v3565_v28 }
 0x1e8   : > { %v1225_v37 = vmul.f32 0.7978846, %v1161_v30  ;;  %v1038_v33 = vmul.f32 %v974_v8, %v3574_v63  ;;  %v1334_v57 = vadd.f32 1.0, %v3576_v19  ;;  %v977_v56 = vmul.f32 0.044715, %v3596_v0  ;;  %v3627_v36 = vpop.f32.mrb[52].mxu1 }
 0x1e9   : > { %v3629_v16 = vpop.eup %2765  ;;  %1974 = vmatmul.mubr.bf16.gmra.mrb[28].mxu0 %v1483_v34  ;;  %v1098_v2 = vmul.f32 %v1034_v31, %v3563_v15  ;;  %v1101_v21 = vmul.f32 %v1037_v22, %v3569_v44  ;;  %v1394_v29 = vmul.f32 %v1330_v58, %v882_v46  ;;  %v1457_v28 = vpack.c.bf16 %v3583_v32, %v3555_v38  ;;  %v3635_v48 = vpop.f32.mrb[53].mxu1 }
 0x1ea   : > { %2773 = vtanh.f32 %v1225_v37  ;;  %v1102_v19 = vmul.f32 %v1038_v33, %v3574_v63  ;;  %v1398_v42 = vmul.f32 %v1334_v57, %v886_v20  ;;  %v1041_v49 = vmul.f32 %v977_v56, %v3596_v0  ;;  %v3639_v4 = vpop.f32.mrb[54].mxu1 }
 0x1eb   : > { %v1162_v45 = vadd.f32 %v1098_v2, %v3563_v15  ;;  %v1165_v13 = vadd.f32 %v1101_v21, %v3569_v44  ;;  %v978_v18 = vmul.f32 0.044715, %v3601_v51  ;;  %v981_v11 = vmul.f32 0.044715, %v3605_v41  ;;  %v3645_v14 = vpop.f32.mrb[55].mxu1 }
 0x1ec   : > { %v1166_v38 = vadd.f32 %v1102_v19, %v3574_v63  ;;  %v1458_v32 = vpack.c.bf16 %v1398_v42, %v1394_v29  ;;  %v1105_v47 = vmul.f32 %v1041_v49, %v3596_v0  ;;  %v982_v52 = vmul.f32 0.044715, %v3612_v1 }
 0x1ed   : > { %v1226_v25 = vmul.f32 0.7978846, %v1162_v45  ;;  %v1229_v54 = vmul.f32 0.7978846, %v1165_v13  ;;  %v1042_v17 = vmul.f32 %v978_v18, %v3601_v51  ;;  %v1045_v5 = vmul.f32 %v981_v11, %v3605_v41 }
 0x1ee   : > { %v2768_v61 = vpop.eup %2767  ;;  %v1230_v40 = vmul.f32 0.7978846, %v1166_v38  ;;  %2016 = vmatprep.mubr.bf16.mxu0 %v1458_v32  ;;  %v1169_v46 = vadd.f32 %v1105_v47, %v3596_v0  ;;  %v1046_v55 = vmul.f32 %v982_v52, %v3612_v1  ;;  %v890_v27 = vmul.f32 0.5, %v3496_v24 }
 0x1ef   : > { %v3655_v7 = vpop.eup %2769  ;;  %2775 = vtanh.f32 %v1226_v25  ;;  %v1106_v50 = vmul.f32 %v1042_v17, %v3601_v51  ;;  %v1109_v53 = vmul.f32 %v1045_v5, %v3605_v41  ;;  %v894_v62 = vmul.f32 0.5, %v3506_v3 }
 0x1f0   : > { %v2772_v30 = vpop.eup %2771  ;;  %2777 = vtanh.f32 %v1229_v54  ;;  %v1233_v8 = vmul.f32 0.7978846, %v1169_v46  ;;  %v1110_v20 = vmul.f32 %v1046_v55, %v3612_v1  ;;  %v1338_v34 = vadd.f32 1.0, %v3607_v35  ;;  %v3662_v31 = vpop.f32.mrb[56].mxu1 }
 0x1f1   : > { %2779 = vtanh.f32 %v1230_v40  ;;  %2017 = vmatmul.mubr.bf16.vlgmr.msra.gmra.mrb[0].mxu0 %v1457_v28  ;;  %v1170_v24 = vadd.f32 %v1106_v50, %v3601_v51  ;;  %v1173_v22 = vadd.f32 %v1109_v53, %v3605_v41  ;;  %v1342_v58 = vadd.f32 1.0, %v2764_v60  ;;  %v3666_v37 = vpop.f32.mrb[57].mxu1 }
 0x1f2   : > { %2781 = vtanh.f32 %v1233_v8  ;;  %v1174_v3 = vadd.f32 %v1110_v20, %v3612_v1  ;;  %v1402_v33 = vmul.f32 %v1338_v34, %v890_v27  ;;  %v985_v57 = vmul.f32 0.044715, %v3627_v36  ;;  %v3670_v56 = vpop.f32.mrb[58].mxu1 }
 0x1f3   : > { %v1234_v35 = vmul.f32 0.7978846, %v1170_v24  ;;  %v1237_v2 = vmul.f32 0.7978846, %v1173_v22  ;;  %v1406_v21 = vmul.f32 %v1342_v58, %v894_v62  ;;  %v889_v29 = vmul.f32 0.5, %v3490_v9  ;;  %v3673_v28 = vpop.f32.mrb[59].mxu1 }
 0x1f4   : > { %v3675_v19 = vpop.eup %2773  ;;  %v1238_v60 = vmul.f32 0.7978846, %v1174_v3  ;;  %v1049_v42 = vmul.f32 %v985_v57, %v3627_v36  ;;  %v893_v49 = vmul.f32 0.5, %v3501_v26  ;;  %v1337_v45 = vadd.f32 1.0, %v3590_v43 }
 0x1f5   : > { %2783 = vtanh.f32 %v1234_v35  ;;  %v1462_v13 = vpack.c.bf16 %v1406_v21, %v1402_v33  ;;  %v1341_v18 = vadd.f32 1.0, %v3614_v6  ;;  %v986_v11 = vmul.f32 0.044715, %v3635_v48 }
 0x1f6   : > { %2785 = vtanh.f32 %v1237_v2  ;;  %v1113_v9 = vmul.f32 %v1049_v42, %v3627_v36  ;;  %v1401_v38 = vmul.f32 %v1337_v45, %v889_v29  ;;  %v989_v32 = vmul.f32 0.044715, %v3639_v4 }
 0x1f7   : > { %2787 = vtanh.f32 %v1238_v60  ;;  %2026 = vmatprep.mubr.bf16.mxu0 %v1462_v13  ;;  %v1405_v47 = vmul.f32 %v1341_v18, %v893_v49  ;;  %v1050_v52 = vmul.f32 %v986_v11, %v3635_v48  ;;  %v990_v26 = vmul.f32 0.044715, %v3645_v14 }
 0x1f8   : > { %v1177_v43 = vadd.f32 %v1113_v9, %v3627_v36  ;;  %v1053_v25 = vmul.f32 %v989_v32, %v3639_v4  ;;  %v898_v6 = vmul.f32 0.5, %v3528_v10  ;;  %v902_v54 = vmul.f32 0.5, %v3542_v23  ;;  %v3690_v17 = vpop.f32.mrb[60].mxu1 }
 0x1f9   : > { %v2776_v5 = vpop.eup %2775  ;;  %v1461_v40 = vpack.c.bf16 %v1405_v47, %v1401_v38  ;;  %v1114_v46 = vmul.f32 %v1050_v52, %v3635_v48  ;;  %v1054_v55 = vmul.f32 %v990_v26, %v3645_v14  ;;  %v1346_v27 = vadd.f32 1.0, %v2768_v61  ;;  %v3694_v50 = vpop.f32.mrb[61].mxu1 }
 0x1fa   : > { %v3696_v53 = vpop.eup %2777  ;;  %v1241_v62 = vmul.f32 0.7978846, %v1177_v43  ;;  %v1117_v8 = vmul.f32 %v1053_v25, %v3639_v4  ;;  %v1350_v20 = vadd.f32 1.0, %v2772_v30  ;;  %v993_v10 = vmul.f32 0.044715, %v3662_v31  ;;  %v3700_v23 = vpop.f32.mrb[62].mxu1 }
 0x1fb   : > { %v2780_v34 = vpop.eup %2779  ;;  %2027 = vmatmul.mubr.bf16.gmra.mrb[4].mxu0 %v1461_v40  ;;  %v1178_v24 = vadd.f32 %v1114_v46, %v3635_v48  ;;  %v1118_v22 = vmul.f32 %v1054_v55, %v3645_v14  ;;  %v1410_v58 = vmul.f32 %v1346_v27, %v898_v6  ;;  %v897_v61 = vmul.f32 0.5, %v3522_v39  ;;  %v3705_v3 = vpop.f32.mrb[63].mxu1 }
 0x1fc   : > { %v3707_v33 = vpop.eup %2781  ;;  %2789 = vtanh.f32 %v1241_v62  ;;  %v1181_v30 = vadd.f32 %v1117_v8, %v3639_v4  ;;  %v1414_v57 = vmul.f32 %v1350_v20, %v902_v54  ;;  %v1057_v35 = vmul.f32 %v993_v10, %v3662_v31 }
 0x1fd   : > { %v1242_v2 = vmul.f32 0.7978846, %v1178_v24  ;;  %v1182_v21 = vadd.f32 %v1118_v22, %v3645_v14  ;;  %v901_v29 = vmul.f32 0.5, %v3535_v12  ;;  %v1345_v60 = vadd.f32 1.0, %v3629_v16 }
 0x1fe   : > { %v1245_v42 = vmul.f32 0.7978846, %v1181_v30  ;;  %v1466_v49 = vpack.c.bf16 %v1414_v57, %v1410_v58  ;;  %v1121_v39 = vmul.f32 %v1057_v35, %v3662_v31  ;;  %v1349_v45 = vadd.f32 1.0, %v3655_v7 }
 0x1ff   : > { %v3716_v13 = vpop.eup %2783  ;;  %2791 = vtanh.f32 %v1242_v2  ;;  %v1246_v18 = vmul.f32 0.7978846, %v1182_v21  ;;  %v1409_v11 = vmul.f32 %v1345_v60, %v897_v61  ;;  %v994_v9 = vmul.f32 0.044715, %v3666_v37 }
 0x200   : > { %v3719_v38 = vpop.eup %2785  ;;  %2793 = vtanh.f32 %v1245_v42  ;;  %2036 = vmatprep.mubr.bf16.mxu0 %v1466_v49  ;;  %v1185_v12 = vadd.f32 %v1121_v39, %v3662_v31  ;;  %v1413_v16 = vmul.f32 %v1349_v45, %v901_v29  ;;  %v997_v32 = vmul.f32 0.044715, %v3670_v56 }
 0x201   : > { %v2788_v47 = vpop.eup %2787  ;;  %2795 = vtanh.f32 %v1246_v18  ;;  %v1058_v7 = vmul.f32 %v994_v9, %v3666_v37  ;;  %v998_v52 = vmul.f32 0.044715, %v3673_v28  ;;  %v906_v26 = vmul.f32 0.5, %v3563_v15 }
 0x202   : > { %v1249_v43 = vmul.f32 0.7978846, %v1185_v12  ;;  %v1465_v25 = vpack.c.bf16 %v1413_v16, %v1409_v11  ;;  %v1061_v6 = vmul.f32 %v997_v32, %v3670_v56  ;;  %v910_v54 = vmul.f32 0.5, %v3574_v63 }
 0x203   : > { %v1122_v40 = vmul.f32 %v1058_v7, %v3666_v37  ;;  %v1062_v46 = vmul.f32 %v998_v52, %v3673_v28  ;;  %v1354_v55 = vadd.f32 1.0, %v2776_v5  ;;  %v1358_v27 = vadd.f32 1.0, %v2780_v34 }
 0x204   : > { %2797 = vtanh.f32 %v1249_v43  ;;  %2037 = vmatmul.mubr.bf16.gmra.mrb[8].mxu0 %v1465_v25  ;;  %v1125_v62 = vmul.f32 %v1061_v6, %v3670_v56  ;;  %v1001_v8 = vmul.f32 0.044715, %v3690_v17  ;;  %v905_v15 = vmul.f32 0.5, %v3560_v59 }
 0x205   : > { %v1186_v20 = vadd.f32 %v1122_v40, %v3666_v37  ;;  %v1126_v10 = vmul.f32 %v1062_v46, %v3673_v28  ;;  %v1418_v24 = vmul.f32 %v1354_v55, %v906_v26  ;;  %v1422_v63 = vmul.f32 %v1358_v27, %v910_v54 }
 0x206   : > { %v3735_v22 = vpop.eup %2789  ;;  %v1189_v58 = vadd.f32 %v1125_v62, %v3670_v56  ;;  %v1065_v5 = vmul.f32 %v1001_v8, %v3690_v17  ;;  %v909_v34 = vmul.f32 0.5, %v3569_v44  ;;  %v1353_v61 = vadd.f32 1.0, %v3675_v19 }
 0x207   : > { %v1250_v30 = vmul.f32 0.7978846, %v1186_v20  ;;  %v1190_v57 = vadd.f32 %v1126_v10, %v3673_v28  ;;  %v1470_v59 = vpack.c.bf16 %v1422_v63, %v1418_v24  ;;  %v1357_v35 = vadd.f32 1.0, %v3696_v53 }
 0x208   : > { %v1253_v2 = vmul.f32 0.7978846, %v1189_v58  ;;  %v1129_v21 = vmul.f32 %v1065_v5, %v3690_v17  ;;  %v1417_v29 = vmul.f32 %v1353_v61, %v905_v15  ;;  %v1002_v60 = vmul.f32 0.044715, %v3694_v50 }
 0x209   : > { %v2792_v42 = vpop.eup %2791  ;;  %2799 = vtanh.f32 %v1250_v30  ;;  %v1254_v49 = vmul.f32 0.7978846, %v1190_v57  ;;  %2046 = vmatprep.mubr.bf16.mxu0 %v1470_v59  ;;  %v1421_v39 = vmul.f32 %v1357_v35, %v909_v34  ;;  %v1005_v44 = vmul.f32 0.044715, %v3700_v23 }
 0x20a   : > { %v2794_v19 = vpop.eup %2793  ;;  %2801 = vtanh.f32 %v1253_v2  ;;  %v1193_v45 = vadd.f32 %v1129_v21, %v3690_v17  ;;  %v1066_v18 = vmul.f32 %v1002_v60, %v3694_v50  ;;  %v1006_v12 = vmul.f32 0.044715, %v3705_v3 }
 0x20b   : > { %v2796_v53 = vpop.eup %2795  ;;  %2803 = vtanh.f32 %v1254_v49  ;;  %v1469_v11 = vpack.c.bf16 %v1421_v39, %v1417_v29  ;;  %v1069_v9 = vmul.f32 %v1005_v44, %v3700_v23  ;;  %v914_v7 = vmul.f32 0.5, %v3601_v51 }
 0x20c   : > { %v1257_v16 = vmul.f32 0.7978846, %v1193_v45  ;;  %v1130_v32 = vmul.f32 %v1066_v18, %v3694_v50  ;;  %v918_v52 = vmul.f32 0.5, %v3612_v1  ;;  %v1070_v43 = vmul.f32 %v1006_v12, %v3705_v3 }
 0x20d   : > { %2047 = vmatmul.mubr.bf16.gmra.mrb[12].mxu0 %v1469_v11  ;;  %v1133_v26 = vmul.f32 %v1069_v9, %v3700_v23  ;;  %v1362_v25 = vadd.f32 1.0, %v3716_v13  ;;  %v1366_v6 = vadd.f32 1.0, %v2788_v47  ;;  %v913_v46 = vmul.f32 0.5, %v3596_v0 }
 0x20e   : > { %v2798_v54 = vpop.eup %2797  ;;  %2805 = vtanh.f32 %v1257_v16  ;;  %v1194_v40 = vadd.f32 %v1130_v32, %v3694_v50  ;;  %v917_v55 = vmul.f32 0.5, %v3605_v41  ;;  %v1134_v1 = vmul.f32 %v1070_v43, %v3705_v3 }
 0x20f   : > { %v1197_v51 = vadd.f32 %v1133_v26, %v3700_v23  ;;  %v1426_v27 = vmul.f32 %v1362_v25, %v914_v7  ;;  %v1430_v62 = vmul.f32 %v1366_v6, %v918_v52  ;;  %v1361_v15 = vadd.f32 1.0, %v3707_v33 }
 0x210   : > { %v1258_v8 = vmul.f32 0.7978846, %v1194_v40  ;;  %v1365_v13 = vadd.f32 1.0, %v3719_v38  ;;  %v922_v47 = vmul.f32 0.5, %v3635_v48  ;;  %v1198_v10 = vadd.f32 %v1134_v1, %v3705_v3 }
 0x211   : > { %v1261_v20 = vmul.f32 0.7978846, %v1197_v51  ;;  %v1474_v24 = vpack.c.bf16 %v1430_v62, %v1426_v27  ;;  %v926_v0 = vmul.f32 0.5, %v3645_v14  ;;  %v1425_v41 = vmul.f32 %v1361_v15, %v913_v46 }
 0x212   : > { %2807 = vtanh.f32 %v1258_v8  ;;  %v1429_v63 = vmul.f32 %v1365_v13, %v917_v55  ;;  %v1370_v58 = vadd.f32 1.0, %v2792_v42  ;;  %v1262_v34 = vmul.f32 0.7978846, %v1198_v10 }
 0x213   : > { %v2800_v5 = vpop.eup %2799  ;;  %2809 = vtanh.f32 %v1261_v20  ;;  %2056 = vmatprep.mubr.bf16.mxu0 %v1474_v24  ;;  %v1374_v61 = vadd.f32 1.0, %v2796_v53  ;;  %v921_v33 = vmul.f32 0.5, %v3627_v36  ;;  %v925_v57 = vmul.f32 0.5, %v3639_v4 }
 0x214   : > { %v2802_v38 = vpop.eup %2801  ;;  %v1473_v30 = vpack.c.bf16 %v1429_v63, %v1425_v41  ;;  %v1434_v48 = vmul.f32 %v1370_v58, %v922_v47  ;;  %v1369_v59 = vadd.f32 1.0, %v3735_v22  ;;  %2811 = vtanh.f32 %v1262_v34 }
 0x215   : > { %v2804_v35 = vpop.eup %2803  ;;  %v1438_v14 = vmul.f32 %v1374_v61, %v926_v0  ;;  %v1373_v2 = vadd.f32 1.0, %v2794_v19  ;;  %v930_v21 = vmul.f32 0.5, %v3666_v37  ;;  %v934_v60 = vmul.f32 0.5, %v3673_v28 }
 0x216   : > { %2057 = vmatmul.mubr.bf16.gmra.mrb[16].mxu0 %v1473_v30  ;;  %v1433_v29 = vmul.f32 %v1369_v59, %v921_v33  ;;  %v1378_v42 = vadd.f32 1.0, %v2800_v5  ;;  %v1382_v49 = vadd.f32 1.0, %v2804_v35  ;;  %v929_v44 = vmul.f32 0.5, %v3662_v31 }
 0x217   : > { %v1478_v36 = vpack.c.bf16 %v1438_v14, %v1434_v48  ;;  %v1437_v39 = vmul.f32 %v1373_v2, %v925_v57  ;;  %v933_v4 = vmul.f32 0.5, %v3670_v56  ;;  %v1377_v53 = vadd.f32 1.0, %v2798_v54 }
 0x218   : > { %v2806_v45 = vpop.eup %2805  ;;  %v1442_v22 = vmul.f32 %v1378_v42, %v930_v21  ;;  %v1446_v18 = vmul.f32 %v1382_v49, %v934_v60  ;;  %v1381_v11 = vadd.f32 1.0, %v2802_v38  ;;  %v937_v31 = vmul.f32 0.5, %v3690_v17 }
 0x219   : > { %2066 = vmatprep.mubr.bf16.mxu0 %v1478_v36  ;;  %v1477_v19 = vpack.c.bf16 %v1437_v39, %v1433_v29  ;;  %v1441_v9 = vmul.f32 %v1377_v53, %v929_v44  ;;  %v1385_v32 = vadd.f32 1.0, %v2806_v45  ;;  %v941_v56 = vmul.f32 0.5, %v3700_v23 }
 0x21a   : > { %v1482_v37 = vpack.c.bf16 %v1446_v18, %v1442_v22  ;;  %v1445_v12 = vmul.f32 %v1381_v11, %v933_v4  ;;  %v942_v25 = vmul.f32 0.5, %v3705_v3  ;;  %v938_v6 = vmul.f32 0.5, %v3694_v50 }
 0x21b   : > { %v1449_v40 = vmul.f32 %v1385_v32, %v937_v31 }
 0x21c   : > { %v2808_v16 = vpop.eup %2807  ;;  %v1481_v28 = vpack.c.bf16 %v1445_v12, %v1441_v9 }
 0x21d   : > { %v2810_v7 = vpop.eup %2809  ;;  %v1386_v52 = vadd.f32 1.0, %v2808_v16 }
 0x21e   : > { %2067 = vmatmul.mubr.bf16.gmra.mrb[20].mxu0 %v1477_v19  ;;  %v1389_v26 = vadd.f32 1.0, %v2810_v7  ;;  %v2812_v43 = vpop.eup %2811 }
 0x21f   : > { %2076 = vmatprep.mubr.bf16.mxu0 %v1482_v37  ;;  %v1390_v54 = vadd.f32 1.0, %v2812_v43  ;;  %v1450_v55 = vmul.f32 %v1386_v52, %v938_v6 }
 0x220   : > { %v1453_v46 = vmul.f32 %v1389_v26, %v941_v56 }
 0x221   : > { %v1454_v51 = vmul.f32 %v1390_v54, %v942_v25 }
 0x222   : > { %v1485_v1 = vpack.c.bf16 %v1453_v46, %v1449_v40 }
 0x223   : > { %v1486_v27 = vpack.c.bf16 %v1454_v51, %v1450_v55 }
 0x226   : > { %2077 = vmatmul.mubr.bf16.gmra.mrb[24].mxu0 %v1481_v28 }
 0x227   : > { %2086 = vmatprep.mubr.bf16.mxu0 %v1486_v27 }
 0x22e   : > { %2087 = vmatmul.mubr.bf16.gmra.mrb[28].mxu0 %v1485_v1 }
 0x2c4   : > { %v2018_v17 = vpop.f32.mrb[0].mxu0 }
 0x2c5   : > { %2097 = vst [vmem:[%s3779_s18] sm:$0xff] %v2018_v17  ;;  %v2020_v50 = vpop.f32.mrb[1].mxu0 }
 0x2c6   : > { %2098 = vst [vmem:[%s3779_s18 + $0x8] sm:$0xff] %v2020_v50  ;;  %v2022_v23 = vpop.f32.mrb[2].mxu0 }
 0x2c7   : > { %2099 = vst [vmem:[%s3779_s18 + $0x10] sm:$0xff] %v2022_v23  ;;  %v2024_v3 = vpop.f32.mrb[3].mxu0 }
 0x2c8   : > { %2100 = vst [vmem:[%s3779_s18 + $0x18] sm:$0xff] %v2024_v3 }
 0x2ce   : > { %v2028_v62 = vpop.f32.mrb[4].mxu0 }
 0x2cf   : > { %2101 = vst [vmem:[%s3779_s18 + $0x20] sm:$0xff] %v2028_v62  ;;  %v2030_v8 = vpop.f32.mrb[5].mxu0 }
 0x2d0   : > { %2102 = vst [vmem:[%s3779_s18 + $0x28] sm:$0xff] %v2030_v8  ;;  %v2032_v15 = vpop.f32.mrb[6].mxu0 }
 0x2d1   : > { %2103 = vst [vmem:[%s3779_s18 + $0x30] sm:$0xff] %v2032_v15  ;;  %v2034_v13 = vpop.f32.mrb[7].mxu0 }
 0x2d2   : > { %2104 = vst [vmem:[%s3779_s18 + $0x38] sm:$0xff] %v2034_v13 }
 0x2d7   : > { %v2038_v47 = vpop.f32.mrb[8].mxu0 }
 0x2d8   : > { %2105 = vst [vmem:[%s3779_s18 + $0x40] sm:$0xff] %v2038_v47  ;;  %v2040_v20 = vpop.f32.mrb[9].mxu0 }
 0x2d9   : > { %2106 = vst [vmem:[%s3779_s18 + $0x48] sm:$0xff] %v2040_v20  ;;  %v2042_v10 = vpop.f32.mrb[10].mxu0 }
 0x2da   : > { %2107 = vst [vmem:[%s3779_s18 + $0x50] sm:$0xff] %v2042_v10  ;;  %v2044_v24 = vpop.f32.mrb[11].mxu0 }
 0x2db   : > { %2108 = vst [vmem:[%s3779_s18 + $0x58] sm:$0xff] %v2044_v24 }
 0x2e0   : > { %v2048_v0 = vpop.f32.mrb[12].mxu0 }
 0x2e1   : > { %2109 = vst [vmem:[%s3779_s18 + $0x60] sm:$0xff] %v2048_v0  ;;  %v2050_v41 = vpop.f32.mrb[13].mxu0 }
 0x2e2   : > { %2110 = vst [vmem:[%s3779_s18 + $0x68] sm:$0xff] %v2050_v41  ;;  %v2052_v63 = vpop.f32.mrb[14].mxu0 }
 0x2e3   : > { %2111 = vst [vmem:[%s3779_s18 + $0x70] sm:$0xff] %v2052_v63  ;;  %v2054_v58 = vpop.f32.mrb[15].mxu0 }
 0x2e4   : > { %2112 = vst [vmem:[%s3779_s18 + $0x78] sm:$0xff] %v2054_v58 }
 0x2e9   : > { %v2058_v5 = vpop.f32.mrb[16].mxu0 }
 0x2ea   : > { %2113 = vst [vmem:[%s3779_s18 + $0x80] sm:$0xff] %v2058_v5  ;;  %v2060_v34 = vpop.f32.mrb[17].mxu0 }
 0x2eb   : > { %2114 = vst [vmem:[%s3779_s18 + $0x88] sm:$0xff] %v2060_v34  ;;  %v2062_v61 = vpop.f32.mrb[18].mxu0 }
 0x2ec   : > { %2115 = vst [vmem:[%s3779_s18 + $0x90] sm:$0xff] %v2062_v61  ;;  %v2064_v33 = vpop.f32.mrb[19].mxu0 }
 0x2ed   : > { %2116 = vst [vmem:[%s3779_s18 + $0x98] sm:$0xff] %v2064_v33 }
 0x2f1   : > { %v2068_v38 = vpop.f32.mrb[20].mxu0 }
 0x2f2   : > { %2117 = vst [vmem:[%s3779_s18 + $0xa0] sm:$0xff] %v2068_v38  ;;  %v2070_v30 = vpop.f32.mrb[21].mxu0 }
 0x2f3   : > { %2118 = vst [vmem:[%s3779_s18 + $0xa8] sm:$0xff] %v2070_v30  ;;  %v2072_v48 = vpop.f32.mrb[22].mxu0 }
 0x2f4   : > { %2119 = vst [vmem:[%s3779_s18 + $0xb0] sm:$0xff] %v2072_v48  ;;  %v2074_v57 = vpop.f32.mrb[23].mxu0 }
 0x2f5   : > { %2120 = vst [vmem:[%s3779_s18 + $0xb8] sm:$0xff] %v2074_v57 }
 0x2f9   : > { %v2078_v59 = vpop.f32.mrb[24].mxu0 }
 0x2fa   : > { %2121 = vst [vmem:[%s3779_s18 + $0xc0] sm:$0xff] %v2078_v59  ;;  %v2080_v35 = vpop.f32.mrb[25].mxu0 }
 0x2fb   : > { %2122 = vst [vmem:[%s3779_s18 + $0xc8] sm:$0xff] %v2080_v35  ;;  %v2082_v14 = vpop.f32.mrb[26].mxu0 }
 0x2fc   : > { %2123 = vst [vmem:[%s3779_s18 + $0xd0] sm:$0xff] %v2082_v14  ;;  %v2084_v2 = vpop.f32.mrb[27].mxu0 }
 0x2fd   : > { %2124 = vst [vmem:[%s3779_s18 + $0xd8] sm:$0xff] %v2084_v2 }
 0x301   : > { %v2088_v21 = vpop.f32.mrb[28].mxu0 }
 0x302   : > { %2125 = vst [vmem:[%s3779_s18 + $0xe0] sm:$0xff] %v2088_v21  ;;  %v2090_v29 = vpop.f32.mrb[29].mxu0 }
 0x303   : > { %2126 = vst [vmem:[%s3779_s18 + $0xe8] sm:$0xff] %v2090_v29  ;;  %v2092_v60 = vpop.f32.mrb[30].mxu0 }
 0x304   : > { %2127 = vst [vmem:[%s3779_s18 + $0xf0] sm:$0xff] %v2092_v60  ;;  %v2094_v42 = vpop.f32.mrb[31].mxu0 }
 0x305   : > { %2128 = vst [vmem:[%s3779_s18 + $0xf8] sm:$0xff] %v2094_v42 }
 0x306   : > { %2912 = shalt.err (!%p2909_p7)
}
 0x307   : > { %s2913_s23 = scalar_lea.hbm %s3815_s22, 4096  ;;  %s2917_s28 = scalar_lea.hbm %s3866_s3, 16384 }
 0x308   : > { %p2914_p9 = scmp.ne.s32.totalorder %s3815_s22, %s2913_s23  ;;  %p2918_p5 = scmp.lt.u32.totalorder %s3815_s22, %s3866_s3 }
 0x309   : > { %p2919_p10 = scmp.lt.u32.totalorder %s2917_s28, %s2913_s23  ;;  %p2921_p2 = scmp.lt.u32.totalorder %s2913_s23, %s3815_s22 }
 0x30a   : > { %p2915_p12 = pnand %p2914_p9, %p3119_p8 }
 0x30b   : > { %p2920_p1 = por %p2919_p10, %p2918_p5 }
 0x30c   : > { %p2916_p0 = pneg %p2915_p12 }
 0x30d   : > { %p2922_p4 = por %p2921_p2, %p2920_p1 }
 0x30f   : > { %p2923_p6 = pnand %p2922_p4, %p2916_p0 }
 0x311   : > { %2926 = shalt.err (!%p2923_p6)
}
 0x312   : > { %s2979_s29 = smov 256   ;;  %s2980_s18 = smov 16  }
 0x313   : > { %2430 = dma.vmem_to_hbm [thread:$0]  (%p3119_p8), %s3817_s7, 4096, %s3815_s22, %s2130_s16, %s2979_s29, %s2979_s29, %s2980_s18  }
 0x314 PF: > { %p2452_p11 = scmp.ge.s32.totalorder %s2969_s15, 2  ;;  %s2159_s20 = sand.u32 1, %s2957_s12  }
 0x315   : > { %p3881_p13 = scmp.ne.s32.totalorder %s3871_s19, 0  ;;  %s2160_s8 = scalar_lea.sflag [#allocation4], %s2159_s20 }
 0x317   : > { %p2444_p3 = pnand %p2452_p11, %p3881_p13 }
 0x319   : > { %2952 = dma.done.wait (!%p2444_p3), %s2160_s8, 4096  }
 0x31a   : > { %2954 = vsyncadd (!%p2444_p3), %s2160_s8, 4294963200  ;;  %p17_p7 = scmp.ge.s32.totalorder %s3106_s6, 6   ;;  %s3882_s12 = smov %s2961_s13 }
 0x31b   : > { %s3883_s13 = smov %s2965_s14  ;;  %s3884_s14 = smov %s3115_s11 }
 0x31c   : > { %s3885_s15 = smov %s3106_s6  ;;  %19 = sbr.rel (!%p17_p7) target bundleno = 6 (0x6), region = 85 }
 0x323   :  { %2165 = vsyncpa [#allocation3], 1 }
 0x324   :  { %2167 = vsyncpa [#allocation3 + $0x1], 1 }
 0x325   :  { %2168 = vsyncpa [#allocation6], 1 }
 0x326   :  { %2169 = vsyncpa [#allocation4], 1 }
 0x327   :  { %2171 = vsyncpa [#allocation4 + $0x1], 1 }

</bundles_post_ra>
